<compile_context>
chip_gen: v7x
topology: tpu7x:2x2x1
jax: 0.10.0
libtpu: 0.0.40
codegen_flags: <defaults>
</compile_context>

<pallas_src>
import functools

import jax
import jax.numpy as jnp
import numpy as np
from jax.experimental import pallas as pl
from jax.experimental.pallas import tpu as pltpu

EPS = 1e-5
LANES = 128
# Row-tile cap (TH * W).  4096 keeps the per-step VMEM footprint (~20 MiB with
# the im2col LHS and double-buffered in/out blocks) inside the v7x budget.
MAX_TILE_ROWS = 4096
VMEM_LIMIT = 48 * 1024 * 1024


def _round_up(x, m):
    return (x + m - 1) // m * m


def _pick_th(H, W):
    """Largest divisor of H with TH * W <= MAX_TILE_ROWS."""
    # TODO(synk): support non-divisor H via a cdiv grid + masked tail tile so
    # awkward H (e.g. prime) does not collapse toward TH == 1.
    max_rows = max(1, MAX_TILE_ROWS // max(W, 1))
    th = 1
    for d in range(1, H + 1):
        if H % d == 0 and d <= max_rows:
            th = d
    return th


def _conv_kernel(main_ref, top_ref, bot_ref, w_ref, scale_ref, shift_ref,
                 y_ref, stats_ref, src_buf, *, TH, W, apply_act):
    """One (image, row-tile) step.

    main_ref  : (1, TH, W, Cin)   rows [h0, h0+TH) of this stage's input
    top_ref   : (1, 1,  W, Cin)   row max(h0-1, 0)     (zeroed when ht == 0)
    bot_ref   : (1, 1,  W, Cin)   row min(h0+TH, H-1)  (zeroed when ht == last)
    w_ref     : (9*Cin, Cpad)     bf16 weights, row index = (dy*3+dx)*Cin + c
    scale_ref : (1, Cin)          previous-stage BN scale (used iff apply_act)
    shift_ref : (1, Cin)          previous-stage BN shift (used iff apply_act)
    y_ref     : (1, TH, W, Cpad)  raw (un-normalized) conv output tile (bf16)
    stats_ref : (1, 1, 2, Cpad)   per-tile [sum, sum-of-squares] (f32)
    src_buf   : VMEM (TH+2, W+2, Cin) bf16: assembled halo'd (activated) source
    """
    ht = pl.program_id(1)
    last = pl.num_programs(1) - 1
    cin = main_ref.shape[-1]
    cpad = y_ref.shape[-1]

    def prep(v):
        if apply_act:
            # Fused BN affine + ReLU of the previous conv stage.
            v = jnp.maximum(
                v.astype(jnp.float32) * scale_ref[...] + shift_ref[...], 0.0)
        return v.astype(jnp.bfloat16)

    # Assemble the zero-halo'd (and, for stage 2, BN+ReLU'd) source tile.
    src_buf[1:TH + 1, 1:W + 1, :] = prep(main_ref[0])
    src_buf[0:1, 1:W + 1, :] = prep(top_ref[0])
    src_buf[TH + 1:TH + 2, 1:W + 1, :] = prep(bot_ref[0])
    zcol = jnp.zeros((TH + 2, 1, cin), jnp.bfloat16)
    src_buf[:, 0:1, :] = zcol
    src_buf[:, W + 1:W + 2, :] = zcol

    @pl.when(ht == 0)
    def _():
        src_buf[0:1, :, :] = jnp.zeros((1, W + 2, cin), jnp.bfloat16)

    @pl.when(ht == last)
    def _():
        src_buf[TH + 1:TH + 2, :, :] = jnp.zeros((1, W + 2, cin), jnp.bfloat16)

    src = src_buf[...]                                    # (TH+2, W+2, Cin)

    # im2col: fold all 9 taps into one MXU contraction of depth 9*Cin.
    cols = []
    for dy in range(3):
        for dx in range(3):
            cols.append(src[dy:dy + TH, dx:dx + W, :])
    lhs = jnp.concatenate(cols, axis=-1).reshape(TH * W, 9 * cin)
    acc = jnp.dot(lhs, w_ref[...], preferred_element_type=jnp.float32)

    # Streaming per-channel partial stats for the global two-pass BatchNorm.
    # (f32 partial sums; var is formed later as E[y^2] - mean^2 -- adequate at
    # bf16-level accuracy; a Welford combine would be sturdier for huge N*H*W.)
    s1 = jnp.sum(acc, axis=0, keepdims=True)
    s2 = jnp.sum(acc * acc, axis=0, keepdims=True)
    stats_ref[...] = jnp.concatenate([s1, s2], axis=0).reshape(1, 1, 2, cpad)

    y_ref[...] = acc.reshape(1, TH, W, cpad).astype(y_ref.dtype)


def _conv_stage(x_img, wmat, scale, shift, *, apply_act, TH, cpad):
    """3x3 conv (stride 1, pad 1) over NHWC bf16 input + per-tile BN stats."""
    N, H, W, cin = x_img.shape
    n_ht = H // TH
    kernel = functools.partial(_conv_kernel, TH=TH, W=W, apply_act=apply_act)
    y, stats = pl.pallas_call(
        kernel,
        grid=(N, n_ht),
        in_specs=[
            # Main TH rows + two 1-row halos, all auto-pipelined (Pallas
            # double-buffers them => the HBM fetch overlaps compute).
            pl.BlockSpec((1, TH, W, cin), lambda n, h: (n, h, 0, 0)),
            pl.BlockSpec((1, 1, W, cin),
                         lambda n, h: (n, jnp.maximum(h * TH - 1, 0), 0, 0)),
            pl.BlockSpec((1, 1, W, cin),
                         lambda n, h: (n, jnp.minimum(h * TH + TH, H - 1), 0, 0)),
            pl.BlockSpec((9 * cin, cpad), lambda n, h: (0, 0)),  # weights (resident)
            pl.BlockSpec((1, cin), lambda n, h: (0, 0)),         # prev-stage BN scale
            pl.BlockSpec((1, cin), lambda n, h: (0, 0)),         # prev-stage BN shift
        ],
        out_specs=[
            pl.BlockSpec((1, TH, W, cpad), lambda n, h: (n, h, 0, 0)),
            pl.BlockSpec((1, 1, 2, cpad), lambda n, h: (n, h, 0, 0)),
        ],
        out_shape=[
            jax.ShapeDtypeStruct((N, H, W, cpad), jnp.bfloat16),
            jax.ShapeDtypeStruct((N, n_ht, 2, cpad), jnp.float32),
        ],
        scratch_shapes=[pltpu.VMEM((TH + 2, W + 2, cin), jnp.bfloat16)],
        compiler_params=pltpu.CompilerParams(
            dimension_semantics=("parallel", "parallel"),
            vmem_limit_bytes=VMEM_LIMIT,
        ),
    )(x_img, x_img, x_img, wmat, scale, shift)
    return y, stats


def _prep_weight(w_oihw, cin_pad, cout_pad):
    """PyTorch (O, I, 3, 3) -> (9*cin_pad, cout_pad) bf16, row = (dy*3+dx)*cin_pad + c."""
    O, I, KH, KW = w_oihw.shape
    m = jnp.transpose(w_oihw, (2, 3, 1, 0))                      # (3, 3, I, O)
    m = jnp.pad(m, ((0, 0), (0, 0), (0, cin_pad - I), (0, cout_pad - O)))
    return m.reshape(KH * KW * cin_pad, cout_pad).astype(jnp.bfloat16)


def _bn_affine(stats, gamma, beta, count, cpad):
    """Reduce per-tile partial stats -> per-channel BN scale/shift (training mode)."""
    s = jnp.sum(stats, axis=(0, 1))                      # (2, Cpad)
    mean = s[0] / count
    var = jnp.maximum(s[1] / count - mean * mean, 0.0)   # biased variance
    # gamma/beta zero-padded => scale = shift = 0 on padded channels.
    g = jnp.pad(gamma.astype(jnp.float32), (0, cpad - gamma.shape[0]))
    b = jnp.pad(beta.astype(jnp.float32), (0, cpad - beta.shape[0]))
    scale = g * jax.lax.rsqrt(var + EPS)
    shift = b - mean * scale
    return scale.reshape(1, cpad), shift.reshape(1, cpad)


@jax.jit
def conv_block_forward(x_nchw, w1, g1, b1, w2, g2, b2):
    """Equivalent of conv_block.forward.  x_nchw: (N, C_in, H, W) float32."""
    N, cin, H, W = x_nchw.shape
    cout = w1.shape[0]
    cpad = _round_up(cout, LANES)
    TH = _pick_th(H, W)
    count = float(N * H * W)

    # NCHW -> NHWC, bf16 (halves the stage-1 input DMA; matmuls are bf16 anyway).
    x = jnp.transpose(x_nchw, (0, 2, 3, 1)).astype(jnp.bfloat16)

    zeros_s = jnp.zeros((1, cin), jnp.float32)   # stage-1: no input activation

    # Stage 1: conv(in_c -> out_c); BN1 partial stats gathered on the fly.
    w1m = _prep_weight(w1, cin, cpad)
    y1, st1 = _conv_stage(x, w1m, zeros_s, zeros_s,
                          apply_act=False, TH=TH, cpad=cpad)
    scale1, shift1 = _bn_affine(st1, g1, b1, count, cpad)

    # Stage 2: BN1 + ReLU fused into the conv kernel's input path,
    # conv(out_c -> out_c).  y1 consumed directly (bf16, unpadded) from HBM.
    w2m = _prep_weight(w2, cpad, cpad)
    y2, st2 = _conv_stage(y1, w2m, scale1, shift1,
                          apply_act=True, TH=TH, cpad=cpad)
    scale2, shift2 = _bn_affine(st2, g2, b2, count, cpad)

    # Final BN2 + ReLU in plain JAX so XLA fuses it with the channel slice and
    # the NCHW transpose (no extra Pallas elementwise pass over the output).
    y2v = y2[..., :cout].astype(jnp.float32)
    out = jnp.maximum(y2v * scale2[0, :cout] + shift2[0, :cout], 0.0)
    return jnp.transpose(out, (0, 3, 1, 2))


def _reference(x, w1, g1, b1, w2, g2, b2):
    """Pure-JAX reference mirroring PyTorch training-mode forward."""
    def conv(x, w):
        return jax.lax.conv_general_dilated(
            x, w, window_strides=(1, 1), padding=((1, 1), (1, 1)),
            dimension_numbers=("NCHW", "OIHW", "NCHW"))

    def bn_relu(y, g, b):
        mean = jnp.mean(y, axis=(0, 2, 3), keepdims=True)
        var = jnp.mean((y - mean) ** 2, axis=(0, 2, 3), keepdims=True)
        yn = (y - mean) * jax.lax.rsqrt(var + EPS)
        return jnp.maximum(yn * g.reshape(1, -1, 1, 1) + b.reshape(1, -1, 1, 1), 0.0)

    y = bn_relu(conv(x, w1), g1, b1)
    return bn_relu(conv(y, w2), g2, b2)


if __name__ == "__main__":
    key = jax.random.PRNGKey(0)
    k_x, k_w1, k_w2 = jax.random.split(key, 3)

    N, in_c, out_c, H, W = 2, 4, 8, 16, 16

    x = jax.random.normal(k_x, (N, in_c, H, W), dtype=jnp.float32)
    # Conv weights (shapes per nn.Conv2d(in, out, 3, 1, 1, bias=False))
    w1 = 0.1 * jax.random.normal(k_w1, (out_c, in_c, 3, 3), dtype=jnp.float32)
    w2 = 0.1 * jax.random.normal(k_w2, (out_c, out_c, 3, 3), dtype=jnp.float32)
    # BatchNorm affine params: PyTorch default init (weight=1, bias=0)
    g1 = jnp.ones((out_c,), jnp.float32)
    b1 = jnp.zeros((out_c,), jnp.float32)
    g2 = jnp.ones((out_c,), jnp.float32)
    b2 = jnp.zeros((out_c,), jnp.float32)

    out = conv_block_forward(x, w1, g1, b1, w2, g2, b2)
    out = jax.block_until_ready(out)

    ref = jax.block_until_ready(_reference(x, w1, g1, b1, w2, g2, b2))

    assert out.shape == (N, out_c, H, W), out.shape
    assert bool(jnp.all(jnp.isfinite(out)))
    # Tolerance reflects the deliberate bf16 matmul-operand / bf16 intermediate-
    # storage trade-off (f32 would match tighter but double HBM traffic).
    assert np.allclose(np.asarray(out), np.asarray(ref), atol=4e-2, rtol=4e-2), \
        float(np.max(np.abs(np.asarray(out) - np.asarray(ref))))

    print("KERNEL_OK")
</pallas_src>

<mosaic_0001>
module attributes {stable_mosaic.version = 11 : i64} {
  func.func @_conv_kernel(%arg0: i32, %arg1: i32, %arg2: memref<1x16x16x128xbf16, #tpu.memory_space<vmem>>, %arg3: memref<1x1x16x128xbf16, #tpu.memory_space<vmem>>, %arg4: memref<1x1x16x128xbf16, #tpu.memory_space<vmem>>, %arg5: memref<1152x128xbf16, #tpu.memory_space<vmem>>, %arg6: memref<1x128xf32, #tpu.memory_space<vmem>>, %arg7: memref<1x128xf32, #tpu.memory_space<vmem>>, %arg8: memref<1x16x16x128xbf16, #tpu.memory_space<vmem>>, %arg9: memref<1x1x2x128xf32, #tpu.memory_space<vmem>>, %arg10: memref<18x18x128xbf16, #tpu.memory_space<vmem>>) attributes {dimension_semantics = [#tpu.dimension_semantics<parallel>, #tpu.dimension_semantics<parallel>], iteration_bounds = array<i64: 2, 1>, scalar_prefetch = 0 : i64, scratch_operands = 1 : i64, tpu.core_type = #tpu.core_type<tc>, window_params = [{transform_indices = @transform_0, window_bounds = array<i64: 1, 16, 16, 128>}, {transform_indices = @transform_1, window_bounds = array<i64: 1, 1, 16, 128>}, {transform_indices = @transform_2, window_bounds = array<i64: 1, 1, 16, 128>}, {pipeline_mode = #tpu.pipeline_mode<synchronous>, transform_indices = @transform_3, window_bounds = array<i64: 1152, 128>}, {pipeline_mode = #tpu.pipeline_mode<synchronous>, transform_indices = @transform_4, window_bounds = array<i64: 1, 128>}, {pipeline_mode = #tpu.pipeline_mode<synchronous>, transform_indices = @transform_5, window_bounds = array<i64: 1, 128>}, {transform_indices = @transform_6, window_bounds = array<i64: 1, 16, 16, 128>}, {transform_indices = @transform_7, window_bounds = array<i64: 1, 1, 2, 128>}]} {
    %c0 = arith.constant 0 : index
    %c0_0 = arith.constant 0 : index
    %c0_1 = arith.constant 0 : index
    %c0_2 = arith.constant 0 : index
    %0 = vector.load %arg2[%c0, %c0_0, %c0_1, %c0_2] : memref<1x16x16x128xbf16, #tpu.memory_space<vmem>>, vector<1x16x16x128xbf16>
    %1 = vector.shape_cast %0 : vector<1x16x16x128xbf16> to vector<16x16x128xbf16>
    %2 = arith.extf %1 : vector<16x16x128xbf16> to vector<16x16x128xf32>
    %c0_3 = arith.constant 0 : index
    %c0_4 = arith.constant 0 : index
    %3 = vector.load %arg6[%c0_3, %c0_4] : memref<1x128xf32, #tpu.memory_space<vmem>>, vector<1x128xf32>
    %4 = vector.shape_cast %3 : vector<1x128xf32> to vector<1x1x128xf32>
    %5 = vector.broadcast %4 : vector<1x1x128xf32> to vector<16x16x128xf32>
    %6 = arith.mulf %2, %5 : vector<16x16x128xf32>
    %c0_5 = arith.constant 0 : index
    %c0_6 = arith.constant 0 : index
    %7 = vector.load %arg7[%c0_5, %c0_6] : memref<1x128xf32, #tpu.memory_space<vmem>>, vector<1x128xf32>
    %8 = vector.shape_cast %7 : vector<1x128xf32> to vector<1x1x128xf32>
    %9 = vector.broadcast %8 : vector<1x1x128xf32> to vector<16x16x128xf32>
    %10 = arith.addf %6, %9 : vector<16x16x128xf32>
    %cst = arith.constant 0.000000e+00 : f32
    %11 = vector.broadcast %cst : f32 to vector<16x16x128xf32>
    %12 = arith.maximumf %10, %11 : vector<16x16x128xf32>
    %13 = arith.truncf %12 : vector<16x16x128xf32> to vector<16x16x128xbf16>
    %c1 = arith.constant 1 : index
    %c1_7 = arith.constant 1 : index
    %c0_8 = arith.constant 0 : index
    %14 = vector.load %arg10[%c1, %c1_7, %c0_8] : memref<18x18x128xbf16, #tpu.memory_space<vmem>>, vector<16x16x128xbf16>
    tpu.vector_store %arg10[%c1, %c1_7, %c0_8], %13 {strides = array<i32>} : memref<18x18x128xbf16, #tpu.memory_space<vmem>>, vector<16x16x128xbf16>,
    %c0_9 = arith.constant 0 : index
    %c0_10 = arith.constant 0 : index
    %c0_11 = arith.constant 0 : index
    %c0_12 = arith.constant 0 : index
    %15 = vector.load %arg3[%c0_9, %c0_10, %c0_11, %c0_12] : memref<1x1x16x128xbf16, #tpu.memory_space<vmem>>, vector<1x1x16x128xbf16>
    %16 = vector.shape_cast %15 : vector<1x1x16x128xbf16> to vector<1x16x128xbf16>
    %17 = arith.extf %16 : vector<1x16x128xbf16> to vector<1x16x128xf32>
    %c0_13 = arith.constant 0 : index
    %c0_14 = arith.constant 0 : index
    %18 = vector.load %arg6[%c0_13, %c0_14] : memref<1x128xf32, #tpu.memory_space<vmem>>, vector<1x128xf32>
    %19 = vector.shape_cast %18 : vector<1x128xf32> to vector<1x1x128xf32>
    %20 = vector.broadcast %19 : vector<1x1x128xf32> to vector<1x16x128xf32>
    %21 = arith.mulf %17, %20 : vector<1x16x128xf32>
    %c0_15 = arith.constant 0 : index
    %c0_16 = arith.constant 0 : index
    %22 = vector.load %arg7[%c0_15, %c0_16] : memref<1x128xf32, #tpu.memory_space<vmem>>, vector<1x128xf32>
    %23 = vector.shape_cast %22 : vector<1x128xf32> to vector<1x1x128xf32>
    %24 = vector.broadcast %23 : vector<1x1x128xf32> to vector<1x16x128xf32>
    %25 = arith.addf %21, %24 : vector<1x16x128xf32>
    %cst_17 = arith.constant 0.000000e+00 : f32
    %26 = vector.broadcast %cst_17 : f32 to vector<1x16x128xf32>
    %27 = arith.maximumf %25, %26 : vector<1x16x128xf32>
    %28 = arith.truncf %27 : vector<1x16x128xf32> to vector<1x16x128xbf16>
    %c0_18 = arith.constant 0 : index
    %c1_19 = arith.constant 1 : index
    %c0_20 = arith.constant 0 : index
    %29 = vector.load %arg10[%c0_18, %c1_19, %c0_20] : memref<18x18x128xbf16, #tpu.memory_space<vmem>>, vector<1x16x128xbf16>
    tpu.vector_store %arg10[%c0_18, %c1_19, %c0_20], %28 {strides = array<i32>} : memref<18x18x128xbf16, #tpu.memory_space<vmem>>, vector<1x16x128xbf16>,
    %c0_21 = arith.constant 0 : index
    %c0_22 = arith.constant 0 : index
    %c0_23 = arith.constant 0 : index
    %c0_24 = arith.constant 0 : index
    %30 = vector.load %arg4[%c0_21, %c0_22, %c0_23, %c0_24] : memref<1x1x16x128xbf16, #tpu.memory_space<vmem>>, vector<1x1x16x128xbf16>
    %31 = vector.shape_cast %30 : vector<1x1x16x128xbf16> to vector<1x16x128xbf16>
    %32 = arith.extf %31 : vector<1x16x128xbf16> to vector<1x16x128xf32>
    %c0_25 = arith.constant 0 : index
    %c0_26 = arith.constant 0 : index
    %33 = vector.load %arg6[%c0_25, %c0_26] : memref<1x128xf32, #tpu.memory_space<vmem>>, vector<1x128xf32>
    %34 = vector.shape_cast %33 : vector<1x128xf32> to vector<1x1x128xf32>
    %35 = vector.broadcast %34 : vector<1x1x128xf32> to vector<1x16x128xf32>
    %36 = arith.mulf %32, %35 : vector<1x16x128xf32>
    %c0_27 = arith.constant 0 : index
    %c0_28 = arith.constant 0 : index
    %37 = vector.load %arg7[%c0_27, %c0_28] : memref<1x128xf32, #tpu.memory_space<vmem>>, vector<1x128xf32>
    %38 = vector.shape_cast %37 : vector<1x128xf32> to vector<1x1x128xf32>
    %39 = vector.broadcast %38 : vector<1x1x128xf32> to vector<1x16x128xf32>
    %40 = arith.addf %36, %39 : vector<1x16x128xf32>
    %cst_29 = arith.constant 0.000000e+00 : f32
    %41 = vector.broadcast %cst_29 : f32 to vector<1x16x128xf32>
    %42 = arith.maximumf %40, %41 : vector<1x16x128xf32>
    %43 = arith.truncf %42 : vector<1x16x128xf32> to vector<1x16x128xbf16>
    %c17 = arith.constant 17 : index
    %c1_30 = arith.constant 1 : index
    %c0_31 = arith.constant 0 : index
    %44 = vector.load %arg10[%c17, %c1_30, %c0_31] : memref<18x18x128xbf16, #tpu.memory_space<vmem>>, vector<1x16x128xbf16>
    tpu.vector_store %arg10[%c17, %c1_30, %c0_31], %43 {strides = array<i32>} : memref<18x18x128xbf16, #tpu.memory_space<vmem>>, vector<1x16x128xbf16>,
    %cst_32 = arith.constant 0.000000e+00 : bf16
    %45 = vector.broadcast %cst_32 : bf16 to vector<18x1x128xbf16>
    %c0_33 = arith.constant 0 : index
    %c0_34 = arith.constant 0 : index
    %c0_35 = arith.constant 0 : index
    %46 = vector.load %arg10[%c0_33, %c0_34, %c0_35] : memref<18x18x128xbf16, #tpu.memory_space<vmem>>, vector<18x1x128xbf16>
    tpu.vector_store %arg10[%c0_33, %c0_34, %c0_35], %45 {strides = array<i32>} : memref<18x18x128xbf16, #tpu.memory_space<vmem>>, vector<18x1x128xbf16>,
    %c0_36 = arith.constant 0 : index
    %c17_37 = arith.constant 17 : index
    %c0_38 = arith.constant 0 : index
    %47 = vector.load %arg10[%c0_36, %c17_37, %c0_38] : memref<18x18x128xbf16, #tpu.memory_space<vmem>>, vector<18x1x128xbf16>
    tpu.vector_store %arg10[%c0_36, %c17_37, %c0_38], %45 {strides = array<i32>} : memref<18x18x128xbf16, #tpu.memory_space<vmem>>, vector<18x1x128xbf16>,
    %c0_i32 = arith.constant 0 : i32
    %48 = arith.cmpi eq, %arg1, %c0_i32 : i32
    %49 = arith.extui %48 : i1 to i32
    %c0_i32_39 = arith.constant 0 : i32
    %50 = arith.cmpi ne, %49, %c0_i32_39 : i32
    scf.if %50 {
      %cst_58 = arith.constant 0.000000e+00 : bf16
      %79 = vector.broadcast %cst_58 : bf16 to vector<1x18x128xbf16>
      %c0_59 = arith.constant 0 : index
      %c0_60 = arith.constant 0 : index
      %c0_61 = arith.constant 0 : index
      %80 = vector.load %arg10[%c0_59, %c0_60, %c0_61] : memref<18x18x128xbf16, #tpu.memory_space<vmem>>, vector<1x18x128xbf16>
      tpu.vector_store %arg10[%c0_59, %c0_60, %c0_61], %79 {strides = array<i32>} : memref<18x18x128xbf16, #tpu.memory_space<vmem>>, vector<1x18x128xbf16>,
    } else {
    }
    %c0_i32_40 = arith.constant 0 : i32
    %51 = arith.cmpi eq, %arg1, %c0_i32_40 : i32
    %52 = arith.extui %51 : i1 to i32
    %c0_i32_41 = arith.constant 0 : i32
    %53 = arith.cmpi ne, %52, %c0_i32_41 : i32
    scf.if %53 {
      %cst_58 = arith.constant 0.000000e+00 : bf16
      %79 = vector.broadcast %cst_58 : bf16 to vector<1x18x128xbf16>
      %c17_59 = arith.constant 17 : index
      %c0_60 = arith.constant 0 : index
      %c0_61 = arith.constant 0 : index
      %80 = vector.load %arg10[%c17_59, %c0_60, %c0_61] : memref<18x18x128xbf16, #tpu.memory_space<vmem>>, vector<1x18x128xbf16>
      tpu.vector_store %arg10[%c17_59, %c0_60, %c0_61], %79 {strides = array<i32>} : memref<18x18x128xbf16, #tpu.memory_space<vmem>>, vector<1x18x128xbf16>,
    } else {
    }
    %c0_42 = arith.constant 0 : index
    %c0_43 = arith.constant 0 : index
    %c0_44 = arith.constant 0 : index
    %54 = vector.load %arg10[%c0_42, %c0_43, %c0_44] : memref<18x18x128xbf16, #tpu.memory_space<vmem>>, vector<18x18x128xbf16>
    %55 = vector.extract_strided_slice %54 {offsets = [0, 0, 0], sizes = [16, 16, 128], strides = [1, 1, 1]} : vector<18x18x128xbf16> to vector<16x16x128xbf16>
    %56 = vector.extract_strided_slice %54 {offsets = [0, 1, 0], sizes = [16, 16, 128], strides = [1, 1, 1]} : vector<18x18x128xbf16> to vector<16x16x128xbf16>
    %57 = vector.extract_strided_slice %54 {offsets = [0, 2, 0], sizes = [16, 16, 128], strides = [1, 1, 1]} : vector<18x18x128xbf16> to vector<16x16x128xbf16>
    %58 = vector.extract_strided_slice %54 {offsets = [1, 0, 0], sizes = [16, 16, 128], strides = [1, 1, 1]} : vector<18x18x128xbf16> to vector<16x16x128xbf16>
    %59 = vector.extract_strided_slice %54 {offsets = [1, 1, 0], sizes = [16, 16, 128], strides = [1, 1, 1]} : vector<18x18x128xbf16> to vector<16x16x128xbf16>
    %60 = vector.extract_strided_slice %54 {offsets = [1, 2, 0], sizes = [16, 16, 128], strides = [1, 1, 1]} : vector<18x18x128xbf16> to vector<16x16x128xbf16>
    %61 = vector.extract_strided_slice %54 {offsets = [2, 0, 0], sizes = [16, 16, 128], strides = [1, 1, 1]} : vector<18x18x128xbf16> to vector<16x16x128xbf16>
    %62 = vector.extract_strided_slice %54 {offsets = [2, 1, 0], sizes = [16, 16, 128], strides = [1, 1, 1]} : vector<18x18x128xbf16> to vector<16x16x128xbf16>
    %63 = vector.extract_strided_slice %54 {offsets = [2, 2, 0], sizes = [16, 16, 128], strides = [1, 1, 1]} : vector<18x18x128xbf16> to vector<16x16x128xbf16>
    %64 = tpu.concatenate %55, %56, %57, %58, %59, %60, %61, %62, %63 in 2 : vector<16x16x128xbf16>, vector<16x16x128xbf16>, vector<16x16x128xbf16>, vector<16x16x128xbf16>, vector<16x16x128xbf16>, vector<16x16x128xbf16>, vector<16x16x128xbf16>, vector<16x16x128xbf16>, vector<16x16x128xbf16> -> vector<16x16x1152xbf16>
    %65 = vector.shape_cast %64 : vector<16x16x1152xbf16> to vector<256x1152xbf16>
    %c0_45 = arith.constant 0 : index
    %c0_46 = arith.constant 0 : index
    %66 = vector.load %arg5[%c0_45, %c0_46] : memref<1152x128xbf16, #tpu.memory_space<vmem>>, vector<1152x128xbf16>
    %cst_47 = arith.constant dense<0.000000e+00> : vector<256x128xf32>
    %67 = tpu.matmul %65, %66, %cst_47 {dimension_numbers = #tpu.dot_dimension_numbers<[1], [0], [0], [1], [0, 0, 1, 1], [], []>} : vector<256x1152xbf16>, vector<1152x128xbf16>, vector<256x128xf32> -> vector<256x128xf32>
    %cst_48 = arith.constant dense<0.000000e+00> : vector<128xf32>
    %68 = vector.multi_reduction <add>, %67, %cst_48 [0] : vector<256x128xf32> to vector<128xf32>
    %69 = vector.shape_cast %68 : vector<128xf32> to vector<1x128xf32>
    %70 = arith.mulf %67, %67 : vector<256x128xf32>
    %cst_49 = arith.constant dense<0.000000e+00> : vector<128xf32>
    %71 = vector.multi_reduction <add>, %70, %cst_49 [0] : vector<256x128xf32> to vector<128xf32>
    %72 = vector.shape_cast %71 : vector<128xf32> to vector<1x128xf32>
    %73 = tpu.concatenate %69, %72 in 0 : vector<1x128xf32>, vector<1x128xf32> -> vector<2x128xf32>
    %74 = vector.shape_cast %73 : vector<2x128xf32> to vector<1x1x2x128xf32>
    %c0_50 = arith.constant 0 : index
    %c0_51 = arith.constant 0 : index
    %c0_52 = arith.constant 0 : index
    %c0_53 = arith.constant 0 : index
    %75 = vector.load %arg9[%c0_50, %c0_51, %c0_52, %c0_53] : memref<1x1x2x128xf32, #tpu.memory_space<vmem>>, vector<1x1x2x128xf32>
    tpu.vector_store %arg9[%c0_50, %c0_51, %c0_52, %c0_53], %74 {strides = array<i32>} : memref<1x1x2x128xf32, #tpu.memory_space<vmem>>, vector<1x1x2x128xf32>,
    %76 = vector.shape_cast %67 : vector<256x128xf32> to vector<1x16x16x128xf32>
    %77 = arith.truncf %76 : vector<1x16x16x128xf32> to vector<1x16x16x128xbf16>
    %c0_54 = arith.constant 0 : index
    %c0_55 = arith.constant 0 : index
    %c0_56 = arith.constant 0 : index
    %c0_57 = arith.constant 0 : index
    %78 = vector.load %arg8[%c0_54, %c0_55, %c0_56, %c0_57] : memref<1x16x16x128xbf16, #tpu.memory_space<vmem>>, vector<1x16x16x128xbf16>
    tpu.vector_store %arg8[%c0_54, %c0_55, %c0_56, %c0_57], %77 {strides = array<i32>} : memref<1x16x16x128xbf16, #tpu.memory_space<vmem>>, vector<1x16x16x128xbf16>,
    return
  }
  func.func @transform_0(%arg0: i32, %arg1: i32) -> (i32, i32, i32, i32) {
    %c0_i32 = arith.constant 0 : i32
    %c0_i32_0 = arith.constant 0 : i32
    %c0_i32_1 = arith.constant 0 : i32
    return %arg0, %arg1, %c0_i32, %c0_i32_0 : i32, i32, i32, i32
  }
  func.func @transform_1(%arg0: i32, %arg1: i32) -> (i32, i32, i32, i32) {
    %c16_i32 = arith.constant 16 : i32
    %0 = arith.muli %arg1, %c16_i32 : i32
    %c1_i32 = arith.constant 1 : i32
    %1 = arith.subi %0, %c1_i32 : i32
    %c0_i32 = arith.constant 0 : i32
    %2 = arith.maxsi %1, %c0_i32 : i32
    %c0_i32_0 = arith.constant 0 : i32
    %c0_i32_1 = arith.constant 0 : i32
    %c0_i32_2 = arith.constant 0 : i32
    return %arg0, %2, %c0_i32_0, %c0_i32_1 : i32, i32, i32, i32
  }
  func.func @transform_2(%arg0: i32, %arg1: i32) -> (i32, i32, i32, i32) {
    %c16_i32 = arith.constant 16 : i32
    %0 = arith.muli %arg1, %c16_i32 : i32
    %c16_i32_0 = arith.constant 16 : i32
    %1 = arith.addi %0, %c16_i32_0 : i32
    %c15_i32 = arith.constant 15 : i32
    %2 = arith.minsi %1, %c15_i32 : i32
    %c0_i32 = arith.constant 0 : i32
    %c0_i32_1 = arith.constant 0 : i32
    %c0_i32_2 = arith.constant 0 : i32
    return %arg0, %2, %c0_i32, %c0_i32_1 : i32, i32, i32, i32
  }
  func.func @transform_3(%arg0: i32, %arg1: i32) -> (i32, i32) {
    %c0_i32 = arith.constant 0 : i32
    %c0_i32_0 = arith.constant 0 : i32
    %c0_i32_1 = arith.constant 0 : i32
    return %c0_i32, %c0_i32_0 : i32, i32
  }
  func.func @transform_4(%arg0: i32, %arg1: i32) -> (i32, i32) {
    %c0_i32 = arith.constant 0 : i32
    %c0_i32_0 = arith.constant 0 : i32
    %c0_i32_1 = arith.constant 0 : i32
    return %c0_i32, %c0_i32_0 : i32, i32
  }
  func.func @transform_5(%arg0: i32, %arg1: i32) -> (i32, i32) {
    %c0_i32 = arith.constant 0 : i32
    %c0_i32_0 = arith.constant 0 : i32
    %c0_i32_1 = arith.constant 0 : i32
    return %c0_i32, %c0_i32_0 : i32, i32
  }
  func.func @transform_6(%arg0: i32, %arg1: i32) -> (i32, i32, i32, i32) {
    %c0_i32 = arith.constant 0 : i32
    %c0_i32_0 = arith.constant 0 : i32
    %c0_i32_1 = arith.constant 0 : i32
    return %arg0, %arg1, %c0_i32, %c0_i32_0 : i32, i32, i32, i32
  }
  func.func @transform_7(%arg0: i32, %arg1: i32) -> (i32, i32, i32, i32) {
    %c0_i32 = arith.constant 0 : i32
    %c0_i32_0 = arith.constant 0 : i32
    %c0_i32_1 = arith.constant 0 : i32
    return %arg0, %arg1, %c0_i32, %c0_i32_0 : i32, i32, i32, i32
  }
}

module attributes {stable_mosaic.version = 11 : i64} {
  func.func @_conv_kernel(%arg0: i32, %arg1: i32, %arg2: memref<1x16x16x4xbf16, #tpu.memory_space<vmem>>, %arg3: memref<1x1x16x4xbf16, #tpu.memory_space<vmem>>, %arg4: memref<1x1x16x4xbf16, #tpu.memory_space<vmem>>, %arg5: memref<36x128xbf16, #tpu.memory_space<vmem>>, %arg6: memref<1x4xf32, #tpu.memory_space<vmem>>, %arg7: memref<1x4xf32, #tpu.memory_space<vmem>>, %arg8: memref<1x16x16x128xbf16, #tpu.memory_space<vmem>>, %arg9: memref<1x1x2x128xf32, #tpu.memory_space<vmem>>, %arg10: memref<18x18x4xbf16, #tpu.memory_space<vmem>>) attributes {dimension_semantics = [#tpu.dimension_semantics<parallel>, #tpu.dimension_semantics<parallel>], iteration_bounds = array<i64: 2, 1>, scalar_prefetch = 0 : i64, scratch_operands = 1 : i64, tpu.core_type = #tpu.core_type<tc>, window_params = [{transform_indices = @transform_0, window_bounds = array<i64: 1, 16, 16, 4>}, {transform_indices = @transform_1, window_bounds = array<i64: 1, 1, 16, 4>}, {transform_indices = @transform_2, window_bounds = array<i64: 1, 1, 16, 4>}, {pipeline_mode = #tpu.pipeline_mode<synchronous>, transform_indices = @transform_3, window_bounds = array<i64: 36, 128>}, {pipeline_mode = #tpu.pipeline_mode<synchronous>, transform_indices = @transform_4, window_bounds = array<i64: 1, 4>}, {pipeline_mode = #tpu.pipeline_mode<synchronous>, transform_indices = @transform_5, window_bounds = array<i64: 1, 4>}, {transform_indices = @transform_6, window_bounds = array<i64: 1, 16, 16, 128>}, {transform_indices = @transform_7, window_bounds = array<i64: 1, 1, 2, 128>}]} {
    %c0 = arith.constant 0 : index
    %c0_0 = arith.constant 0 : index
    %c0_1 = arith.constant 0 : index
    %c0_2 = arith.constant 0 : index
    %0 = vector.load %arg2[%c0, %c0_0, %c0_1, %c0_2] : memref<1x16x16x4xbf16, #tpu.memory_space<vmem>>, vector<1x16x16x4xbf16>
    %1 = vector.shape_cast %0 : vector<1x16x16x4xbf16> to vector<16x16x4xbf16>
    %c1 = arith.constant 1 : index
    %c1_3 = arith.constant 1 : index
    %c0_4 = arith.constant 0 : index
    %2 = vector.load %arg10[%c1, %c1_3, %c0_4] : memref<18x18x4xbf16, #tpu.memory_space<vmem>>, vector<16x16x4xbf16>
    tpu.vector_store %arg10[%c1, %c1_3, %c0_4], %1 {strides = array<i32>} : memref<18x18x4xbf16, #tpu.memory_space<vmem>>, vector<16x16x4xbf16>,
    %c0_5 = arith.constant 0 : index
    %c0_6 = arith.constant 0 : index
    %c0_7 = arith.constant 0 : index
    %c0_8 = arith.constant 0 : index
    %3 = vector.load %arg3[%c0_5, %c0_6, %c0_7, %c0_8] : memref<1x1x16x4xbf16, #tpu.memory_space<vmem>>, vector<1x1x16x4xbf16>
    %4 = vector.shape_cast %3 : vector<1x1x16x4xbf16> to vector<1x16x4xbf16>
    %c0_9 = arith.constant 0 : index
    %c1_10 = arith.constant 1 : index
    %c0_11 = arith.constant 0 : index
    %5 = vector.load %arg10[%c0_9, %c1_10, %c0_11] : memref<18x18x4xbf16, #tpu.memory_space<vmem>>, vector<1x16x4xbf16>
    tpu.vector_store %arg10[%c0_9, %c1_10, %c0_11], %4 {strides = array<i32>} : memref<18x18x4xbf16, #tpu.memory_space<vmem>>, vector<1x16x4xbf16>,
    %c0_12 = arith.constant 0 : index
    %c0_13 = arith.constant 0 : index
    %c0_14 = arith.constant 0 : index
    %c0_15 = arith.constant 0 : index
    %6 = vector.load %arg4[%c0_12, %c0_13, %c0_14, %c0_15] : memref<1x1x16x4xbf16, #tpu.memory_space<vmem>>, vector<1x1x16x4xbf16>
    %7 = vector.shape_cast %6 : vector<1x1x16x4xbf16> to vector<1x16x4xbf16>
    %c17 = arith.constant 17 : index
    %c1_16 = arith.constant 1 : index
    %c0_17 = arith.constant 0 : index
    %8 = vector.load %arg10[%c17, %c1_16, %c0_17] : memref<18x18x4xbf16, #tpu.memory_space<vmem>>, vector<1x16x4xbf16>
    tpu.vector_store %arg10[%c17, %c1_16, %c0_17], %7 {strides = array<i32>} : memref<18x18x4xbf16, #tpu.memory_space<vmem>>, vector<1x16x4xbf16>,
    %cst = arith.constant 0.000000e+00 : bf16
    %9 = vector.broadcast %cst : bf16 to vector<18x1x4xbf16>
    %c0_18 = arith.constant 0 : index
    %c0_19 = arith.constant 0 : index
    %c0_20 = arith.constant 0 : index
    %10 = vector.load %arg10[%c0_18, %c0_19, %c0_20] : memref<18x18x4xbf16, #tpu.memory_space<vmem>>, vector<18x1x4xbf16>
    tpu.vector_store %arg10[%c0_18, %c0_19, %c0_20], %9 {strides = array<i32>} : memref<18x18x4xbf16, #tpu.memory_space<vmem>>, vector<18x1x4xbf16>,
    %c0_21 = arith.constant 0 : index
    %c17_22 = arith.constant 17 : index
    %c0_23 = arith.constant 0 : index
    %11 = vector.load %arg10[%c0_21, %c17_22, %c0_23] : memref<18x18x4xbf16, #tpu.memory_space<vmem>>, vector<18x1x4xbf16>
    tpu.vector_store %arg10[%c0_21, %c17_22, %c0_23], %9 {strides = array<i32>} : memref<18x18x4xbf16, #tpu.memory_space<vmem>>, vector<18x1x4xbf16>,
    %c0_i32 = arith.constant 0 : i32
    %12 = arith.cmpi eq, %arg1, %c0_i32 : i32
    %13 = arith.extui %12 : i1 to i32
    %c0_i32_24 = arith.constant 0 : i32
    %14 = arith.cmpi ne, %13, %c0_i32_24 : i32
    scf.if %14 {
      %cst_43 = arith.constant 0.000000e+00 : bf16
      %43 = vector.broadcast %cst_43 : bf16 to vector<1x18x4xbf16>
      %c0_44 = arith.constant 0 : index
      %c0_45 = arith.constant 0 : index
      %c0_46 = arith.constant 0 : index
      %44 = vector.load %arg10[%c0_44, %c0_45, %c0_46] : memref<18x18x4xbf16, #tpu.memory_space<vmem>>, vector<1x18x4xbf16>
      tpu.vector_store %arg10[%c0_44, %c0_45, %c0_46], %43 {strides = array<i32>} : memref<18x18x4xbf16, #tpu.memory_space<vmem>>, vector<1x18x4xbf16>,
    } else {
    }
    %c0_i32_25 = arith.constant 0 : i32
    %15 = arith.cmpi eq, %arg1, %c0_i32_25 : i32
    %16 = arith.extui %15 : i1 to i32
    %c0_i32_26 = arith.constant 0 : i32
    %17 = arith.cmpi ne, %16, %c0_i32_26 : i32
    scf.if %17 {
      %cst_43 = arith.constant 0.000000e+00 : bf16
      %43 = vector.broadcast %cst_43 : bf16 to vector<1x18x4xbf16>
      %c17_44 = arith.constant 17 : index
      %c0_45 = arith.constant 0 : index
      %c0_46 = arith.constant 0 : index
      %44 = vector.load %arg10[%c17_44, %c0_45, %c0_46] : memref<18x18x4xbf16, #tpu.memory_space<vmem>>, vector<1x18x4xbf16>
      tpu.vector_store %arg10[%c17_44, %c0_45, %c0_46], %43 {strides = array<i32>} : memref<18x18x4xbf16, #tpu.memory_space<vmem>>, vector<1x18x4xbf16>,
    } else {
    }
    %c0_27 = arith.constant 0 : index
    %c0_28 = arith.constant 0 : index
    %c0_29 = arith.constant 0 : index
    %18 = vector.load %arg10[%c0_27, %c0_28, %c0_29] : memref<18x18x4xbf16, #tpu.memory_space<vmem>>, vector<18x18x4xbf16>
    %19 = vector.extract_strided_slice %18 {offsets = [0, 0, 0], sizes = [16, 16, 4], strides = [1, 1, 1]} : vector<18x18x4xbf16> to vector<16x16x4xbf16>
    %20 = vector.extract_strided_slice %18 {offsets = [0, 1, 0], sizes = [16, 16, 4], strides = [1, 1, 1]} : vector<18x18x4xbf16> to vector<16x16x4xbf16>
    %21 = vector.extract_strided_slice %18 {offsets = [0, 2, 0], sizes = [16, 16, 4], strides = [1, 1, 1]} : vector<18x18x4xbf16> to vector<16x16x4xbf16>
    %22 = vector.extract_strided_slice %18 {offsets = [1, 0, 0], sizes = [16, 16, 4], strides = [1, 1, 1]} : vector<18x18x4xbf16> to vector<16x16x4xbf16>
    %23 = vector.extract_strided_slice %18 {offsets = [1, 1, 0], sizes = [16, 16, 4], strides = [1, 1, 1]} : vector<18x18x4xbf16> to vector<16x16x4xbf16>
    %24 = vector.extract_strided_slice %18 {offsets = [1, 2, 0], sizes = [16, 16, 4], strides = [1, 1, 1]} : vector<18x18x4xbf16> to vector<16x16x4xbf16>
    %25 = vector.extract_strided_slice %18 {offsets = [2, 0, 0], sizes = [16, 16, 4], strides = [1, 1, 1]} : vector<18x18x4xbf16> to vector<16x16x4xbf16>
    %26 = vector.extract_strided_slice %18 {offsets = [2, 1, 0], sizes = [16, 16, 4], strides = [1, 1, 1]} : vector<18x18x4xbf16> to vector<16x16x4xbf16>
    %27 = vector.extract_strided_slice %18 {offsets = [2, 2, 0], sizes = [16, 16, 4], strides = [1, 1, 1]} : vector<18x18x4xbf16> to vector<16x16x4xbf16>
    %28 = tpu.concatenate %19, %20, %21, %22, %23, %24, %25, %26, %27 in 2 : vector<16x16x4xbf16>, vector<16x16x4xbf16>, vector<16x16x4xbf16>, vector<16x16x4xbf16>, vector<16x16x4xbf16>, vector<16x16x4xbf16>, vector<16x16x4xbf16>, vector<16x16x4xbf16>, vector<16x16x4xbf16> -> vector<16x16x36xbf16>
    %29 = vector.shape_cast %28 : vector<16x16x36xbf16> to vector<256x36xbf16>
    %c0_30 = arith.constant 0 : index
    %c0_31 = arith.constant 0 : index
    %30 = vector.load %arg5[%c0_30, %c0_31] : memref<36x128xbf16, #tpu.memory_space<vmem>>, vector<36x128xbf16>
    %cst_32 = arith.constant dense<0.000000e+00> : vector<256x128xf32>
    %31 = tpu.matmul %29, %30, %cst_32 {dimension_numbers = #tpu.dot_dimension_numbers<[1], [0], [0], [1], [0, 0, 1, 1], [], []>} : vector<256x36xbf16>, vector<36x128xbf16>, vector<256x128xf32> -> vector<256x128xf32>
    %cst_33 = arith.constant dense<0.000000e+00> : vector<128xf32>
    %32 = vector.multi_reduction <add>, %31, %cst_33 [0] : vector<256x128xf32> to vector<128xf32>
    %33 = vector.shape_cast %32 : vector<128xf32> to vector<1x128xf32>
    %34 = arith.mulf %31, %31 : vector<256x128xf32>
    %cst_34 = arith.constant dense<0.000000e+00> : vector<128xf32>
    %35 = vector.multi_reduction <add>, %34, %cst_34 [0] : vector<256x128xf32> to vector<128xf32>
    %36 = vector.shape_cast %35 : vector<128xf32> to vector<1x128xf32>
    %37 = tpu.concatenate %33, %36 in 0 : vector<1x128xf32>, vector<1x128xf32> -> vector<2x128xf32>
    %38 = vector.shape_cast %37 : vector<2x128xf32> to vector<1x1x2x128xf32>
    %c0_35 = arith.constant 0 : index
    %c0_36 = arith.constant 0 : index
    %c0_37 = arith.constant 0 : index
    %c0_38 = arith.constant 0 : index
    %39 = vector.load %arg9[%c0_35, %c0_36, %c0_37, %c0_38] : memref<1x1x2x128xf32, #tpu.memory_space<vmem>>, vector<1x1x2x128xf32>
    tpu.vector_store %arg9[%c0_35, %c0_36, %c0_37, %c0_38], %38 {strides = array<i32>} : memref<1x1x2x128xf32, #tpu.memory_space<vmem>>, vector<1x1x2x128xf32>,
    %40 = vector.shape_cast %31 : vector<256x128xf32> to vector<1x16x16x128xf32>
    %41 = arith.truncf %40 : vector<1x16x16x128xf32> to vector<1x16x16x128xbf16>
    %c0_39 = arith.constant 0 : index
    %c0_40 = arith.constant 0 : index
    %c0_41 = arith.constant 0 : index
    %c0_42 = arith.constant 0 : index
    %42 = vector.load %arg8[%c0_39, %c0_40, %c0_41, %c0_42] : memref<1x16x16x128xbf16, #tpu.memory_space<vmem>>, vector<1x16x16x128xbf16>
    tpu.vector_store %arg8[%c0_39, %c0_40, %c0_41, %c0_42], %41 {strides = array<i32>} : memref<1x16x16x128xbf16, #tpu.memory_space<vmem>>, vector<1x16x16x128xbf16>,
    return
  }
  func.func @transform_0(%arg0: i32, %arg1: i32) -> (i32, i32, i32, i32) {
    %c0_i32 = arith.constant 0 : i32
    %c0_i32_0 = arith.constant 0 : i32
    %c0_i32_1 = arith.constant 0 : i32
    return %arg0, %arg1, %c0_i32, %c0_i32_0 : i32, i32, i32, i32
  }
  func.func @transform_1(%arg0: i32, %arg1: i32) -> (i32, i32, i32, i32) {
    %c16_i32 = arith.constant 16 : i32
    %0 = arith.muli %arg1, %c16_i32 : i32
    %c1_i32 = arith.constant 1 : i32
    %1 = arith.subi %0, %c1_i32 : i32
    %c0_i32 = arith.constant 0 : i32
    %2 = arith.maxsi %1, %c0_i32 : i32
    %c0_i32_0 = arith.constant 0 : i32
    %c0_i32_1 = arith.constant 0 : i32
    %c0_i32_2 = arith.constant 0 : i32
    return %arg0, %2, %c0_i32_0, %c0_i32_1 : i32, i32, i32, i32
  }
  func.func @transform_2(%arg0: i32, %arg1: i32) -> (i32, i32, i32, i32) {
    %c16_i32 = arith.constant 16 : i32
    %0 = arith.muli %arg1, %c16_i32 : i32
    %c16_i32_0 = arith.constant 16 : i32
    %1 = arith.addi %0, %c16_i32_0 : i32
    %c15_i32 = arith.constant 15 : i32
    %2 = arith.minsi %1, %c15_i32 : i32
    %c0_i32 = arith.constant 0 : i32
    %c0_i32_1 = arith.constant 0 : i32
    %c0_i32_2 = arith.constant 0 : i32
    return %arg0, %2, %c0_i32, %c0_i32_1 : i32, i32, i32, i32
  }
  func.func @transform_3(%arg0: i32, %arg1: i32) -> (i32, i32) {
    %c0_i32 = arith.constant 0 : i32
    %c0_i32_0 = arith.constant 0 : i32
    %c0_i32_1 = arith.constant 0 : i32
    return %c0_i32, %c0_i32_0 : i32, i32
  }
  func.func @transform_4(%arg0: i32, %arg1: i32) -> (i32, i32) {
    %c0_i32 = arith.constant 0 : i32
    %c0_i32_0 = arith.constant 0 : i32
    %c0_i32_1 = arith.constant 0 : i32
    return %c0_i32, %c0_i32_0 : i32, i32
  }
  func.func @transform_5(%arg0: i32, %arg1: i32) -> (i32, i32) {
    %c0_i32 = arith.constant 0 : i32
    %c0_i32_0 = arith.constant 0 : i32
    %c0_i32_1 = arith.constant 0 : i32
    return %c0_i32, %c0_i32_0 : i32, i32
  }
  func.func @transform_6(%arg0: i32, %arg1: i32) -> (i32, i32, i32, i32) {
    %c0_i32 = arith.constant 0 : i32
    %c0_i32_0 = arith.constant 0 : i32
    %c0_i32_1 = arith.constant 0 : i32
    return %arg0, %arg1, %c0_i32, %c0_i32_0 : i32, i32, i32, i32
  }
  func.func @transform_7(%arg0: i32, %arg1: i32) -> (i32, i32, i32, i32) {
    %c0_i32 = arith.constant 0 : i32
    %c0_i32_0 = arith.constant 0 : i32
    %c0_i32_1 = arith.constant 0 : i32
    return %arg0, %arg1, %c0_i32, %c0_i32_0 : i32, i32, i32, i32
  }
}

</mosaic_0001>

<bundles_post_ra>
// kernel: conv_block_forward.2
= control target key start
LH: loop header
LB: loop body
LE: loop exit
PB: predicated region body
PF: predicated region fallthrough
CT: control target
= control target key end

     0   :  { %s3229_s24 = smov 0   ;;  %s3231_s25 = smov 0   ;;  %s4165_s0 = inlined_call_operand.vmem [shape: bf16[2,16,16,4], index: 0, kind: input, shape index: {}, may-alias: {0,1,2}]   ;;  %s4166_s1 = inlined_call_operand.vmem [shape: bf16[2,16,16,4], index: 1, kind: input, shape index: {}, may-alias: {0,1,2}]   ;;  %s4167_s2 = inlined_call_operand.vmem [shape: bf16[2,16,16,4], index: 2, kind: input, shape index: {}, may-alias: {0,1,2}]   ;;  %s4168_s3 = inlined_call_operand.vmem [shape: bf16[36,128], index: 3, kind: input, shape index: {}]   ;;  %s4169_s4 = inlined_call_operand.vmem [shape: f32[1,4], index: 4, kind: input, shape index: {}, may-alias: {4,5}]   ;;  %s4170_s5 = inlined_call_operand.vmem [shape: f32[1,4], index: 5, kind: input, shape index: {}, may-alias: {4,5}]   ;;  %s4171_s6 = inlined_call_operand.vmem [shape: bf16[2,16,16,128], index: 6, kind: output, shape index: {0}]   ;;  %s4172_s7 = inlined_call_operand.vmem [shape: f32[2,1,2,128], index: 7, kind: output, shape index: {1}]  }
   0x1   :  { %s3233_s26 = smov 0  }
   0x2 LB: > { %s30_s4 = sadd.s32 1, %s3174_s25  ;;  %p2780_p0 = scmp.ge.s32.totalorder %s3178_s26, 1  ;;  %s3178_s26 = sphi %s3233_s26, %s18_s26   ;;  %s3174_s25 = sphi %s3231_s25, %s4182_s25   ;;  %s3170_s24 = sphi %s3229_s24, %s4181_s24  }
   0x3   : > { %p32_p1 = scmp.ge.s32.totalorder %s30_s4, 2  ;;  %p328_p2 = scmp.lt.s32.totalorder %s3178_s26, 3 }
   0x5   : > { %s4184_s4 = smov (%p32_p1, %s30_s4), 0  ;;  %p329_p3 = pnand %p2780_p0, %p328_p2 }
   0x6   : > { %p404_p4 = scmp.lt.s32.totalorder (!%p329_p3), %s3170_s24, 1  ;;  %vm499_vm0 = vsmask.f32 (!%p329_p3), 256  ;;  %vm500_vm1 = vsmask.f32 (!%p329_p3), 4368  ;;  %vm823_vm2 = vcmask (!%p329_p3), 27648  }
   0x7   : > { %332 = sbr.rel (%p329_p3) target bundleno = 651 (0x28b), region = 44  ;;  %vm824_vm3 = vsmask.f32 (!%p329_p3), 7938  ;;  %vm831_vm4 = vcmask (!%p329_p3), 24576   ;;  %vm3265_vm5 = vmor (!%p329_p3), %vm499_vm0, %vm500_vm1  ;;  %v836_v20 = vld [vmem:[#allocation2 + $0x18] sm:$0xf] (!%p329_p3) }
   0x8   : > { %vm3272_vm6 = vmand (!%p329_p3), %vm823_vm2, %vm824_vm3  ;;  %v826_v28 = vld [vmem:[#allocation2 + $0xc] sm:$0xf] (!%p329_p3)  ;;  %v843_v35 = vld [vmem:[#allocation2 + $0x24] sm:$0xf] (!%p329_p3)  ;;  %s3181_s10 = smov (!%p329_p3), 12   ;;  %s3182_s11 = smov (!%p329_p3), 24  }
   0x9   : > { %v833_v41 = vld [vmem:[#allocation2 + $0x14] sm:$0x1] (!%p329_p3)  ;;  %v840_v46 = vld [vmem:[#allocation2 + $0x20] sm:$0x1] (!%p329_p3)  ;;  %vm3296_vm7 = vmand (!%p329_p3), %vm831_vm4, %vm499_vm0  ;;  %vm1527_vm9 = vcmask (!%p329_p3), 1046528   ;;  %s3183_s12 = smov (!%p329_p3), 8  }
   0xa   : > { %v847_v53 = vld [vmem:[#allocation2 + $0x2c] sm:$0x1] (!%p329_p3)  ;;  %v850_v60 = vld [vmem:[#allocation2 + $0x30] sm:$0xf] (!%p329_p3)  ;;  %vm3333_vm8 = vmand (!%p329_p3), %vm831_vm4, %vm824_vm3  ;;  %s3184_s13 = smov (!%p329_p3), 20   ;;  %s3185_s14 = smov (!%p329_p3), 32  }
   0xb   : > { %vm1302_vm10 = vsmask.f32 (!%p329_p3), 7424  ;;  %s3186_s19 = smov (!%p329_p3), 16   ;;  %s3187_s20 = smov (!%p329_p3), 4   ;;  %vm2163_vm11 = vcmask (!%p329_p3), 1041408   ;;  %vm1846_vm12 = vcmask (!%p329_p3), 31744  }
   0xc   : > { %s3188_s21 = smov (!%p329_p3), 28   ;;  %vm1879_vm13 = vcmask (!%p329_p3), 64512   ;;  %vm1912_vm14 = vcmask (!%p329_p3), 97280   ;;  %vm1945_vm15 = vcmask (!%p329_p3), 130048   ;;  %vm1978_vm0 = vcmask (!%p329_p3), 162816  }
   0xd   : > { %vm2011_vm1 = vcmask (!%p329_p3), 195584   ;;  %vm2077_vm3 = vcmask (!%p329_p3), 261120  }
   0xe   : > { %s4186_s24 = smov (!%p404_p4, %s3170_s24), 1 }
   0xf   : > { %s3250_s5 = sshll.u32 %s4186_s24, 7 }
  0x10   : > { %s3256_s29 = scalar_lea.vmem %s4165_s0, %s3250_s5  ;;  %s3281_s9 = scalar_lea.vmem %s4166_s1, %s3250_s5 }
  0x11   : > { %v469_v0 = vld [vmem:[%s3256_s29 + $0x8] sm:$0xf]  ;;  %v470_v1 = vld [vmem:[%s3256_s29 + $0xc] sm:$0xf]  ;;  %v467_v2 = vld [vmem:[%s3256_s29] sm:$0xf] }
  0x12   : > { %v520_v3 = vshrl.u32 %v469_v0, 16  ;;  %v523_v4 = vshll.u32 %v469_v0, 16  ;;  %v528_v5 = vshrl.u32 %v470_v1, 16  ;;  %v531_v6 = vshll.u32 %v470_v1, 16  ;;  %v468_v7 = vld [vmem:[%s3256_s29 + $0x4] sm:$0xf] }
  0x13   : > { %v503_v8 = vshrl.u32 %v467_v2, 16  ;;  %v506_v9 = vshll.u32 %v467_v2, 16  ;;  %v511_v10 = vshrl.u32 %v468_v7, 16  ;;  %v514_v11 = vshll.u32 %v468_v7, 16  ;;  %v471_v12 = vld [vmem:[%s3256_s29 + $0x10] sm:$0xf] }
  0x14   : > { %v522_v14 = vrot.slane %v520_v3, 7  ;;  %v530_v15 = vrot.slane %v528_v5, 7  ;;  %v472_v16 = vld [vmem:[%s3256_s29 + $0x14] sm:$0xf]  ;;  %v537_v17 = vshrl.u32 %v471_v12, 16  ;;  %v540_v18 = vshll.u32 %v471_v12, 16 }
  0x15   : > { %v505_v21 = vrot.slane %v503_v8, 7  ;;  %v513_v22 = vrot.slane %v511_v10, 7  ;;  %v545_v23 = vshrl.u32 %v472_v16, 16  ;;  %v548_v24 = vshll.u32 %v472_v16, 16  ;;  %v473_v30 = vld [vmem:[%s3256_s29 + $0x18] sm:$0xf] }
  0x16   : > { %v525_v25 = vor.u32 %v523_v4, %v522_v14  ;;  %v526_v26 = vrot.slane %v522_v14, 4  ;;  %v533_v27 = vor.u32 %v531_v6, %v530_v15  ;;  %v539_v29 = vrot.slane %v537_v17, 7  ;;  %v474_v36 = vld [vmem:[%s3256_s29 + $0x1c] sm:$0xf]  ;;  %v941_v47 = vld [vmem:[%s3281_s9] sm:$0xf] }
  0x17   : > { %v508_v31 = vor.u32 %v506_v9, %v505_v21  ;;  %v509_v32 = vrot.slane %v505_v21, 4  ;;  %v516_v33 = vor.u32 %v514_v11, %v513_v22  ;;  %v547_v34 = vrot.slane %v545_v23, 7  ;;  %v942_v58 = vld [vmem:[%s3281_s9 + $0x4] sm:$0xf]  ;;  %v963_v4 = vld [vmem:[#allocation2] sm:$0xf] }
  0x18   : > { %v534_v37 = vsel %vm3265_vm5, %v526_v26, %v533_v27  ;;  %v837_v38 = vsel %vm3272_vm6, %v525_v25, %v836_v20  ;;  %v542_v39 = vor.u32 %v540_v18, %v539_v29  ;;  %v543_v40 = vrot.slane %v539_v29, 4  ;;  %v854_v9 = vld [vmem:[#allocation2 + $0x38] sm:$0x1]  ;;  %v475_v10 = vld [vmem:[%s3256_s29 + $0x20] sm:$0xf]  ;;  %s2882_s27 = sadd.s32 120, %s3250_s5 }
  0x19   : > { %838 = vst [vmem:[#allocation2 + $0x18] sm:$0xf] %v837_v38  ;;  %839 = vst.msk [vmem:[#allocation2 + $0x1c] sm:$0xf] %vm823_vm2, %v534_v37  ;;  %v517_v42 = vsel %vm3265_vm5, %v509_v32, %v516_v33  ;;  %v827_v43 = vsel %vm3272_vm6, %v508_v31, %v826_v28  ;;  %v550_v44 = vor.u32 %v548_v24, %v547_v34  ;;  %v554_v45 = vshrl.u32 %v473_v30, 16  ;;  %s443_s30 = scalar_lea.vmem %s4167_s2, %s2882_s27 }
  0x1a   : > { %828 = vst [vmem:[#allocation2 + $0xc] sm:$0xf] %v827_v43  ;;  %830 = vst.msk [vmem:[#allocation2 + $0x10] sm:$0xf] %vm823_vm2, %v517_v42  ;;  %v844_v49 = vsel %vm3272_vm6, %v542_v39, %v843_v35  ;;  %v557_v50 = vshll.u32 %v473_v30, 16  ;;  %v562_v51 = vshrl.u32 %v474_v36, 16 }
  0x1b   : > { %v565_v52 = vshll.u32 %v474_v36, 16  ;;  %v551_v54 = vsel %vm3265_vm5, %v543_v40, %v550_v44  ;;  %845 = vst [vmem:[#allocation2 + $0x24] sm:$0xf] %v844_v49  ;;  %v556_v55 = vrot.slane %v554_v45, 7  ;;  %v518_v56 = vrot.slane %v513_v22, 4 }
  0x1c   : > { %v535_v57 = vrot.slane %v530_v15, 4  ;;  %846 = vst.msk [vmem:[#allocation2 + $0x28] sm:$0xf] %vm823_vm2, %v551_v54  ;;  %v564_v59 = vrot.slane %v562_v51, 7  ;;  %v552_v61 = vrot.slane %v547_v34, 4  ;;  %v944_v62 = vshrl.u32 %v941_v47, 16 }
  0x1d   : > { %v947_v63 = vshll.u32 %v941_v47, 16  ;;  %v559_v0 = vor.u32 %v557_v50, %v556_v55  ;;  %v560_v1 = vrot.slane %v556_v55, 4  ;;  %v834_v2 = vsel %vm3296_vm7, %v518_v56, %v833_v41  ;;  %v967_v14 = vld [vmem:[#allocation2 + $0x8] sm:$0x1]  ;;  %v476_v16 = vld [vmem:[%s3256_s29 + $0x24] sm:$0xf] }
  0x1e   : > { %v841_v3 = vsel %vm3296_vm7, %v535_v57, %v840_v46  ;;  %v567_v5 = vor.u32 %v565_v52, %v564_v59  ;;  %835 = vst [vmem:[#allocation2 + $0x14] sm:$0x1] %v834_v2  ;;  %v848_v6 = vsel %vm3296_vm7, %v552_v61, %v847_v53  ;;  %v946_v7 = vrot.slane %v944_v62, 7  ;;  %v477_v17 = vld [vmem:[%s3256_s29 + $0x28] sm:$0xf] }
  0x1f   : > { %842 = vst [vmem:[#allocation2 + $0x20] sm:$0x1] %v841_v3  ;;  %v952_v8 = vshrl.u32 %v942_v58, 16  ;;  %v851_v11 = vsel %vm3272_vm6, %v559_v0, %v850_v60  ;;  %849 = vst [vmem:[#allocation2 + $0x2c] sm:$0x1] %v848_v6  ;;  %v955_v12 = vshll.u32 %v942_v58, 16 }
  0x20   : > { %v569_v15 = vrot.slane %v564_v59, 4  ;;  %v1006_v18 = vld [vmem:[#allocation2 + $0x18] sm:$0x1]  ;;  %v568_v20 = vsel %vm3265_vm5, %v560_v1, %v567_v5  ;;  %852 = vst [vmem:[#allocation2 + $0x30] sm:$0xf] %v851_v11  ;;  %v949_v21 = vor.u32 %v947_v63, %v946_v7  ;;  %v950_v22 = vrot.slane %v946_v7, 4 }
  0x21   : > { %v954_v23 = vrot.slane %v952_v8, 7  ;;  %v1007_v24 = vsel %vm3296_vm7, 0, %v1006_v18  ;;  %v1003_v25 = vld [vmem:[#allocation2 + $0xc] sm:$0x1]  ;;  %853 = vst.msk [vmem:[#allocation2 + $0x34] sm:$0xf] %vm823_vm2, %v568_v20 }
  0x22   : > { %v855_v26 = vsel %vm3296_vm7, %v569_v15, %v854_v9  ;;  %v571_v27 = vshrl.u32 %v475_v10, 16  ;;  %1008 = vst [vmem:[#allocation2 + $0x18] sm:$0x1] %v1007_v24  ;;  %v1004_v28 = vsel %vm3296_vm7, 0, %v1003_v25  ;;  %v1009_v29 = vld [vmem:[#allocation2 + $0x24] sm:$0x1]  ;;  %v964_v32 = vsel %vm3272_vm6, %v949_v21, %v963_v4 }
  0x23   : > { %v957_v30 = vor.u32 %v955_v12, %v954_v23  ;;  %v959_v31 = vrot.slane %v954_v23, 4  ;;  %856 = vst [vmem:[#allocation2 + $0x38] sm:$0x1] %v855_v26  ;;  %1005 = vst [vmem:[#allocation2 + $0xc] sm:$0x1] %v1004_v28  ;;  %v1010_v33 = vsel %vm3296_vm7, 0, %v1009_v29 }
  0x24   : > { %965 = vst [vmem:[#allocation2] sm:$0xf] %v964_v32  ;;  %v573_v35 = vrot.slane %v571_v27, 7  ;;  %v574_v36 = vshll.u32 %v475_v10, 16  ;;  %v579_v37 = vshrl.u32 %v476_v16, 16  ;;  %v582_v40 = vshll.u32 %v476_v16, 16 }
  0x25   : > { %1011 = vst [vmem:[#allocation2 + $0x24] sm:$0x1] %v1010_v33  ;;  %v958_v38 = vsel %vm3265_vm5, %v950_v22, %v957_v30  ;;  %v968_v39 = vsel %vm3296_vm7, %v959_v31, %v967_v14  ;;  %v857_v41 = vld [vmem:[#allocation2 + $0x3c] sm:$0xf]  ;;  %v861_v42 = vld [vmem:[#allocation2 + $0x44] sm:$0x1] }
  0x26   : > { %v588_v43 = vshrl.u32 %v477_v17, 16  ;;  %v1058_v44 = vld [vmem:[#allocation2 + $0x14] sm:$0x1]  ;;  %v1061_v45 = vld [vmem:[#allocation2 + $0x20] sm:$0x1]  ;;  %v576_v46 = vor.u32 %v574_v36, %v573_v35  ;;  %v577_v47 = vrot.slane %v573_v35, 4 }
  0x27   : > { %966 = vst.msk [vmem:[#allocation2 + $0x4] sm:$0xf] %vm823_vm2, %v958_v38  ;;  %969 = vst [vmem:[#allocation2 + $0x8] sm:$0x1] %v968_v39  ;;  %v581_v49 = vrot.slane %v579_v37, 7  ;;  %v1059_v50 = vsel %vm3333_vm8, 0, %v1058_v44 }
  0x28   : > { %v1062_v51 = vsel %vm3333_vm8, 0, %v1061_v45  ;;  %v1064_v52 = vld [vmem:[#allocation2 + $0x2c] sm:$0x1]  ;;  %v3180_v53 = vmov 0   ;;  %v3348_v54 = vrot.slane %v588_v43, 7  ;;  %v591_v55 = vshll.u32 %v477_v17, 16 }
  0x29   : > { %1114 = vst.msk [vmem:[#allocation2 + $0x4] sm:$0xf] %vm823_vm2, %v3180_v53  ;;  %v1012_v56 = vld [vmem:[#allocation2 + $0x30] sm:$0x1]  ;;  %1060 = vst [vmem:[#allocation2 + $0x14] sm:$0x1] %v1059_v50  ;;  %v584_v58 = vor.u32 %v582_v40, %v581_v49  ;;  %v858_v59 = vsel %vm3272_vm6, %v576_v46, %v857_v41 }
  0x2a   : > { %1063 = vst [vmem:[#allocation2 + $0x20] sm:$0x1] %v1062_v51  ;;  %v1065_v57 = vsel %vm3333_vm8, 0, %v1064_v52  ;;  %v586_v60 = vrot.slane %v581_v49, 4  ;;  %v864_v61 = vld [vmem:[#allocation2 + $0x48] sm:$0xf]  ;;  %v593_v63 = vor.u32 %v591_v55, %v3348_v54 }
  0x2b   : > { %v1013_v62 = vsel %vm3296_vm7, 0, %v1012_v56  ;;  %1066 = vst [vmem:[#allocation2 + $0x2c] sm:$0x1] %v1065_v57  ;;  %859 = vst [vmem:[#allocation2 + $0x3c] sm:$0xf] %v858_v59  ;;  %v3357_v0 = vld [vmem:[#allocation2 + $0x18] sm:$0xff]   ;;  %v585_v2 = vsel %vm3265_vm5, %v577_v47, %v584_v58 }
  0x2c   : > { %1014 = vst [vmem:[#allocation2 + $0x30] sm:$0x1] %v1013_v62  ;;  %v1067_v1 = vld [vmem:[#allocation2 + $0x38] sm:$0x1]  ;;  %v862_v3 = vsel %vm3296_vm7, %v586_v60, %v861_v42  ;;  %v3363_v4 = vld [vmem:[#allocation2 + $0xc] sm:$0xff]   ;;  %v865_v7 = vsel %vm3272_vm6, %v593_v63, %v864_v61  ;;  %1615 = vrot.lane.b32.xlu1 %v3357_v0, %s3181_s10  ;;  %v3372_v8 = vld [vmem:[#allocation2 + $0x24] sm:$0xff]  }
  0x2d   : > { %v1000_v5 = vld [vmem:[#allocation2] sm:$0x1]  ;;  %v1068_v6 = vsel %vm3333_vm8, 0, %v1067_v1  ;;  %860 = vst.msk [vmem:[#allocation2 + $0x40] sm:$0xf] %vm823_vm2, %v585_v2  ;;  %1613 = vrot.lane.b32.xlu0 %v3363_v4, %s3181_s10  ;;  %v1531_v15 = vrot.slane %v3363_v4, 1 }
  0x2e   : > { %863 = vst [vmem:[#allocation2 + $0x44] sm:$0x1] %v862_v3  ;;  %v1001_v9 = vsel %vm3296_vm7, 0, %v1000_v5  ;;  %1069 = vst [vmem:[#allocation2 + $0x38] sm:$0x1] %v1068_v6  ;;  %v1330_v17 = vshll.u32 %v3357_v0, 16 }
  0x2f   : > { %866 = vst [vmem:[#allocation2 + $0x48] sm:$0xf] %v865_v7  ;;  %1002 = vst [vmem:[#allocation2] sm:$0x1] %v1001_v9  ;;  %v1055_v10 = vld [vmem:[#allocation2 + $0x8] sm:$0x1] }
  0x30   : > { %v1056_v11 = vsel %vm3333_vm8, 0, %v1055_v10  ;;  %1113 = vst.msk [vmem:[#allocation2] sm:$0xf] %vm823_vm2, %v3180_v53  ;;  %v3383_v12 = vld [vmem:[%s3256_s29 + $0x2c] sm:$0xf]  ;;  %1734 = vrot.lane.b32.xlu1 %v3372_v8, %s3182_s11  ;;  %v1318_v21 = vshll.u32 %v3363_v4, 16 }
  0x31   : > { %v3114_v14 = vld [vmem:[#allocation2 + $0x14] ss:$0 sps:$4 sm:$0x11]   ;;  %1057 = vst [vmem:[#allocation2 + $0x8] sm:$0x1] %v1056_v11  ;;  %1732 = vrot.lane.b32.xlu0 %v3357_v0, %s3182_s11  ;;  %v1534_v22 = vrot.slane %v3357_v0, 1 }
  0x32   : > { %v3115_v16 = vld [vmem:[#allocation2 + $0x20] ss:$0 sps:$4 sm:$0x11]   ;;  %1116 = vst.msk [vmem:[#allocation2 + $0x8] sm:$0x1] %vm831_vm4, %v3180_v53  ;;  %v1532_v20 = vrot.slane %v3114_v14, 1 }
  0x33   : > { %v3393_v18 = vld [vmem:[#allocation2 + $0x30] sm:$0xff]   ;;  %v1342_v23 = vshll.u32 %v3372_v8, 16  ;;  %v596_v24 = vshrl.u32 %v3383_v12, 16  ;;  %v3116_v25 = vld [vmem:[#allocation2 + $0x2c] ss:$0 sps:$4 sm:$0x11]  }
  0x34   : > { %1619 = vrot.lane.b32.xlu1 %v3393_v18, %s3181_s10  ;;  %v1537_v26 = vrot.slane %v3372_v8, 1  ;;  %v1328_v27 = vshrl.u32 %v3357_v0, 16  ;;  %v1316_v28 = vshrl.u32 %v3363_v4, 16  ;;  %v1533_v29 = vsel %vm1527_vm9, %v1531_v15, %v1532_v20  ;;  %v1015_v42 = vld [vmem:[#allocation2 + $0x3c] sm:$0x1] }
  0x35   : > { %1617 = vrot.lane.b32.xlu0 %v3372_v8, %s3181_s10  ;;  %v1535_v30 = vrot.slane %v3115_v16, 1  ;;  %v1332_v31 = vrot.slane %v1330_v17, 1  ;;  %v1340_v32 = vshrl.u32 %v3372_v8, 16  ;;  %v1335_v35 = vshll.u32 %v3115_v16, 16  ;;  %v1070_v43 = vld [vmem:[#allocation2 + $0x44] sm:$0x1] }
  0x36   : > { %v1320_v36 = vrot.slane %v1318_v21, 1  ;;  %v1323_v37 = vshll.u32 %v3114_v14, 16  ;;  %v1344_v39 = vrot.slane %v1342_v23, 1  ;;  %v1538_v40 = vrot.slane %v3116_v25, 1  ;;  %v479_v49 = vld [vmem:[%s3256_s29 + $0x30] sm:$0xf] }
  0x37   : > { %v3408_v33 = vld [vmem:[#allocation2] sm:$0xff]   ;;  %v1347_v41 = vshll.u32 %v3116_v25, 16  ;;  %v3415_v44 = vsel %vm1527_vm9, %v1534_v22, %v1535_v30  ;;  %v3417_v45 = vor.u32 %v1332_v31, %v1328_v27  ;;  %v594_v46 = vrot.slane %v3348_v54, 4  ;;  %v480_v50 = vld [vmem:[%s3256_s29 + $0x34] sm:$0xf] }
  0x38   : > { %1578 = vrot.lane.b32.xlu1 %v1533_v29, %s3183_s12  ;;  %v599_v47 = vshll.u32 %v3383_v12, 16  ;;  %v1528_v51 = vrot.slane %v3408_v33, 1  ;;  %v3425_v55 = vrot.slane %v1335_v35, 1  ;;  %v3427_v56 = vor.u32 %v1320_v36, %v1316_v28  ;;  %v1018_v57 = vld [vmem:[#allocation2 + $0x48] sm:$0x1] }
  0x39   : > { %v3410_v38 = vld [vmem:[#allocation2 + $0x8] ss:$0 sps:$4 sm:$0x11]   ;;  %1695 = vrot.lane.b32.xlu0 %v1533_v29, %s3184_s13  ;;  %v3429_v58 = vrot.slane %v1323_v37, 1  ;;  %v3431_v59 = vor.u32 %v1344_v39, %v1340_v32  ;;  %v1016_v54 = vsel %vm3296_vm7, 0, %v1015_v42  ;;  %v1071_v60 = vsel %vm3333_vm8, 0, %v1070_v43 }
  0x3a   : > { %v1529_v52 = vrot.slane %v3410_v38, 1  ;;  %v868_v61 = vld [vmem:[#allocation2 + $0x50] sm:$0x1]  ;;  %v3440_v62 = vsel %vm1527_vm9, %v1537_v26, %v1538_v40  ;;  %v3442_v63 = vrot.slane %v1347_v41, 1  ;;  %v1352_v0 = vshrl.u32 %v3393_v18, 16 }
  0x3b   : > { %1017 = vst [vmem:[#allocation2 + $0x3c] sm:$0x1] %v1016_v54  ;;  %1072 = vst [vmem:[#allocation2 + $0x44] sm:$0x1] %v1071_v60  ;;  %v598_v1 = vrot.slane %v596_v24, 7  ;;  %v1019_v3 = vsel %vm3296_vm7, 0, %v1018_v57  ;;  %v3482_v57 = vsel %vm1302_vm10, %v3417_v45, %v3425_v55 }
  0x3c   : > { %1697 = vrot.lane.b32.xlu1 %v3415_v44, %s3184_s13  ;;  %v481_v2 = vld [vmem:[%s3256_s29 + $0x38] sm:$0xf]  ;;  %v605_v4 = vshrl.u32 %v479_v49, 16  ;;  %v608_v5 = vshll.u32 %v479_v49, 16  ;;  %v613_v6 = vshrl.u32 %v480_v50, 16  ;;  %v1530_v8 = vsel %vm1527_vm9, %v1528_v51, %v1529_v52  ;;  %v3133_v52 = vld [vmem:[%s4168_s3] sm:$0xff]  }
  0x3d   : > { %1814 = vrot.lane.b32.xlu0 %v3415_v44, %s3185_s14  ;;  %v482_v7 = vld [vmem:[%s3256_s29 + $0x3c] sm:$0xf]  ;;  %v601_v9 = vor.u32 %v599_v47, %v598_v1  ;;  %1020 = vst [vmem:[#allocation2 + $0x48] sm:$0x1] %v1019_v3  ;;  %v603_v10 = vrot.slane %v598_v1, 4  ;;  %v616_v11 = vshll.u32 %v480_v50, 16  ;;  %v1326_v1 = vsel %vm1302_vm10, %v3427_v56, %v3429_v58  ;;  %3031 = vmatprep.subr.bf16.mxu0 %v3133_v52 }
  0x3e   : > { %v871_v12 = vld [vmem:[#allocation2 + $0x54] sm:$0xf]  ;;  %v875_v14 = vld [vmem:[#allocation2 + $0x5c] sm:$0x1]  ;;  %v607_v15 = vrot.slane %v605_v4, 7  ;;  %v615_v16 = vrot.slane %v613_v6, 7  ;;  %3069 = vmatprep.subr.bf16.mxu1 %v3133_v52  ;;  %3032 = vmatpush3.bf16.msra.mxu0 %v3133_v52 }
  0x3f   : > { %v622_v17 = vshrl.u32 %v481_v2, 16  ;;  %v625_v20 = vshll.u32 %v481_v2, 16  ;;  %v483_v21 = vld [vmem:[%s3256_s29 + $0x40] sm:$0xf]  ;;  %v602_v23 = vsel %vm3265_vm5, %v594_v46, %v601_v9  ;;  %v869_v24 = vsel %vm3296_vm7, %v603_v10, %v868_v61  ;;  %v484_v37 = vld [vmem:[%s3256_s29 + $0x44] sm:$0xf]  ;;  %3072 = vmatpush3.bf16.msra.mxu1 %v3133_v52 }
  0x40   : > { %1582 = vrot.lane.b32.xlu1 %v3440_v62, %s3183_s12  ;;  %v3455_v22 = vld [vmem:[#allocation2 + $0x38] ss:$0 sps:$4 sm:$0x11]   ;;  %v630_v25 = vshrl.u32 %v482_v7, 16  ;;  %v633_v26 = vshll.u32 %v482_v7, 16  ;;  %v610_v27 = vor.u32 %v608_v5, %v607_v15  ;;  %v611_v28 = vrot.slane %v607_v15, 4 }
  0x41   : > { %1816 = vrot.lane.b32.xlu0 %v3440_v62, %s3185_s14  ;;  %867 = vst.msk [vmem:[#allocation2 + $0x4c] sm:$0xf] %vm823_vm2, %v602_v23  ;;  %870 = vst [vmem:[#allocation2 + $0x50] sm:$0x1] %v869_v24  ;;  %v618_v29 = vor.u32 %v616_v11, %v615_v16  ;;  %v620_v30 = vrot.slane %v615_v16, 4  ;;  %v1306_v32 = vshll.u32 %v3408_v33, 16 }
  0x42   : > { %v878_v31 = vld [vmem:[#allocation2 + $0x60] sm:$0xf]  ;;  %v624_v35 = vrot.slane %v622_v17, 7  ;;  %v632_v36 = vrot.slane %v630_v25, 7  ;;  %v639_v39 = vshrl.u32 %v483_v21, 16  ;;  %v872_v41 = vsel %vm3272_vm6, %v610_v27, %v871_v12  ;;  %v3135_v58 = vld [vmem:[%s4168_s3 + $0x8] sm:$0xff]  }
  0x43   : > { %v619_v40 = vsel %vm3265_vm5, %v611_v28, %v618_v29  ;;  %v876_v42 = vsel %vm3296_vm7, %v620_v30, %v875_v14  ;;  %v642_v43 = vshll.u32 %v483_v21, 16  ;;  %873 = vst [vmem:[#allocation2 + $0x54] sm:$0xf] %v872_v41  ;;  %v882_v51 = vld [vmem:[#allocation2 + $0x68] sm:$0x1]  ;;  %v1354_v54 = vshll.u32 %v3393_v18, 16  ;;  %3033 = vmatprep.subr.bf16.mxu0 %v3135_v58  ;;  %3070 = vmatprep.subr.bf16.mxu1 %v3135_v58 }
  0x44   : > { %1576 = vrot.lane.b32.xlu1 %v1530_v8, %s3183_s12  ;;  %874 = vst.msk [vmem:[#allocation2 + $0x58] sm:$0xf] %vm823_vm2, %v619_v40  ;;  %877 = vst [vmem:[#allocation2 + $0x5c] sm:$0x1] %v876_v42  ;;  %v627_v46 = vor.u32 %v625_v20, %v624_v35  ;;  %v628_v47 = vrot.slane %v624_v35, 4  ;;  %v635_v49 = vor.u32 %v633_v26, %v632_v36  ;;  %v637_v50 = vrot.slane %v632_v36, 4 }
  0x45   : > { %1580 = vrot.lane.b32.xlu0 %v3415_v44, %s3183_s12  ;;  %v641_v60 = vrot.slane %v639_v39, 7  ;;  %v647_v61 = vshrl.u32 %v484_v37, 16  ;;  %v1359_v2 = vshll.u32 %v3455_v22, 16  ;;  %v1304_v45 = vshrl.u32 %v3408_v33, 16  ;;  %v885_v56 = vld [vmem:[#allocation2 + $0x6c] sm:$0xf]  ;;  %3034 = vmatpush3.bf16.msra.mxu0 %v3135_v58 }
  0x46   : > { %v636_v3 = vsel %vm3265_vm5, %v628_v47, %v635_v49  ;;  %v879_v44 = vsel %vm3272_vm6, %v627_v46, %v878_v31  ;;  %v883_v55 = vsel %vm3296_vm7, %v637_v50, %v882_v51  ;;  %v3505_v33 = vsel %vm1302_vm10, %v3431_v59, %v3442_v63  ;;  %v889_v63 = vld [vmem:[#allocation2 + $0x74] sm:$0x1]  ;;  %v485_v12 = vld [vmem:[%s3256_s29 + $0x48] sm:$0xf]  ;;  %v486_v14 = vld [vmem:[%s3256_s29 + $0x4c] sm:$0xf]  ;;  %3073 = vmatpush3.bf16.msra.mxu1 %v3135_v58 }
  0x47   : > { %880 = vst [vmem:[#allocation2 + $0x60] sm:$0xf] %v879_v44  ;;  %881 = vst.msk [vmem:[#allocation2 + $0x64] sm:$0xf] %vm823_vm2, %v636_v3  ;;  %v644_v4 = vor.u32 %v642_v43, %v641_v60  ;;  %v1308_v5 = vrot.slane %v1306_v32, 1  ;;  %v1311_v6 = vshll.u32 %v3410_v38, 16 }
  0x48   : > { %1662 = vrot.lane.b32.xlu1 %v3482_v57, %s3186_s19  ;;  %v1073_v7 = vld [vmem:[#allocation2 + $0x50] sm:$0x1]  ;;  %884 = vst [vmem:[#allocation2 + $0x68] sm:$0x1] %v883_v55  ;;  %v645_v9 = vrot.slane %v641_v60, 4  ;;  %v649_v10 = vrot.slane %v647_v61, 7 }
  0x49   : > { %1497 = vrot.lane.b32.xlu0 %v1326_v1, %s3187_s20  ;;  %v1074_v8 = vsel %vm3333_vm8, 0, %v1073_v7  ;;  %v650_v11 = vshll.u32 %v484_v37, 16  ;;  %v886_v59 = vsel %vm3272_vm6, %v644_v4, %v885_v56  ;;  %v1356_v17 = vrot.slane %v1354_v54, 1  ;;  %v487_v28 = vld [vmem:[%s3256_s29 + $0x50] sm:$0xf]  ;;  %v3540_v47 = vld [vmem:[#allocation2 + $0x3c] sm:$0xff]  }
  0x4a   : > { %1075 = vst [vmem:[#allocation2 + $0x50] sm:$0x1] %v1074_v8  ;;  %v1021_v38 = vld [vmem:[#allocation2 + $0x54] sm:$0x1]  ;;  %887 = vst [vmem:[#allocation2 + $0x6c] sm:$0xf] %v886_v59  ;;  %v1309_v29 = vor.u32 %v1308_v5, %v1304_v45 }
  0x4b   : > { %v1076_v15 = vld [vmem:[#allocation2 + $0x5c] sm:$0x1]  ;;  %v652_v16 = vor.u32 %v650_v11, %v649_v10  ;;  %v1022_v20 = vsel %vm3296_vm7, 0, %v1021_v38  ;;  %v654_v23 = vrot.slane %v649_v10, 4  ;;  %v656_v25 = vshrl.u32 %v485_v12, 16 }
  0x4c   : > { %1781 = vrot.lane.b32.xlu1 %v3505_v33, %s3188_s21  ;;  %v1077_v21 = vsel %vm3333_vm8, 0, %v1076_v15  ;;  %1023 = vst [vmem:[#allocation2 + $0x54] sm:$0x1] %v1022_v20  ;;  %v659_v26 = vshll.u32 %v485_v12, 16  ;;  %v664_v27 = vshrl.u32 %v486_v14, 16  ;;  %v1313_v30 = vrot.slane %v1311_v6, 1 }
  0x4d   : > { %1660 = vrot.lane.b32.xlu0 %v1326_v1, %s3186_s19  ;;  %1078 = vst [vmem:[#allocation2 + $0x5c] sm:$0x1] %v1077_v21  ;;  %v653_v24 = vsel %vm3265_vm5, %v645_v9, %v652_v16  ;;  %v890_v32 = vsel %vm3296_vm7, %v654_v23, %v889_v63  ;;  %v667_v35 = vshll.u32 %v486_v14, 16  ;;  %v658_v39 = vrot.slane %v656_v25, 7  ;;  %v892_v43 = vld [vmem:[#allocation2 + $0x78] sm:$0xf] }
  0x4e   : > { %v1024_v31 = vld [vmem:[#allocation2 + $0x60] sm:$0x1]  ;;  %888 = vst.msk [vmem:[#allocation2 + $0x70] sm:$0xf] %vm823_vm2, %v653_v24  ;;  %891 = vst [vmem:[#allocation2 + $0x74] sm:$0x1] %v890_v32  ;;  %v1357_v46 = vor.u32 %v1356_v17, %v1352_v0  ;;  %v1314_v54 = vsel %vm1302_vm10, %v1309_v29, %v1313_v30 }
  0x4f   : > { %v1025_v36 = vsel %vm3296_vm7, 0, %v1024_v31  ;;  %v1079_v37 = vld [vmem:[#allocation2 + $0x68] sm:$0x1]  ;;  %v666_v40 = vrot.slane %v664_v27, 7  ;;  %v1361_v41 = vrot.slane %v1359_v2, 1  ;;  %v661_v49 = vor.u32 %v659_v26, %v658_v39 }
  0x50   : > { %1499 = vrot.lane.b32.xlu1 %v3482_v57, %s3187_s20  ;;  %1026 = vst [vmem:[#allocation2 + $0x60] sm:$0x1] %v1025_v36  ;;  %v1080_v42 = vsel %vm3333_vm8, 0, %v1079_v37  ;;  %v662_v50 = vrot.slane %v658_v39, 4  ;;  %v896_v52 = vld [vmem:[#allocation2 + $0x80] sm:$0x1] }
  0x51   : > { %1779 = vrot.lane.b32.xlu0 %v3482_v57, %s3188_s21  ;;  %1081 = vst [vmem:[#allocation2 + $0x68] sm:$0x1] %v1080_v42  ;;  %v669_v51 = vor.u32 %v667_v35, %v666_v40  ;;  %v1027_v60 = vld [vmem:[#allocation2 + $0x6c] sm:$0x1]  ;;  %v671_v61 = vrot.slane %v666_v40, 4  ;;  %v673_v1 = vshrl.u32 %v487_v28, 16  ;;  %v893_v44 = vsel %vm3272_vm6, %v661_v49, %v892_v43 }
  0x52   : > { %v1540_v2 = vrot.slane %v3393_v18, 1  ;;  %v1028_v57 = vsel %vm3296_vm7, 0, %v1027_v60  ;;  %v1541_v3 = vrot.slane %v3455_v22, 1  ;;  %v3560_v4 = vsel %vm1302_vm10, %v1357_v46, %v1361_v41  ;;  %v3562_v56 = vld [vmem:[#allocation2 + $0x44] ss:$0 sps:$4 sm:$0x11]  }
  0x53   : > { %v670_v0 = vsel %vm3265_vm5, %v662_v50, %v669_v51  ;;  %1029 = vst [vmem:[#allocation2 + $0x6c] sm:$0x1] %v1028_v57  ;;  %v897_v45 = vsel %vm3296_vm7, %v671_v61, %v896_v52  ;;  %v3556_v55 = vrot.slane %v673_v1, 7  ;;  %v1366_v22 = vshll.u32 %v3540_v47, 16  ;;  %894 = vst [vmem:[#allocation2 + $0x78] sm:$0xf] %v893_v44 }
  0x54   : > { %1501 = vrot.lane.b32.xlu1 %v3505_v33, %s3187_s20  ;;  %895 = vst.msk [vmem:[#allocation2 + $0x7c] sm:$0xf] %vm823_vm2, %v670_v0  ;;  %898 = vst [vmem:[#allocation2 + $0x80] sm:$0x1] %v897_v45  ;;  %v676_v5 = vshll.u32 %v487_v28, 16  ;;  %v3573_v9 = vsel %vm1527_vm9, %v1540_v2, %v1541_v3  ;;  %v1364_v10 = vshrl.u32 %v3540_v47, 16 }
  0x55   : > { %1495 = vrot.lane.b32.xlu0 %v1314_v54, %s3187_s20  ;;  %v1082_v58 = vld [vmem:[#allocation2 + $0x74] sm:$0x1]  ;;  %v899_v8 = vld [vmem:[#allocation2 + $0x84] sm:$0xf]  ;;  %v1368_v11 = vrot.slane %v1366_v22, 1  ;;  %v1371_v59 = vshll.u32 %v3562_v56, 16 }
  0x56   : > { %v1083_v6 = vsel %vm3333_vm8, 0, %v1082_v58  ;;  %v678_v7 = vor.u32 %v676_v5, %v3556_v55  ;;  %v488_v63 = vld [vmem:[%s3256_s29 + $0x54] sm:$0xf]  ;;  %v3136_v16 = vld [vmem:[%s4168_s3 + $0x10] ss:$0 sps:$4 sm:$0x33]  }
  0x57   : > { %1084 = vst [vmem:[#allocation2 + $0x74] sm:$0x1] %v1083_v6  ;;  %v1373_v15 = vrot.slane %v1371_v59, 1  ;;  %v681_v21 = vshrl.u32 %v488_v63, 16  ;;  %v684_v23 = vshll.u32 %v488_v63, 16  ;;  %v3591_v24 = vld [vmem:[#allocation2 + $0x48] sm:$0xff]   ;;  %3075 = vmatprep.subr.msk.bf16.mxu0 %vm2163_vm11, %v3136_v16  ;;  %3076 = vmatprep.subr.msk.bf16.mxu1 %vm2163_vm11, %v3136_v16 }
  0x58   : > { %1666 = vrot.lane.b32.xlu1 %v3560_v4, %s3186_s19  ;;  %v900_v12 = vsel %vm3272_vm6, %v678_v7, %v899_v8  ;;  %v679_v25 = vrot.slane %v3556_v55, 4  ;;  %v490_v27 = vld [vmem:[%s3256_s29 + $0x5c] sm:$0xf]  ;;  %v1543_v29 = vrot.slane %v3540_v47, 1  ;;  %v903_v30 = vld [vmem:[#allocation2 + $0x8c] sm:$0x1] }
  0x59   : > { %1664 = vrot.lane.b32.xlu0 %v3505_v33, %s3186_s19  ;;  %901 = vst [vmem:[#allocation2 + $0x84] sm:$0xf] %v900_v12  ;;  %v1369_v33 = vor.u32 %v1368_v11, %v1364_v10  ;;  %v683_v26 = vrot.slane %v681_v21, 7  ;;  %v2165_v31 = vsel %vm2163_vm11, %v3136_v16, 0  ;;  %v491_v39 = vld [vmem:[%s3256_s29 + $0x60] sm:$0xf] }
  0x5a   : > { %v1030_v14 = vld [vmem:[#allocation2 + $0x78] sm:$0x1]  ;;  %3036 = vmatpush3.bf16.msra.mxu0 %v2165_v31  ;;  %v1544_v40 = vrot.slane %v3562_v56, 1  ;;  %v698_v42 = vshrl.u32 %v490_v27, 16  ;;  %v701_v43 = vshll.u32 %v490_v27, 16  ;;  %3074 = vmatpush3.bf16.msra.mxu1 %v2165_v31  ;;  %v707_v1 = vshrl.u32 %v491_v39, 16 }
  0x5b   : > { %v1085_v38 = vld [vmem:[#allocation2 + $0x80] sm:$0x1]  ;;  %v1031_v17 = vsel %vm3296_vm7, 0, %v1030_v14  ;;  %v3601_v28 = vsel %vm1302_vm10, %v1369_v33, %v1373_v15  ;;  %v686_v32 = vor.u32 %v684_v23, %v683_v26  ;;  %v688_v35 = vrot.slane %v683_v26, 4  ;;  %v492_v52 = vld [vmem:[%s3256_s29 + $0x64] sm:$0xf] }
  0x5c   : > { %1701 = vrot.lane.b32.xlu1 %v3573_v9, %s3184_s13  ;;  %v1086_v20 = vsel %vm3333_vm8, 0, %v1085_v38  ;;  %1032 = vst [vmem:[#allocation2 + $0x78] sm:$0x1] %v1031_v17  ;;  %v700_v54 = vrot.slane %v698_v42, 7  ;;  %v906_v60 = vld [vmem:[#allocation2 + $0x90] sm:$0xf]  ;;  %v3633_v8 = vsel %vm1527_vm9, %v1543_v29, %v1544_v40 }
  0x5d   : > { %1699 = vrot.lane.b32.xlu0 %v3440_v62, %s3184_s13  ;;  %1087 = vst [vmem:[#allocation2 + $0x80] sm:$0x1] %v1086_v20  ;;  %v489_v62 = vld [vmem:[%s3256_s29 + $0x58] sm:$0xf]  ;;  %v687_v46 = vsel %vm3265_vm5, %v679_v25, %v686_v32  ;;  %v904_v50 = vsel %vm3296_vm7, %v688_v35, %v903_v30  ;;  %v710_v0 = vshll.u32 %v491_v39, 16  ;;  %v709_v45 = vrot.slane %v707_v1, 7 }
  0x5e   : > { %v690_v36 = vshrl.u32 %v489_v62, 16  ;;  %v693_v37 = vshll.u32 %v489_v62, 16  ;;  %902 = vst.msk [vmem:[#allocation2 + $0x88] sm:$0xf] %vm823_vm2, %v687_v46  ;;  %905 = vst [vmem:[#allocation2 + $0x8c] sm:$0x1] %v904_v50  ;;  %v703_v3 = vor.u32 %v701_v43, %v700_v54 }
  0x5f   : > { %v910_v61 = vld [vmem:[#allocation2 + $0x98] sm:$0x1]  ;;  %v705_v44 = vrot.slane %v700_v54, 4  ;;  %v715_v55 = vshrl.u32 %v492_v52, 16  ;;  %v493_v58 = vld [vmem:[%s3256_s29 + $0x68] sm:$0xf]  ;;  %v712_v10 = vor.u32 %v710_v0, %v709_v45 }
  0x60   : > { %1738 = vrot.lane.b32.xlu1 %v3540_v47, %s3182_s11  ;;  %v1033_v41 = vld [vmem:[#allocation2 + $0x84] sm:$0x1]  ;;  %v692_v51 = vrot.slane %v690_v36, 7  ;;  %v3621_v56 = vld [vmem:[#allocation2 + $0x50] ss:$0 sps:$4 sm:$0x11]  }
  0x61   : > { %1736 = vrot.lane.b32.xlu0 %v3393_v18, %s3182_s11  ;;  %v1378_v18 = vshll.u32 %v3591_v24, 16  ;;  %v1034_v49 = vsel %vm3296_vm7, 0, %v1033_v41  ;;  %v911_v6 = vsel %vm3296_vm7, %v705_v44, %v910_v61  ;;  %v913_v7 = vld [vmem:[#allocation2 + $0x9c] sm:$0xf]  ;;  %v717_v11 = vrot.slane %v715_v55, 7  ;;  %v3649_v32 = vld [vmem:[#allocation2 + $0x54] sm:$0xff]  }
  0x62   : > { %1035 = vst [vmem:[#allocation2 + $0x84] sm:$0x1] %v1034_v49  ;;  %v695_v2 = vor.u32 %v693_v37, %v692_v51  ;;  %v696_v57 = vrot.slane %v692_v51, 4  ;;  %912 = vst [vmem:[#allocation2 + $0x98] sm:$0x1] %v911_v6  ;;  %v713_v12 = vrot.slane %v709_v45, 4  ;;  %v914_v16 = vsel %vm3272_vm6, %v712_v10, %v913_v7 }
  0x63   : > { %v494_v59 = vld [vmem:[%s3256_s29 + $0x6c] sm:$0xf]  ;;  %v1380_v63 = vrot.slane %v1378_v18, 1  ;;  %v718_v14 = vshll.u32 %v492_v52, 16  ;;  %v917_v38 = vld [vmem:[#allocation2 + $0xa4] sm:$0x1] }
  0x64   : > { %1785 = vrot.lane.b32.xlu1 %v3601_v28, %s3188_s21  ;;  %v907_v22 = vsel %vm3272_vm6, %v695_v2, %v906_v60  ;;  %v704_v5 = vsel %vm3265_vm5, %v696_v57, %v703_v3  ;;  %v724_v33 = vshrl.u32 %v493_v58, 16  ;;  %v1383_v15 = vshll.u32 %v3621_v56, 16  ;;  %915 = vst [vmem:[#allocation2 + $0x9c] sm:$0xf] %v914_v16  ;;  %v920_v29 = vld [vmem:[#allocation2 + $0xa8] sm:$0xf] }
  0x65   : > { %1783 = vrot.lane.b32.xlu0 %v3560_v4, %s3188_s21  ;;  %908 = vst [vmem:[#allocation2 + $0x90] sm:$0xf] %v907_v22  ;;  %909 = vst.msk [vmem:[#allocation2 + $0x94] sm:$0xf] %vm823_vm2, %v704_v5  ;;  %v722_v17 = vrot.slane %v717_v11, 4  ;;  %v720_v21 = vor.u32 %v718_v14, %v717_v11  ;;  %v727_v62 = vshll.u32 %v493_v58, 16 }
  0x66   : > { %v1088_v20 = vld [vmem:[#allocation2 + $0x8c] sm:$0x1]  ;;  %v726_v23 = vrot.slane %v724_v33, 7  ;;  %v732_v25 = vshrl.u32 %v494_v59, 16  ;;  %v1546_v26 = vrot.slane %v3591_v24, 1  ;;  %v1385_v18 = vrot.slane %v1383_v15, 1 }
  0x67   : > { %v1089_v27 = vsel %vm3333_vm8, 0, %v1088_v20  ;;  %v495_v30 = vld [vmem:[%s3256_s29 + $0x70] sm:$0xf]  ;;  %v721_v35 = vsel %vm3265_vm5, %v713_v12, %v720_v21  ;;  %v918_v36 = vsel %vm3296_vm7, %v722_v17, %v917_v38  ;;  %v496_v40 = vld [vmem:[%s3256_s29 + $0x74] sm:$0xf]  ;;  %v735_v46 = vshll.u32 %v494_v59, 16 }
  0x68   : > { %1503 = vrot.lane.b32.xlu1 %v3560_v4, %s3187_s20  ;;  %v1376_v4 = vshrl.u32 %v3591_v24, 16  ;;  %1090 = vst [vmem:[#allocation2 + $0x8c] sm:$0x1] %v1089_v27  ;;  %v729_v37 = vor.u32 %v727_v62, %v726_v23  ;;  %v924_v39 = vld [vmem:[#allocation2 + $0xb0] sm:$0x1]  ;;  %v730_v42 = vrot.slane %v726_v23, 4 }
  0x69   : > { %1818 = vrot.lane.b32.xlu0 %v3573_v9, %s3185_s14  ;;  %916 = vst.msk [vmem:[#allocation2 + $0xa0] sm:$0xf] %vm823_vm2, %v721_v35  ;;  %919 = vst [vmem:[#allocation2 + $0xa4] sm:$0x1] %v918_v36  ;;  %v734_v43 = vrot.slane %v732_v25, 7  ;;  %v741_v52 = vshrl.u32 %v495_v30, 16 }
  0x6a   : > { %v1381_v31 = vor.u32 %v1380_v63, %v1376_v4  ;;  %v1091_v50 = vld [vmem:[#allocation2 + $0x98] sm:$0x1]  ;;  %v921_v51 = vsel %vm3272_vm6, %v729_v37, %v920_v29  ;;  %v1547_v54 = vrot.slane %v3621_v56, 1  ;;  %v3666_v60 = vld [vmem:[#allocation2 + $0x5c] ss:$0 sps:$4 sm:$0x11]  }
  0x6b   : > { %v1092_v61 = vsel %vm3333_vm8, 0, %v1091_v50  ;;  %v737_v1 = vor.u32 %v735_v46, %v734_v43  ;;  %922 = vst [vmem:[#allocation2 + $0xa8] sm:$0xf] %v921_v51  ;;  %v739_v2 = vrot.slane %v734_v43, 4  ;;  %v744_v57 = vshll.u32 %v495_v30, 16  ;;  %v3734_v51 = vld [vmem:[#allocation2 + $0x60] sm:$0xff]  }
  0x6c   : > { %1505 = vrot.lane.b32.xlu1 %v3601_v28, %s3187_s20  ;;  %v1036_v41 = vld [vmem:[#allocation2 + $0x90] sm:$0x1]  ;;  %1093 = vst [vmem:[#allocation2 + $0x98] sm:$0x1] %v1092_v61  ;;  %v749_v0 = vshrl.u32 %v496_v40, 16  ;;  %v752_v3 = vshll.u32 %v496_v40, 16  ;;  %v3673_v44 = vsel %vm1302_vm10, %v1381_v31, %v1385_v18 }
  0x6d   : > { %1820 = vrot.lane.b32.xlu0 %v3633_v8, %s3185_s14  ;;  %v1037_v49 = vsel %vm3296_vm7, 0, %v1036_v41  ;;  %v1390_v45 = vshll.u32 %v3649_v32, 16  ;;  %v1039_v55 = vld [vmem:[#allocation2 + $0x9c] sm:$0x1]  ;;  %v738_v56 = vsel %vm3265_vm5, %v730_v42, %v737_v1  ;;  %v925_v22 = vsel %vm3296_vm7, %v739_v2, %v924_v39  ;;  %v927_v58 = vld [vmem:[#allocation2 + $0xb4] sm:$0xf] }
  0x6e   : > { %1038 = vst [vmem:[#allocation2 + $0x90] sm:$0x1] %v1037_v49  ;;  %v1040_v5 = vsel %vm3296_vm7, 0, %v1039_v55  ;;  %923 = vst.msk [vmem:[#allocation2 + $0xac] sm:$0xf] %vm823_vm2, %v738_v56  ;;  %v751_v4 = vrot.slane %v749_v0, 7 }
  0x6f   : > { %926 = vst [vmem:[#allocation2 + $0xb0] sm:$0x1] %v925_v22  ;;  %1041 = vst [vmem:[#allocation2 + $0x9c] sm:$0x1] %v1040_v5  ;;  %v931_v10 = vld [vmem:[#allocation2 + $0xbc] sm:$0x1] }
  0x70   : > { %1586 = vrot.lane.b32.xlu1 %v3633_v8, %s3183_s12  ;;  %v1094_v11 = vld [vmem:[#allocation2 + $0xa4] sm:$0x1]  ;;  %v754_v59 = vor.u32 %v752_v3, %v751_v4  ;;  %v756_v12 = vrot.slane %v751_v4, 4  ;;  %v1388_v14 = vshrl.u32 %v3649_v32, 16  ;;  %v1395_v38 = vshll.u32 %v3666_v60, 16 }
  0x71   : > { %1584 = vrot.lane.b32.xlu0 %v3573_v9, %s3183_s12  ;;  %v743_v9 = vrot.slane %v741_v52, 7  ;;  %v1095_v33 = vsel %vm3333_vm8, 0, %v1094_v11  ;;  %v497_v15 = vld [vmem:[%s3256_s29 + $0x78] sm:$0xf]  ;;  %v1392_v16 = vrot.slane %v1390_v45, 1  ;;  %v1550_v61 = vrot.slane %v3666_v60, 1 }
  0x72   : > { %1096 = vst [vmem:[#allocation2 + $0xa4] sm:$0x1] %v1095_v33  ;;  %v1042_v17 = vld [vmem:[#allocation2 + $0xa8] sm:$0x1]  ;;  %v932_v21 = vsel %vm3296_vm7, %v756_v12, %v931_v10  ;;  %v758_v23 = vshrl.u32 %v497_v15, 16  ;;  %v1397_v27 = vrot.slane %v1395_v38, 1 }
  0x73   : > { %v746_v6 = vor.u32 %v744_v57, %v743_v9  ;;  %v747_v7 = vrot.slane %v743_v9, 4  ;;  %933 = vst [vmem:[#allocation2 + $0xbc] sm:$0x1] %v932_v21  ;;  %v1043_v62 = vsel %vm3296_vm7, 0, %v1042_v17  ;;  %v498_v25 = vld [vmem:[%s3256_s29 + $0x7c] sm:$0xf] }
  0x74   : > { %1623 = vrot.lane.b32.xlu1 %v3591_v24, %s3181_s10  ;;  %1044 = vst [vmem:[#allocation2 + $0xa8] sm:$0x1] %v1043_v62  ;;  %v760_v30 = vrot.slane %v758_v23, 7  ;;  %v761_v31 = vshll.u32 %v497_v15, 16  ;;  %v766_v35 = vshrl.u32 %v498_v25, 16  ;;  %v1402_v55 = vshll.u32 %v3734_v51, 16 }
  0x75   : > { %1621 = vrot.lane.b32.xlu0 %v3540_v47, %s3181_s10  ;;  %v928_v63 = vsel %vm3272_vm6, %v746_v6, %v927_v58  ;;  %v3690_v47 = vsel %vm1527_vm9, %v1546_v26, %v1547_v54  ;;  %v755_v20 = vsel %vm3265_vm5, %v747_v7, %v754_v59  ;;  %v1393_v26 = vor.u32 %v1392_v16, %v1388_v14  ;;  %v934_v37 = vld [vmem:[#allocation2 + $0xc0] sm:$0xf]  ;;  %v938_v46 = vld [vmem:[#allocation2 + $0xc8] sm:$0x1]  ;;  %v971_v2 = vld [vmem:[%s443_s30 + $0x4] sm:$0xf] }
  0x76   : > { %929 = vst [vmem:[#allocation2 + $0xb4] sm:$0xf] %v928_v63  ;;  %930 = vst.msk [vmem:[#allocation2 + $0xb8] sm:$0xf] %vm823_vm2, %v755_v20  ;;  %v763_v40 = vor.u32 %v761_v31, %v760_v30  ;;  %v768_v41 = vrot.slane %v766_v35, 7  ;;  %v1549_v54 = vrot.slane %v3649_v32, 1 }
  0x77   : > { %v970_v50 = vld [vmem:[%s443_s30] sm:$0xf]  ;;  %v764_v1 = vrot.slane %v760_v30, 4  ;;  %v981_v3 = vshrl.u32 %v971_v2, 16  ;;  %v993_v58 = vld [vmem:[#allocation2 + $0xcc] sm:$0xf] }
  0x78   : > { %1670 = vrot.lane.b32.xlu1 %v3673_v44, %s3186_s19  ;;  %v935_v43 = vsel %vm3272_vm6, %v763_v40, %v934_v37  ;;  %v773_v49 = vrot.slane %v768_v41, 4  ;;  %v973_v57 = vshrl.u32 %v970_v50, 16  ;;  %v976_v0 = vshll.u32 %v970_v50, 16  ;;  %v3127_v45 = vld [vmem:[#allocation2 + $0x68] ss:$0 sps:$4 sm:$0x11]  }
  0x79   : > { %1668 = vrot.lane.b32.xlu0 %v3601_v28, %s3186_s19  ;;  %v1097_v28 = vld [vmem:[#allocation2 + $0xb0] sm:$0x1]  ;;  %936 = vst [vmem:[#allocation2 + $0xc0] sm:$0xf] %v935_v43  ;;  %v1551_v22 = vsel %vm1527_vm9, %v1549_v54, %v1550_v61  ;;  %v1400_v7 = vshrl.u32 %v3734_v51, 16  ;;  %v1404_v11 = vrot.slane %v1402_v55, 1 }
  0x7a   : > { %v1098_v29 = vsel %vm3333_vm8, 0, %v1097_v28  ;;  %v1100_v18 = vld [vmem:[#allocation2 + $0xbc] sm:$0x1]  ;;  %v939_v52 = vsel %vm3296_vm7, %v773_v49, %v938_v46  ;;  %v975_v60 = vrot.slane %v973_v57, 7  ;;  %v997_v10 = vld [vmem:[#allocation2 + $0xd4] sm:$0x1] }
  0x7b   : > { %1099 = vst [vmem:[#allocation2 + $0xb0] sm:$0x1] %v1098_v29  ;;  %v1101_v42 = vsel %vm3333_vm8, 0, %v1100_v18  ;;  %940 = vst [vmem:[#allocation2 + $0xc8] sm:$0x1] %v939_v52  ;;  %v1407_v59 = vshll.u32 %v3127_v45, 16  ;;  %v1405_v16 = vor.u32 %v1404_v11, %v1400_v7 }
  0x7c   : > { %1705 = vrot.lane.b32.xlu1 %v3690_v47, %s3184_s13  ;;  %1102 = vst [vmem:[#allocation2 + $0xbc] sm:$0x1] %v1101_v42  ;;  %v978_v6 = vor.u32 %v976_v0, %v975_v60  ;;  %v984_v33 = vshll.u32 %v971_v2, 16  ;;  %v3764_v20 = vld [vmem:[#allocation2 + $0x6c] sm:$0xff]   ;;  %v979_v19 = vrot.slane %v975_v60, 4  ;;  %v1552_v62 = vrot.slane %v3734_v51, 1 }
  0x7d   : > { %1703 = vrot.lane.b32.xlu0 %v3633_v8, %s3184_s13  ;;  %v1045_v36 = vld [vmem:[#allocation2 + $0xb4] sm:$0x1]  ;;  %v3720_v8 = vsel %vm1302_vm10, %v1393_v26, %v1397_v27  ;;  %v1409_v17 = vrot.slane %v1407_v59, 1  ;;  %v1414_v26 = vshll.u32 %v3764_v20, 16  ;;  %v1412_v35 = vshrl.u32 %v3764_v20, 16  ;;  %v3828_v55 = vld [vmem:[#allocation2 + $0x84] sm:$0xff]  }
  0x7e   : > { %v1046_v39 = vsel %vm3296_vm7, 0, %v1045_v36  ;;  %v994_v14 = vsel %vm3272_vm6, %v978_v6, %v993_v58  ;;  %v3129_v28 = vld [vmem:[#allocation2 + $0x74] ss:$0 sps:$4 sm:$0x11]   ;;  %v1555_v43 = vrot.slane %v3764_v20, 1  ;;  %v1436_v11 = vshrl.u32 %v3828_v55, 16 }
  0x7f   : > { %1047 = vst [vmem:[#allocation2 + $0xb4] sm:$0x1] %v1046_v39  ;;  %995 = vst [vmem:[#allocation2 + $0xcc] sm:$0xf] %v994_v14  ;;  %v1416_v36 = vrot.slane %v1414_v26, 1  ;;  %v1419_v37 = vshll.u32 %v3129_v28, 16 }
  0x80   : > { %1742 = vrot.lane.b32.xlu1 %v3649_v32, %s3182_s11  ;;  %v1048_v5 = vld [vmem:[#allocation2 + $0xc0] sm:$0x1]  ;;  %v1556_v46 = vrot.slane %v3129_v28, 1  ;;  %v3134_v6 = vld [vmem:[#allocation2 + $0x8c] ss:$0 sps:$4 sm:$0x11]  }
  0x81   : > { %1740 = vrot.lane.b32.xlu0 %v3591_v24, %s3182_s11  ;;  %v769_v24 = vshll.u32 %v498_v25, 16  ;;  %v1049_v4 = vsel %vm3296_vm7, 0, %v1048_v5  ;;  %v1553_v25 = vrot.slane %v3127_v45, 1  ;;  %v1417_v48 = vor.u32 %v1416_v36, %v1412_v35  ;;  %v3867_v26 = vld [vmem:[#allocation2 + $0x90] sm:$0xff]   ;;  %v3150_v35 = vld [vmem:[#allocation2] sm:$0xff]  }
  0x82   : > { %1050 = vst [vmem:[#allocation2 + $0xc0] sm:$0x1] %v1049_v4  ;;  %v1103_v63 = vld [vmem:[#allocation2 + $0xc8] sm:$0x1]  ;;  %v1421_v34 = vrot.slane %v1419_v37, 1  ;;  %v1557_v54 = vsel %vm1527_vm9, %v1555_v43, %v1556_v46 }
  0x83   : > { %v771_v9 = vor.u32 %v769_v24, %v768_v41  ;;  %v1104_v38 = vsel %vm3333_vm8, 0, %v1103_v63  ;;  %v1554_v31 = vsel %vm1527_vm9, %v1552_v62, %v1553_v25  ;;  %v3808_v41 = vld [vmem:[#allocation2 + $0x78] sm:$0xff]   ;;  %v3131_v24 = vld [vmem:[#allocation2 + $0x80] ss:$0 sps:$4 sm:$0x11]   ;;  %v1443_v63 = vshll.u32 %v3134_v6, 16 }
  0x84   : > { %1789 = vrot.lane.b32.xlu1 %v3720_v8, %s3188_s21  ;;  %1105 = vst [vmem:[#allocation2 + $0xc8] sm:$0x1] %v1104_v38  ;;  %v1426_v50 = vshll.u32 %v3808_v41, 16  ;;  %v1558_v58 = vrot.slane %v3808_v41, 1  ;;  %v1559_v5 = vrot.slane %v3131_v24, 1  ;;  %v3149_v38 = vld [vmem:[#allocation2 + $0xc] sm:$0xff]  }
  0x85   : > { %1787 = vrot.lane.b32.xlu0 %v3673_v44, %s3188_s21  ;;  %v772_v56 = vsel %vm3265_vm5, %v764_v1, %v771_v9  ;;  %v1424_v1 = vshrl.u32 %v3808_v41, 16  ;;  %v1431_v9 = vshll.u32 %v3131_v24, 16 }
  0x86   : > { %937 = vst.msk [vmem:[#allocation2 + $0xc4] sm:$0xf] %vm823_vm2, %v772_v56  ;;  %v1051_v27 = vld [vmem:[#allocation2 + $0xcc] sm:$0x1]  ;;  %v1428_v2 = vrot.slane %v1426_v50, 1 }
  0x87   : > { %v1052_v13 = vsel %vm3296_vm7, 0, %v1051_v27  ;;  %v1433_v45 = vrot.slane %v1431_v9, 1 }
  0x88   : > { %1507 = vrot.lane.b32.xlu1 %v3673_v44, %s3187_s20  ;;  %v983_v44 = vrot.slane %v981_v3, 7  ;;  %1053 = vst [vmem:[#allocation2 + $0xcc] sm:$0x1] %v1052_v13  ;;  %v1429_v3 = vor.u32 %v1428_v2, %v1424_v1  ;;  %v1561_v13 = vrot.slane %v3828_v55, 1 }
  0x89   : > { %1822 = vrot.lane.b32.xlu0 %v3690_v47, %s3185_s14  ;;  %1117 = vst.msk [vmem:[#allocation2 + $0xcc] sm:$0xf] %vm823_vm2, %v3180_v53 }
  0x8a   : > { %v988_v12 = vrot.slane %v983_v44, 4  ;;  %v986_v21 = vor.u32 %v984_v33, %v983_v44  ;;  %v1438_v44 = vshll.u32 %v3828_v55, 16 }
  0x8c   : > { %1509 = vrot.lane.b32.xlu1 %v3720_v8, %s3187_s20  ;;  %v998_v15 = vsel %vm3296_vm7, %v988_v12, %v997_v10  ;;  %v987_v23 = vsel %vm3265_vm5, %v979_v19, %v986_v21  ;;  %v3846_v10 = vsel %vm1527_vm9, %v1558_v58, %v1559_v5  ;;  %v1440_v59 = vrot.slane %v1438_v44, 1  ;;  %v3152_v44 = vld [vmem:[#allocation2 + $0x24] sm:$0xff]  }
  0x8d   : > { %1824 = vrot.lane.b32.xlu0 %v1551_v22, %s3185_s14  ;;  %999 = vst [vmem:[#allocation2 + $0xd4] sm:$0x1] %v998_v15  ;;  %996 = vst.msk [vmem:[#allocation2 + $0xd0] sm:$0xf] %vm823_vm2, %v987_v23  ;;  %vm2434_vm5 = vcmask 1040384  }
  0x8e   : > { %1118 = vst.msk [vmem:[#allocation2 + $0xd0] sm:$0xf] %vm823_vm2, %v3180_v53  ;;  %v1441_v15 = vor.u32 %v1440_v59, %v1436_v11  ;;  %vm2044_vm2 = vcmask 228352   ;;  %v1564_v59 = vrot.slane %v3867_v26, 1 }
  0x90   : > { %1590 = vrot.lane.b32.xlu1 %v1551_v22, %s3183_s12 }
  0x91   : > { %1588 = vrot.lane.b32.xlu0 %v3690_v47, %s3183_s12  ;;  %v1410_v47 = vsel %vm1302_vm10, %v1405_v16, %v1409_v17  ;;  %v1445_v16 = vrot.slane %v1443_v63, 1 }
  0x93   : > { %v3861_v62 = vsel %vm1302_vm10, %v1441_v15, %v1445_v16 }
  0x94   : > { %1627 = vrot.lane.b32.xlu1 %v3734_v51, %s3181_s10  ;;  %v1106_v29 = vld [vmem:[#allocation2 + $0xd4] sm:$0x1] }
  0x95   : > { %1625 = vrot.lane.b32.xlu0 %v3649_v32, %s3181_s10  ;;  %v1107_v30 = vsel %vm3333_vm8, 0, %v1106_v29  ;;  %v1562_v29 = vrot.slane %v3134_v6, 1  ;;  %v3903_v6 = vld [vmem:[#allocation2 + $0x9c] sm:$0xff]  }
  0x96   : > { %1108 = vst [vmem:[#allocation2 + $0xd4] sm:$0x1] %v1107_v30 }
  0x97   : > { %1119 = vst.msk [vmem:[#allocation2 + $0xd4] sm:$0x1] %vm831_vm4, %v3180_v53  ;;  %v1563_v46 = vsel %vm1527_vm9, %v1561_v13, %v1562_v29  ;;  %vm2130_vm4 = vcmask 293888  }
  0x98   : > { %1674 = vrot.lane.b32.xlu1 %v1410_v47, %s3186_s19 }
  0x99   : > { %1672 = vrot.lane.b32.xlu0 %v3720_v8, %s3186_s19  ;;  %v1422_v8 = vsel %vm1302_vm10, %v1417_v48, %v1421_v34  ;;  %v3138_v48 = vld [vmem:[#allocation2 + $0x98] ss:$0 sps:$4 sm:$0x11]   ;;  %v1450_v34 = vshll.u32 %v3867_v26, 16 }
  0x9a   : > { %v1455_v2 = vshll.u32 %v3138_v48, 16 }
  0x9b   : > { %v1452_v1 = vrot.slane %v1450_v34, 1 }
  0x9c   : > { %1709 = vrot.lane.b32.xlu1 %v1554_v31, %s3184_s13  ;;  %v1457_v5 = vrot.slane %v1455_v2, 1 }
  0x9d   : > { %1707 = vrot.lane.b32.xlu0 %v1551_v22, %s3184_s13  ;;  %v1434_v22 = vsel %vm1302_vm10, %v1429_v3, %v1433_v45 }
  0x9e   : > { %v3793_v39 = vpop.permute.xlu1 %1615 }
  0x9f   : > { %v3795_v40 = vpop.permute.xlu0 %1613 }
  0xa0   : > { %1746 = vrot.lane.b32.xlu1 %v3764_v20, %s3182_s11 }
  0xa1   : > { %1744 = vrot.lane.b32.xlu0 %v3734_v51, %s3182_s11 }
  0xa2   : > { %v3802_v18 = vpop.permute.xlu1 %1734 }
  0xa3   : > { %v3804_v53 = vpop.permute.xlu0 %1732 }
  0xa4   : > { %1793 = vrot.lane.b32.xlu1 %v1422_v8, %s3188_s21 }
  0xa5   : > { %1791 = vrot.lane.b32.xlu0 %v1410_v47, %s3188_s21 }
  0xa6   : > { %v3810_v42 = vpop.permute.xlu1 %1619 }
  0xa7   : > { %v3813_v49 = vpop.permute.xlu0 %1617 }
  0xa8   : > { %1511 = vrot.lane.b32.xlu1 %v1410_v47, %s3187_s20 }
  0xa9   : > { %1826 = vrot.lane.b32.xlu0 %v1554_v31, %s3185_s14 }
  0xaa   : > { %v1579_v52 = vpop.permute.xlu1 %1578 }
  0xab   : > { %v3819_v61 = vpop.permute.xlu0 %1695 }
  0xac   : > { %1513 = vrot.lane.b32.xlu1 %v1422_v8, %s3187_s20 }
  0xad   : > { %1828 = vrot.lane.b32.xlu0 %v1557_v54, %s3185_s14 }
  0xae   : > { %v1698_v57 = vpop.permute.xlu1 %1697 }
  0xaf   : > { %v3824_v0 = vpop.permute.xlu0 %1814 }
  0xb0   : > { %1594 = vrot.lane.b32.xlu1 %v1557_v54, %s3183_s12 }
  0xb1   : > { %1592 = vrot.lane.b32.xlu0 %v1554_v31, %s3183_s12 }
  0xb2   : > { %v3830_v56 = vpop.permute.xlu1 %1582 }
  0xb3   : > { %v3832_v60 = vpop.permute.xlu0 %1816 }
  0xb4   : > { %1631 = vrot.lane.b32.xlu1 %v3808_v41, %s3181_s10 }
  0xb5   : > { %1629 = vrot.lane.b32.xlu0 %v3764_v20, %s3181_s10 }
  0xb6   : > { %v1577_v7 = vpop.permute.xlu1 %1576 }
  0xb7   : > { %v3841_v4 = vpop.permute.xlu0 %1580 }
  0xb8   : > { %1678 = vrot.lane.b32.xlu1 %v1434_v22, %s3186_s19 }
  0xb9   : > { %1676 = vrot.lane.b32.xlu0 %v1422_v8, %s3186_s19 }
  0xba   : > { %v1663_v12 = vpop.permute.xlu1 %1662 }
  0xbb   : > { %v1498_v14 = vpop.permute.xlu0 %1497 }
  0xbc   : > { %v1850_v33 = vsel %vm1846_vm12, %v3149_v38, %v1498_v14  ;;  %1713 = vrot.lane.b32.xlu1 %v3846_v10, %s3184_s13  ;;  %v1462_v14 = vshll.u32 %v3903_v6, 16 }
  0xbd   : > { %1711 = vrot.lane.b32.xlu0 %v1557_v54, %s3184_s13  ;;  %v1883_v17 = vsel %vm1879_vm13, %v1850_v33, %v1579_v52  ;;  %v1448_v54 = vshrl.u32 %v3867_v26, 16 }
  0xbe   : > { %v1782_v19 = vpop.permute.xlu1 %1781  ;;  %v1916_v23 = vsel %vm1912_vm14, %v1883_v17, %v3793_v39 }
  0xbf   : > { %v1661_v21 = vpop.permute.xlu0 %1660  ;;  %v1949_v28 = vsel %vm1945_vm15, %v1916_v23, %v1663_v12  ;;  %v3140_v12 = vld [vmem:[#allocation2 + $0xa4] ss:$0 sps:$4 sm:$0x11]  }
  0xc0   : > { %1750 = vrot.lane.b32.xlu1 %v3828_v55, %s3182_s11  ;;  %v1982_v30 = vsel %vm1978_vm0, %v1949_v28, %v1698_v57 }
  0xc1   : > { %1748 = vrot.lane.b32.xlu0 %v3808_v41, %s3182_s11  ;;  %v2015_v39 = vsel %vm2011_vm1, %v1982_v30, %v3802_v18 }
  0xc2   : > { %v1500_v25 = vpop.permute.xlu1 %1499  ;;  %v2048_v18 = vsel %vm2044_vm2, %v2015_v39, %v1782_v19  ;;  %v1460_v19 = vshrl.u32 %v3903_v6, 16 }
  0xc3   : > { %v1780_v47 = vpop.permute.xlu0 %1779  ;;  %v2081_v45 = vsel %vm2077_vm3, %v2048_v18, %v3832_v60 }
  0xc4   : > { %1797 = vrot.lane.b32.xlu1 %v3861_v62, %s3188_s21 }
  0xc5   : > { %1795 = vrot.lane.b32.xlu0 %v1434_v22, %s3188_s21 }
  0xc6   : > { %v1502_v27 = vpop.permute.xlu1 %1501 }
  0xc7   : > { %v1496_v31 = vpop.permute.xlu0 %1495 }
  0xc8   : > { %v1848_v36 = vsel %vm1846_vm12, %v3150_v35, %v1496_v31  ;;  %1515 = vrot.lane.b32.xlu1 %v1434_v22, %s3187_s20  ;;  %v3151_v22 = vld [vmem:[#allocation2 + $0x18] sm:$0xff]  }
  0xc9   : > { %v1881_v37 = vsel %vm1879_vm13, %v1848_v36, %v1577_v7  ;;  %1830 = vrot.lane.b32.xlu0 %v3846_v10, %s3185_s14  ;;  %v1852_v58 = vsel %vm1846_vm12, %v3151_v22, %v1500_v25  ;;  %v1854_v7 = vsel %vm1846_vm12, %v3152_v44, %v1502_v27  ;;  %v1467_v25 = vshll.u32 %v3140_v12, 16 }
  0xca   : > { %v1914_v8 = vsel %vm1912_vm14, %v1881_v37, %v3795_v40  ;;  %v1667_v43 = vpop.permute.xlu1 %1666  ;;  %v1885_v60 = vsel %vm1879_vm13, %v1852_v58, %v3841_v4  ;;  %v1887_v38 = vsel %vm1879_vm13, %v1854_v7, %v3830_v56  ;;  %v1464_v56 = vrot.slane %v1462_v14, 1 }
  0xcb   : > { %v1947_v24 = vsel %vm1945_vm15, %v1914_v8, %v1661_v21  ;;  %v1665_v50 = vpop.permute.xlu0 %1664  ;;  %v1918_v4 = vsel %vm1912_vm14, %v1885_v60, %v3813_v49  ;;  %v1920_v21 = vsel %vm1912_vm14, %v1887_v38, %v3810_v42  ;;  %v1469_v30 = vrot.slane %v1467_v25, 1 }
  0xcc   : > { %1517 = vrot.lane.b32.xlu1 %v3861_v62, %s3187_s20  ;;  %v1980_v52 = vsel %vm1978_vm0, %v1947_v24, %v3819_v61  ;;  %v1951_v16 = vsel %vm1945_vm15, %v1918_v4, %v1665_v50  ;;  %v1953_v13 = vsel %vm1945_vm15, %v1920_v21, %v1667_v43  ;;  %v3947_v43 = vld [vmem:[#allocation2 + $0xa8] sm:$0xff]   ;;  %v1567_v24 = vrot.slane %v3903_v6, 1 }
  0xcd   : > { %1832 = vrot.lane.b32.xlu0 %v1563_v46, %s3185_s14  ;;  %v2013_v40 = vsel %vm2011_vm1, %v1980_v52, %v3804_v53  ;;  %v1453_v53 = vor.u32 %v1452_v1, %v1448_v54  ;;  %v1568_v50 = vrot.slane %v3140_v12, 1  ;;  %v3142_v54 = vld [vmem:[#allocation2 + $0xb0] ss:$0 sps:$4 sm:$0x11]   ;;  %v1474_v18 = vshll.u32 %v3947_v43, 16 }
  0xce   : > { %v1702_v9 = vpop.permute.xlu1 %1701  ;;  %v2046_v57 = vsel %vm2044_vm2, %v2013_v40, %v1780_v47  ;;  %v1570_v44 = vrot.slane %v3947_v43, 1  ;;  %v1571_v7 = vrot.slane %v3142_v54, 1 }
  0xcf   : > { %v1700_v3 = vpop.permute.xlu0 %1699  ;;  %v2079_v61 = vsel %vm2077_vm3, %v2046_v57, %v3824_v0  ;;  %v1458_v63 = vsel %vm1302_vm10, %v1453_v53, %v1457_v5  ;;  %v1986_v42 = vsel %vm1978_vm0, %v1953_v13, %v1702_v9  ;;  %v1569_v1 = vsel %vm1527_vm9, %v1567_v24, %v1568_v50  ;;  %v3959_v53 = vld [vmem:[#allocation2 + $0xb4] sm:$0xff]   ;;  %v3999_v24 = vld [vmem:[#allocation2 + $0xc0] sm:$0xff]  }
  0xd0   : > { %3037 = vmatprep.mubr.msk.bf16.mxu0 %vm2130_vm4, %v2079_v61  ;;  %1598 = vrot.lane.b32.xlu1 %v1563_v46, %s3183_s12  ;;  %v1984_v23 = vsel %vm1978_vm0, %v1951_v16, %v1700_v3  ;;  %v1472_v9 = vshrl.u32 %v3947_v43, 16  ;;  %v1476_v57 = vrot.slane %v1474_v18, 1  ;;  %v1479_v3 = vshll.u32 %v3142_v54, 16 }
  0xd1   : > { %1596 = vrot.lane.b32.xlu0 %v3846_v10, %s3183_s12  ;;  %3038 = vmatmul.mubr.msk.bf16.vlgmr.msra.gmra.mrb[0].mxu0 %vm2130_vm4, %v2081_v45  ;;  %v1565_v10 = vrot.slane %v3138_v48, 1  ;;  %v1484_v16 = vshrl.u32 %v3959_v53, 16 }
  0xd2   : > { %v1739_v0 = vpop.permute.xlu1 %1738  ;;  %v1477_v22 = vor.u32 %v1476_v57, %v1472_v9  ;;  %v1481_v58 = vrot.slane %v1479_v3, 1  ;;  %v1649_v3 = vshrl.u32 %v3999_v24, 16 }
  0xd3   : > { %v1737_v11 = vpop.permute.xlu0 %1736  ;;  %v1566_v17 = vsel %vm1527_vm9, %v1564_v59, %v1565_v10  ;;  %v2019_v31 = vsel %vm2011_vm1, %v1986_v42, %v1739_v0  ;;  %v3144_v10 = vld [vmem:[#allocation2 + $0xbc] ss:$0 sps:$4 sm:$0x11]  }
  0xd4   : > { %1635 = vrot.lane.b32.xlu1 %v3867_v26, %s3181_s10  ;;  %v2017_v49 = vsel %vm2011_vm1, %v1984_v23, %v1737_v11  ;;  %v3153_v11 = vld [vmem:[#allocation2 + $0x30] sm:$0xff]   ;;  %v1482_v59 = vsel %vm1302_vm10, %v1477_v22, %v1481_v58  ;;  %v1574_v54 = vrot.slane %v3144_v10, 1 }
  0xd5   : > { %1633 = vrot.lane.b32.xlu0 %v3828_v55, %s3181_s10 }
  0xd6   : > { %v1786_v33 = vpop.permute.xlu1 %1785 }
  0xd7   : > { %v1784_v15 = vpop.permute.xlu0 %1783  ;;  %v2052_v36 = vsel %vm2044_vm2, %v2019_v31, %v1786_v33 }
  0xd8   : > { %1682 = vrot.lane.b32.xlu1 %v1458_v63, %s3186_s19  ;;  %v2050_v28 = vsel %vm2044_vm2, %v2017_v49, %v1784_v15  ;;  %v1572_v15 = vsel %vm1527_vm9, %v1570_v44, %v1571_v7  ;;  %v3147_v44 = vld [vmem:[#allocation2 + $0xcc] sm:$0xff]  }
  0xd9   : > { %1680 = vrot.lane.b32.xlu0 %v3861_v62, %s3186_s19  ;;  %v1465_v62 = vor.u32 %v1464_v56, %v1460_v19  ;;  %v1491_v56 = vshll.u32 %v3144_v10, 16  ;;  %v3155_v10 = vld [vmem:[#allocation2 + $0x48] sm:$0xff]  }
  0xda   : > { %v1504_v47 = vpop.permute.xlu1 %1503 }
  0xdb   : > { %v1819_v27 = vpop.permute.xlu0 %1818  ;;  %v1470_v34 = vsel %vm1302_vm10, %v1465_v62, %v1469_v30  ;;  %v1856_v60 = vsel %vm1846_vm12, %v3153_v11, %v1504_v47  ;;  %v1493_v31 = vrot.slane %v1491_v56, 1 }
  0xdc   : > { %v2083_v29 = vsel %vm2077_vm3, %v2050_v28, %v1819_v27  ;;  %1717 = vrot.lane.b32.xlu1 %v1566_v17, %s3184_s13 }
  0xdd   : > { %1715 = vrot.lane.b32.xlu0 %v1563_v46, %s3184_s13  ;;  %3041 = vmatprep.mubr.msk.bf16.mxu0 %vm2130_vm4, %v2083_v29 }
  0xde   : > { %v1506_v35 = vpop.permute.xlu1 %1505 }
  0xdf   : > { %v1821_v37 = vpop.permute.xlu0 %1820 }
  0xe0   : > { %v2085_v48 = vsel %vm2077_vm3, %v2052_v36, %v1821_v37  ;;  %1754 = vrot.lane.b32.xlu1 %v3903_v6, %s3182_s11 }
  0xe1   : > { %1752 = vrot.lane.b32.xlu0 %v3867_v26, %s3182_s11  ;;  %3042 = vmatmul.mubr.msk.bf16.gmra.mrb[4].mxu0 %vm2130_vm4, %v2085_v48 }
  0xe2   : > { %v1587_v39 = vpop.permute.xlu1 %1586 }
  0xe3   : > { %v1585_v8 = vpop.permute.xlu0 %1584 }
  0xe4   : > { %1801 = vrot.lane.b32.xlu1 %v1470_v34, %s3188_s21  ;;  %v1889_v12 = vsel %vm1879_vm13, %v1856_v60, %v1585_v8  ;;  %v1692_v60 = vrot.slane %v3999_v24, 1 }
  0xe5   : > { %1799 = vrot.lane.b32.xlu0 %v1458_v63, %s3188_s21 }
  0xe6   : > { %v1624_v46 = vpop.permute.xlu1 %1623 }
  0xe7   : > { %v1622_v52 = vpop.permute.xlu0 %1621 }
  0xe8   : > { %1519 = vrot.lane.b32.xlu1 %v1458_v63, %s3187_s20  ;;  %v1486_v63 = vshll.u32 %v3959_v53, 16  ;;  %v1922_v38 = vsel %vm1912_vm14, %v1889_v12, %v1622_v52  ;;  %v1573_v52 = vrot.slane %v3959_v53, 1 }
  0xe9   : > { %1834 = vrot.lane.b32.xlu0 %v1566_v17, %s3185_s14 }
  0xea   : > { %v1671_v40 = vpop.permute.xlu1 %1670  ;;  %v1488_v23 = vrot.slane %v1486_v63, 1  ;;  %v1575_v9 = vsel %vm1527_vm9, %v1573_v52, %v1574_v54 }
  0xeb   : > { %v1669_v2 = vpop.permute.xlu0 %1668 }
  0xec   : > { %1521 = vrot.lane.b32.xlu1 %v1470_v34, %s3187_s20  ;;  %v1955_v4 = vsel %vm1945_vm15, %v1922_v38, %v1669_v2  ;;  %v1489_v30 = vor.u32 %v1488_v23, %v1484_v16  ;;  %v1770_v38 = vshll.u32 %v3147_v44, 16 }
  0xed   : > { %1836 = vrot.lane.b32.xlu0 %v1569_v1, %s3185_s14 }
  0xee   : > { %v1706_v61 = vpop.permute.xlu1 %1705 }
  0xef   : > { %v1704_v45 = vpop.permute.xlu0 %1703 }
  0xf0   : > { %1602 = vrot.lane.b32.xlu1 %v1569_v1, %s3183_s12  ;;  %v1988_v21 = vsel %vm1978_vm0, %v1955_v4, %v1704_v45 }
  0xf1   : > { %1600 = vrot.lane.b32.xlu0 %v1566_v17, %s3183_s12  ;;  %v3154_v17 = vld [vmem:[#allocation2 + $0x3c] sm:$0xff]  }
  0xf2   : > { %v1743_v5 = vpop.permute.xlu1 %1742  ;;  %v1858_v19 = vsel %vm1846_vm12, %v3154_v17, %v1506_v35 }
  0xf3   : > { %v1741_v0 = vpop.permute.xlu0 %1740  ;;  %v1891_v25 = vsel %vm1879_vm13, %v1858_v19, %v1587_v39  ;;  %v1494_v39 = vsel %vm1302_vm10, %v1489_v30, %v1493_v31 }
  0xf4   : > { %1639 = vrot.lane.b32.xlu1 %v3947_v43, %s3181_s10  ;;  %v2021_v49 = vsel %vm2011_vm1, %v1988_v21, %v1741_v0  ;;  %v1924_v28 = vsel %vm1912_vm14, %v1891_v25, %v1624_v46  ;;  %v1768_v21 = vshrl.u32 %v3147_v44, 16  ;;  %v1772_v25 = vrot.slane %v1770_v38, 1 }
  0xf5   : > { %1637 = vrot.lane.b32.xlu0 %v3903_v6, %s3181_s10  ;;  %v1957_v29 = vsel %vm1945_vm15, %v1924_v28, %v1671_v40  ;;  %v3146_v40 = vld [vmem:[#allocation2 + $0xc8] ss:$0 sps:$4 sm:$0x11]  }
  0xf6   : > { %v1790_v14 = vpop.permute.xlu1 %1789  ;;  %v1990_v62 = vsel %vm1978_vm0, %v1957_v29, %v1706_v61  ;;  %v1656_v45 = vshll.u32 %v3146_v40, 16  ;;  %v1773_v31 = vor.u32 %v1772_v25, %v1768_v21 }
  0xf7   : > { %v1788_v33 = vpop.permute.xlu0 %1787  ;;  %v2023_v35 = vsel %vm2011_vm1, %v1990_v62, %v1743_v5 }
  0xf8   : > { %1686 = vrot.lane.b32.xlu1 %v1482_v59, %s3186_s19  ;;  %v2054_v27 = vsel %vm2044_vm2, %v2021_v49, %v1788_v33  ;;  %v2056_v37 = vsel %vm2044_vm2, %v2023_v35, %v1790_v14  ;;  %v1658_v0 = vrot.slane %v1656_v45, 1  ;;  %v3148_v14 = vld [vmem:[#allocation2 + $0xd4] ss:$0 sps:$4 sm:$0x11]  }
  0xf9   : > { %1684 = vrot.lane.b32.xlu0 %v1470_v34, %s3186_s19  ;;  %v1775_v49 = vshll.u32 %v3148_v14, 16 }
  0xfa   : > { %v1508_v47 = vpop.permute.xlu1 %1507 }
  0xfb   : > { %v1823_v13 = vpop.permute.xlu0 %1822  ;;  %v1860_v63 = vsel %vm1846_vm12, %v3155_v10, %v1508_v47  ;;  %v1777_v35 = vrot.slane %v1775_v49, 1 }
  0xfc   : > { %v2087_v42 = vsel %vm2077_vm3, %v2054_v27, %v1823_v13  ;;  %1721 = vrot.lane.b32.xlu1 %v1572_v15, %s3184_s13 }
  0xfd   : > { %1719 = vrot.lane.b32.xlu0 %v1569_v1, %s3184_s13  ;;  %3045 = vmatprep.mubr.msk.bf16.mxu0 %vm2130_vm4, %v2087_v42  ;;  %v1651_v1 = vshll.u32 %v3999_v24, 16 }
  0xfe   : > { %v1510_v36 = vpop.permute.xlu1 %1509 }
  0xff   : > { %v1825_v48 = vpop.permute.xlu0 %1824  ;;  %v1653_v61 = vrot.slane %v1651_v1, 1  ;;  %v1862_v23 = vsel %vm1846_vm12, %v3649_v32, %v1510_v36 }
 0x100   : > { %v2089_v34 = vsel %vm2077_vm3, %v2056_v37, %v1825_v48  ;;  %1758 = vrot.lane.b32.xlu1 %v3959_v53, %s3182_s11 }
 0x101   : > { %1756 = vrot.lane.b32.xlu0 %v3947_v43, %s3182_s11  ;;  %3046 = vmatmul.mubr.msk.bf16.gmra.mrb[8].mxu0 %vm2130_vm4, %v2089_v34  ;;  %v1654_v5 = vor.u32 %v1653_v61, %v1649_v3 }
 0x102   : > { %v1591_v8 = vpop.permute.xlu1 %1590 }
 0x103   : > { %v1589_v46 = vpop.permute.xlu0 %1588  ;;  %v1659_v12 = vsel %vm1302_vm10, %v1654_v5, %v1658_v0  ;;  %v1895_v47 = vsel %vm1879_vm13, %v1862_v23, %v1591_v8  ;;  %v1778_v8 = vsel %vm1302_vm10, %v1773_v31, %v1777_v35 }
 0x104   : > { %1805 = vrot.lane.b32.xlu1 %v1494_v39, %s3188_s21  ;;  %v1893_v33 = vsel %vm1879_vm13, %v1860_v63, %v1589_v46  ;;  %v1811_v46 = vrot.slane %v3147_v44, 1 }
 0x105   : > { %1803 = vrot.lane.b32.xlu0 %v1482_v59, %s3188_s21 }
 0x106   : > { %v1628_v50 = vpop.permute.xlu1 %1627 }
 0x107   : > { %v1626_v18 = vpop.permute.xlu0 %1625  ;;  %v1928_v13 = vsel %vm1912_vm14, %v1895_v47, %v1628_v50  ;;  %v1812_v50 = vrot.slane %v3148_v14, 1 }
 0x108   : > { %1523 = vrot.lane.b32.xlu1 %v1482_v59, %s3187_s20  ;;  %v1693_v59 = vrot.slane %v3146_v40, 1 }
 0x109   : > { %1838 = vrot.lane.b32.xlu0 %v1572_v15, %s3185_s14 }
 0x10a   : > { %v1675_v2 = vpop.permute.xlu1 %1674  ;;  %v1694_v19 = vsel %vm1527_vm9, %v1692_v60, %v1693_v59 }
 0x10b   : > { %v1673_v57 = vpop.permute.xlu0 %1672  ;;  %v1961_v62 = vsel %vm1945_vm15, %v1928_v13, %v1675_v2 }
 0x10c   : > { %1525 = vrot.lane.b32.xlu1 %v1494_v39, %s3187_s20 }
 0x10d   : > { %1840 = vrot.lane.b32.xlu0 %v1575_v9, %s3185_s14 }
 0x10e   : > { %v1710_v22 = vpop.permute.xlu1 %1709 }
 0x10f   : > { %v1708_v58 = vpop.permute.xlu0 %1707  ;;  %v1994_v30 = vsel %vm1978_vm0, %v1961_v62, %v1710_v22 }
 0x110   : > { %1606 = vrot.lane.b32.xlu1 %v1575_v9, %s3183_s12 }
 0x111   : > { %1604 = vrot.lane.b32.xlu0 %v1572_v15, %s3183_s12  ;;  %v1926_v15 = vsel %vm1912_vm14, %v1893_v33, %v1626_v18  ;;  %v1813_v18 = vsel %vm1527_vm9, %v1811_v46, %v1812_v50 }
 0x112   : > { %v1747_v7 = vpop.permute.xlu1 %1746  ;;  %v1959_v17 = vsel %vm1945_vm15, %v1926_v15, %v1673_v57 }
 0x113   : > { %v1745_v11 = vpop.permute.xlu0 %1744  ;;  %v1992_v56 = vsel %vm1978_vm0, %v1959_v17, %v1708_v58  ;;  %v2027_v36 = vsel %vm2011_vm1, %v1994_v30, %v1747_v7 }
 0x114   : > { %1643 = vrot.lane.b32.xlu1 %v3999_v24, %s3181_s10  ;;  %v2025_v28 = vsel %vm2011_vm1, %v1992_v56, %v1745_v11 }
 0x115   : > { %1641 = vrot.lane.b32.xlu0 %v3959_v53, %s3181_s10  ;;  %s4134_s10 = scalar_lea.vmem %s4171_s6, %s3250_s5  ;;  %s2789_s5 = sshll.u32 %s4186_s24, 1 }
 0x116   : > { %v1794_v4 = vpop.permute.xlu1 %1793 }
 0x117   : > { %v1792_v16 = vpop.permute.xlu0 %1791  ;;  %v2060_v48 = vsel %vm2044_vm2, %v2027_v36, %v1794_v4 }
 0x118   : > { %1690 = vrot.lane.b32.xlu1 %v1659_v12, %s3186_s19  ;;  %v2058_v29 = vsel %vm2044_vm2, %v2025_v28, %v1792_v16 }
 0x119   : > { %1688 = vrot.lane.b32.xlu0 %v1494_v39, %s3186_s19 }
 0x11a   : > { %v1512_v27 = vpop.permute.xlu1 %1511 }
 0x11b   : > { %v1827_v42 = vpop.permute.xlu0 %1826  ;;  %v1864_v45 = vsel %vm1846_vm12, %v3734_v51, %v1512_v27 }
 0x11c   : > { %v2091_v32 = vsel %vm2077_vm3, %v2058_v29, %v1827_v42  ;;  %1725 = vrot.lane.b32.xlu1 %v1694_v19, %s3184_s13 }
 0x11d   : > { %1723 = vrot.lane.b32.xlu0 %v1575_v9, %s3184_s13  ;;  %3049 = vmatprep.mubr.msk.bf16.mxu0 %vm2130_vm4, %v2091_v32  ;;  %s465_s13 = scalar_lea.vmem %s4172_s7, %s2789_s5 }
 0x11e   : > { %v1514_v37 = vpop.permute.xlu1 %1513 }
 0x11f   : > { %v1829_v34 = vpop.permute.xlu0 %1828  ;;  %v1866_v7 = vsel %vm1846_vm12, %v3764_v20, %v1514_v37 }
 0x120   : > { %v2093_v39 = vsel %vm2077_vm3, %v2060_v48, %v1829_v34  ;;  %1762 = vrot.lane.b32.xlu1 %v3147_v44, %s3182_s11 }
 0x121   : > { %1760 = vrot.lane.b32.xlu0 %v3999_v24, %s3182_s11  ;;  %3050 = vmatmul.mubr.msk.bf16.gmra.mrb[12].mxu0 %vm2130_vm4, %v2093_v39 }
 0x122   : > { %v1595_v52 = vpop.permute.xlu1 %1594 }
 0x123   : > { %v1593_v54 = vpop.permute.xlu0 %1592  ;;  %v1899_v60 = vsel %vm1879_vm13, %v1866_v7, %v1595_v52 }
 0x124   : > { %1809 = vrot.lane.b32.xlu1 %v1778_v8, %s3188_s21  ;;  %v1897_v22 = vsel %vm1879_vm13, %v1864_v45, %v1593_v54 }
 0x125   : > { %1807 = vrot.lane.b32.xlu0 %v1659_v12, %s3188_s21 }
 0x126   : > { %v1632_v40 = vpop.permute.xlu1 %1631 }
 0x127   : > { %v1630_v1 = vpop.permute.xlu0 %1629  ;;  %v1932_v51 = vsel %vm1912_vm14, %v1899_v60, %v1632_v40 }
 0x128   : > { %1844 = vrot.lane.b32.xlu1 %v1813_v18, %s3185_s14  ;;  %v1930_v5 = vsel %vm1912_vm14, %v1897_v22, %v1630_v1 }
 0x129   : > { %1842 = vrot.lane.b32.xlu0 %v1694_v19, %s3185_s14 }
 0x12a   : > { %v1679_v24 = vpop.permute.xlu1 %1678 }
 0x12b   : > { %v1677_v2 = vpop.permute.xlu0 %1676  ;;  %v1965_v14 = vsel %vm1945_vm15, %v1932_v51, %v1679_v24 }
 0x12c   : > { %v1963_v44 = vsel %vm1945_vm15, %v1930_v5, %v1677_v2 }
 0x12e   : > { %v1714_v9 = vpop.permute.xlu1 %1713 }
 0x12f   : > { %v1712_v57 = vpop.permute.xlu0 %1711  ;;  %v1998_v33 = vsel %vm1978_vm0, %v1965_v14, %v1714_v9 }
 0x130   : > { %v1996_v11 = vsel %vm1978_vm0, %v1963_v44, %v1712_v57 }
 0x132   : > { %v1751_v3 = vpop.permute.xlu1 %1750 }
 0x133   : > { %v1749_v61 = vpop.permute.xlu0 %1748  ;;  %v2031_v20 = vsel %vm2011_vm1, %v1998_v33, %v1751_v3 }
 0x134   : > { %v2029_v59 = vsel %vm2011_vm1, %v1996_v11, %v1749_v61 }
 0x136   : > { %v1798_v58 = vpop.permute.xlu1 %1797 }
 0x137   : > { %v1796_v0 = vpop.permute.xlu0 %1795  ;;  %v2064_v15 = vsel %vm2044_vm2, %v2031_v20, %v1798_v58 }
 0x138   : > { %v2062_v63 = vsel %vm2044_vm2, %v2029_v59, %v1796_v0 }
 0x13a   : > { %v1516_v10 = vpop.permute.xlu1 %1515 }
 0x13b   : > { %v1831_v12 = vpop.permute.xlu0 %1830  ;;  %v1868_v29 = vsel %vm1846_vm12, %v3808_v41, %v1516_v10 }
 0x13c   : > { %v2095_v38 = vsel %vm2077_vm3, %v2062_v63, %v1831_v12 }
 0x13d   : > { %3053 = vmatprep.mubr.msk.bf16.mxu1 %vm2130_vm4, %v2095_v38 }
 0x13e   : > { %v1518_v4 = vpop.permute.xlu1 %1517 }
 0x13f   : > { %v1833_v16 = vpop.permute.xlu0 %1832  ;;  %v1870_v35 = vsel %vm1846_vm12, %v3828_v55, %v1518_v4 }
 0x140   : > { %v2097_v17 = vsel %vm2077_vm3, %v2064_v15, %v1833_v16 }
 0x141   : > { %3054 = vmatmul.mubr.msk.bf16.vlgmr.msra.gmra.mrb[0].mxu1 %vm2130_vm4, %v2097_v17 }
 0x142   : > { %v1599_v19 = vpop.permute.xlu1 %1598 }
 0x143   : > { %v1597_v21 = vpop.permute.xlu0 %1596  ;;  %v1903_v37 = vsel %vm1879_vm13, %v1870_v35, %v1599_v19 }
 0x144   : > { %v1901_v42 = vsel %vm1879_vm13, %v1868_v29, %v1597_v21 }
 0x146   : > { %v1636_v23 = vpop.permute.xlu1 %1635 }
 0x147   : > { %v1634_v56 = vpop.permute.xlu0 %1633  ;;  %v1936_v41 = vsel %vm1912_vm14, %v1903_v37, %v1636_v23 }
 0x148   : > { %v1934_v32 = vsel %vm1912_vm14, %v1901_v42, %v1634_v56 }
 0x14a   : > { %v1683_v25 = vpop.permute.xlu1 %1682 }
 0x14b   : > { %v1681_v49 = vpop.permute.xlu0 %1680  ;;  %v1969_v46 = vsel %vm1945_vm15, %v1936_v41, %v1683_v25 }
 0x14c   : > { %v1967_v31 = vsel %vm1945_vm15, %v1934_v32, %v1681_v49 }
 0x14e   : > { %v1718_v47 = vpop.permute.xlu1 %1717 }
 0x14f   : > { %v1716_v28 = vpop.permute.xlu0 %1715  ;;  %v2002_v52 = vsel %vm1978_vm0, %v1969_v46, %v1718_v47 }
 0x150   : > { %v2000_v36 = vsel %vm1978_vm0, %v1967_v31, %v1716_v28 }
 0x152   : > { %v1755_v27 = vpop.permute.xlu1 %1754 }
 0x153   : > { %v1753_v13 = vpop.permute.xlu0 %1752  ;;  %v2035_v55 = vsel %vm2011_vm1, %v2002_v52, %v1755_v27 }
 0x154   : > { %v2033_v48 = vsel %vm2011_vm1, %v2000_v36, %v1753_v13 }
 0x156   : > { %v1802_v62 = vpop.permute.xlu1 %1801 }
 0x157   : > { %v1800_v30 = vpop.permute.xlu0 %1799  ;;  %v2068_v18 = vsel %vm2044_vm2, %v2035_v55, %v1802_v62 }
 0x158   : > { %v2066_v39 = vsel %vm2044_vm2, %v2033_v48, %v1800_v30 }
 0x15a   : > { %v1520_v34 = vpop.permute.xlu1 %1519 }
 0x15b   : > { %v1835_v8 = vpop.permute.xlu0 %1834  ;;  %v1872_v0 = vsel %vm1846_vm12, %v3867_v26, %v1520_v34 }
 0x15c   : > { %v2099_v50 = vsel %vm2077_vm3, %v2066_v39, %v1835_v8 }
 0x15d   : > { %3057 = vmatprep.mubr.msk.bf16.mxu1 %vm2130_vm4, %v2099_v50 }
 0x15e   : > { %v1522_v54 = vpop.permute.xlu1 %1521 }
 0x15f   : > { %v1837_v40 = vpop.permute.xlu0 %1836  ;;  %v1874_v10 = vsel %vm1846_vm12, %v3903_v6, %v1522_v54 }
 0x160   : > { %v2101_v1 = vsel %vm2077_vm3, %v2068_v18, %v1837_v40 }
 0x161   : > { %3058 = vmatmul.mubr.msk.bf16.gmra.mrb[4].mxu1 %vm2130_vm4, %v2101_v1 }
 0x162   : > { %v1603_v24 = vpop.permute.xlu1 %1602 }
 0x163   : > { %v1601_v2 = vpop.permute.xlu0 %1600  ;;  %v1907_v63 = vsel %vm1879_vm13, %v1874_v10, %v1603_v24 }
 0x164   : > { %v1905_v44 = vsel %vm1879_vm13, %v1872_v0, %v1601_v2 }
 0x166   : > { %v1640_v9 = vpop.permute.xlu1 %1639 }
 0x167   : > { %v1638_v57 = vpop.permute.xlu0 %1637  ;;  %v1940_v26 = vsel %vm1912_vm14, %v1907_v63, %v1640_v9 }
 0x168   : > { %v1938_v11 = vsel %vm1912_vm14, %v1905_v44, %v1638_v57 }
 0x16a   : > { %v1687_v3 = vpop.permute.xlu1 %1686 }
 0x16b   : > { %v1685_v61 = vpop.permute.xlu0 %1684  ;;  %v1973_v20 = vsel %vm1945_vm15, %v1940_v26, %v1687_v3 }
 0x16c   : > { %v1971_v59 = vsel %vm1945_vm15, %v1938_v11, %v1685_v61 }
 0x16e   : > { %v1722_v45 = vpop.permute.xlu1 %1721 }
 0x16f   : > { %v1720_v22 = vpop.permute.xlu0 %1719  ;;  %v2006_v15 = vsel %vm1978_vm0, %v1973_v20, %v1722_v45 }
 0x170   : > { %v2004_v51 = vsel %vm1978_vm0, %v1971_v59, %v1720_v22 }
 0x172   : > { %v1759_v58 = vpop.permute.xlu1 %1758 }
 0x173   : > { %v1757_v5 = vpop.permute.xlu0 %1756  ;;  %v2039_v6 = vsel %vm2011_vm1, %v2006_v15, %v1759_v58 }
 0x174   : > { %v2037_v12 = vsel %vm2011_vm1, %v2004_v51, %v1757_v5 }
 0x176   : > { %v1806_v7 = vpop.permute.xlu1 %1805 }
 0x177   : > { %v1804_v60 = vpop.permute.xlu0 %1803  ;;  %v2072_v17 = vsel %vm2044_vm2, %v2039_v6, %v1806_v7 }
 0x178   : > { %v2070_v38 = vsel %vm2044_vm2, %v2037_v12, %v1804_v60 }
 0x17a   : > { %v1524_v14 = vpop.permute.xlu1 %1523 }
 0x17b   : > { %v1839_v33 = vpop.permute.xlu0 %1838  ;;  %v1876_v32 = vsel %vm1846_vm12, %v3947_v43, %v1524_v14 }
 0x17c   : > { %v2103_v4 = vsel %vm2077_vm3, %v2070_v38, %v1839_v33 }
 0x17d   : > { %3061 = vmatprep.mubr.msk.bf16.mxu1 %vm2130_vm4, %v2103_v4 }
 0x17e   : > { %v1526_v16 = vpop.permute.xlu1 %1525 }
 0x17f   : > { %v1841_v19 = vpop.permute.xlu0 %1840  ;;  %v1878_v62 = vsel %vm1846_vm12, %v3959_v53, %v1526_v16 }
 0x180   : > { %v2105_v21 = vsel %vm2077_vm3, %v2072_v17, %v1841_v19 }
 0x181   : > { %3062 = vmatmul.mubr.msk.bf16.gmra.mrb[8].mxu1 %vm2130_vm4, %v2105_v21 }
 0x182   : > { %v1607_v23 = vpop.permute.xlu1 %1606 }
 0x183   : > { %v1605_v56 = vpop.permute.xlu0 %1604  ;;  %v1911_v30 = vsel %vm1879_vm13, %v1878_v62, %v1607_v23 }
 0x184   : > { %v1909_v31 = vsel %vm1879_vm13, %v1876_v32, %v1605_v56 }
 0x186   : > { %v1644_v25 = vpop.permute.xlu1 %1643 }
 0x187   : > { %v1642_v49 = vpop.permute.xlu0 %1641  ;;  %v1944_v35 = vsel %vm1912_vm14, %v1911_v30, %v1644_v25 }
 0x188   : > { %v1942_v37 = vsel %vm1912_vm14, %v1909_v31, %v1642_v49 }
 0x18a   : > { %v1691_v47 = vpop.permute.xlu1 %1690 }
 0x18b   : > { %v1689_v28 = vpop.permute.xlu0 %1688  ;;  %v1977_v48 = vsel %vm1945_vm15, %v1944_v35, %v1691_v47 }
 0x18c   : > { %v1975_v41 = vsel %vm1945_vm15, %v1942_v37, %v1689_v28 }
 0x18e   : > { %v1726_v27 = vpop.permute.xlu1 %1725 }
 0x18f   : > { %v1724_v13 = vpop.permute.xlu0 %1723  ;;  %v2010_v53 = vsel %vm1978_vm0, %v1977_v48, %v1726_v27 }
 0x190   : > { %v2008_v39 = vsel %vm1978_vm0, %v1975_v41, %v1724_v13 }
 0x192   : > { %v1763_v29 = vpop.permute.xlu1 %1762 }
 0x193   : > { %v1761_v42 = vpop.permute.xlu0 %1760  ;;  %v2043_v43 = vsel %vm2011_vm1, %v2010_v53, %v1763_v29 }
 0x194   : > { %v2041_v8 = vsel %vm2011_vm1, %v2008_v39, %v1761_v42 }
 0x196   : > { %v1810_v36 = vpop.permute.xlu1 %1809 }
 0x197   : > { %v1808_v34 = vpop.permute.xlu0 %1807  ;;  %v2076_v46 = vsel %vm2044_vm2, %v2043_v43, %v1810_v36 }
 0x198   : > { %v2074_v52 = vsel %vm2044_vm2, %v2041_v8, %v1808_v34 }
 0x19a   : > { %v1845_v50 = vpop.permute.xlu1 %1844 }
 0x19b   : > { %v2109_v55 = vsel %vm2077_vm3, %v2076_v46, %v1845_v50  ;;  %v1843_v54 = vpop.permute.xlu0 %1842 }
 0x19c   : > { %v2107_v18 = vsel %vm2077_vm3, %v2074_v52, %v1843_v54 }
 0x19d   : > { %3065 = vmatprep.mubr.msk.bf16.mxu1 %vm2130_vm4, %v2107_v18 }
 0x19e   : > { %3066 = vmatmul.mubr.msk.bf16.gmra.mrb[12].mxu1 %vm2130_vm4, %v2109_v55 }
 0x1a4   : > { %v3039_v40 = vpop.f32.mrb[0].mxu0 }
 0x1a5   : > { %v2201_v1 = vpop.f32.mrb[1].mxu0  ;;  %v2367_v22 = vmul.f32 %v3039_v40, %v3039_v40 }
 0x1a6   : > { %v3040_v24 = vpop.f32.mrb[2].mxu0  ;;  %v2365_v57 = vmul.f32 %v2201_v1, %v2201_v1 }
 0x1a7   : > { %v2924_v2 = vpack.c.bf16 %v3040_v24, %v3039_v40  ;;  %v2204_v9 = vpop.f32.mrb[3].mxu0  ;;  %v2368_v0 = vmul.f32 %v3040_v24, %v3040_v24 }
 0x1a8   : > { %v2328_v3 = vadd.f32 %v2204_v9, %v2201_v1  ;;  %v2366_v61 = vmul.f32 %v2204_v9, %v2204_v9  ;;  %v2919_v45 = vpack.c.bf16 %v2204_v9, %v2201_v1 }
 0x1a9   : > { %2997 = vst [vmem:[%s4134_s10 + $0x8] sm:$0xff] %v2924_v2  }
 0x1aa   : > { %v2329_v58 = vadd.f32 %v3039_v40, %v2328_v3  ;;  %v2397_v5 = vadd.f32 %v2366_v61, %v2365_v57  ;;  %2920 = vst [vmem:[%s4134_s10] sm:$0xff] %v2919_v45  }
 0x1ac   : > { %v2398_v44 = vadd.f32 %v2397_v5, %v2367_v22  ;;  %v2330_v7 = vadd.f32 %v3040_v24, %v2329_v58 }
 0x1ae   : > { %v2399_v11 = vadd.f32 %v2398_v44, %v2368_v0 }
 0x1b4   : > { %v3043_v60 = vpop.f32.mrb[4].mxu0 }
 0x1b5   : > { %v2217_v59 = vpop.f32.mrb[5].mxu0  ;;  %v2371_v4 = vmul.f32 %v3043_v60, %v3043_v60 }
 0x1b6   : > { %v2331_v10 = vadd.f32 %v2330_v7, %v2217_v59  ;;  %v2369_v51 = vmul.f32 %v2217_v59, %v2217_v59  ;;  %v3044_v63 = vpop.f32.mrb[6].mxu0 }
 0x1b7   : > { %v2934_v12 = vpack.c.bf16 %v3044_v63, %v3043_v60  ;;  %v2220_v14 = vpop.f32.mrb[7].mxu0  ;;  %v2372_v16 = vmul.f32 %v3044_v63, %v3044_v63 }
 0x1b8   : > { %v2400_v26 = vadd.f32 %v2399_v11, %v2369_v51  ;;  %v2332_v38 = vadd.f32 %v2331_v10, %v2220_v14  ;;  %v2370_v33 = vmul.f32 %v2220_v14, %v2220_v14  ;;  %v2929_v20 = vpack.c.bf16 %v2220_v14, %v2217_v59 }
 0x1b9   : > { %2999 = vst [vmem:[%s4134_s10 + $0x18] sm:$0xff] %v2934_v12  }
 0x1ba   : > { %v2333_v15 = vadd.f32 %v3043_v60, %v2332_v38  ;;  %v2401_v6 = vadd.f32 %v2400_v26, %v2370_v33  ;;  %2998 = vst [vmem:[%s4134_s10 + $0x10] sm:$0xff] %v2929_v20  }
 0x1bc   : > { %v2402_v17 = vadd.f32 %v2401_v6, %v2371_v4  ;;  %v2334_v19 = vadd.f32 %v3044_v63, %v2333_v15 }
 0x1be   : > { %v2403_v21 = vadd.f32 %v2402_v17, %v2372_v16 }
 0x1d4   : > { %v3047_v23 = vpop.f32.mrb[8].mxu0 }
 0x1d5   : > { %v2233_v56 = vpop.f32.mrb[9].mxu0  ;;  %v2375_v32 = vmul.f32 %v3047_v23, %v3047_v23 }
 0x1d6   : > { %v2335_v25 = vadd.f32 %v2334_v19, %v2233_v56  ;;  %v2373_v49 = vmul.f32 %v2233_v56, %v2233_v56  ;;  %v3048_v47 = vpop.f32.mrb[10].mxu0 }
 0x1d7   : > { %v2944_v28 = vpack.c.bf16 %v3048_v47, %v3047_v23  ;;  %v2236_v27 = vpop.f32.mrb[11].mxu0  ;;  %v2376_v35 = vmul.f32 %v3048_v47, %v3048_v47 }
 0x1d8   : > { %v2404_v13 = vadd.f32 %v2403_v21, %v2373_v49  ;;  %v2336_v29 = vadd.f32 %v2335_v25, %v2236_v27  ;;  %v2374_v42 = vmul.f32 %v2236_v27, %v2236_v27  ;;  %v2939_v62 = vpack.c.bf16 %v2236_v27, %v2233_v56 }
 0x1d9   : > { %3001 = vst [vmem:[%s4134_s10 + $0x28] sm:$0xff] %v2944_v28  }
 0x1da   : > { %v2337_v30 = vadd.f32 %v3047_v23, %v2336_v29  ;;  %v2405_v31 = vadd.f32 %v2404_v13, %v2374_v42  ;;  %3000 = vst [vmem:[%s4134_s10 + $0x20] sm:$0xff] %v2939_v62  }
 0x1dc   : > { %v2406_v36 = vadd.f32 %v2405_v31, %v2375_v32  ;;  %v2338_v37 = vadd.f32 %v3048_v47, %v2337_v30 }
 0x1de   : > { %v2407_v48 = vadd.f32 %v2406_v36, %v2376_v35 }
 0x1f4   : > { %v3051_v34 = vpop.f32.mrb[12].mxu0 }
 0x1f5   : > { %v2249_v41 = vpop.f32.mrb[13].mxu0  ;;  %v2379_v18 = vmul.f32 %v3051_v34, %v3051_v34 }
 0x1f6   : > { %v2339_v53 = vadd.f32 %v2338_v37, %v2249_v41  ;;  %v2377_v39 = vmul.f32 %v2249_v41, %v2249_v41  ;;  %v3052_v43 = vpop.f32.mrb[14].mxu0 }
 0x1f7   : > { %v2954_v8 = vpack.c.bf16 %v3052_v43, %v3051_v34  ;;  %v2252_v46 = vpop.f32.mrb[15].mxu0  ;;  %v2380_v24 = vmul.f32 %v3052_v43, %v3052_v43 }
 0x1f8   : > { %v2408_v50 = vadd.f32 %v2407_v48, %v2377_v39  ;;  %v2340_v52 = vadd.f32 %v2339_v53, %v2252_v46  ;;  %v2378_v55 = vmul.f32 %v2252_v46, %v2252_v46  ;;  %v2949_v54 = vpack.c.bf16 %v2252_v46, %v2249_v41 }
 0x1f9   : > { %3003 = vst [vmem:[%s4134_s10 + $0x38] sm:$0xff] %v2954_v8  }
 0x1fa   : > { %v2341_v40 = vadd.f32 %v3051_v34, %v2340_v52  ;;  %v2409_v1 = vadd.f32 %v2408_v50, %v2378_v55  ;;  %3002 = vst [vmem:[%s4134_s10 + $0x30] sm:$0xff] %v2949_v54  }
 0x1fc   : > { %v2410_v2 = vadd.f32 %v2409_v1, %v2379_v18  ;;  %v2342_v9 = vadd.f32 %v3052_v43, %v2341_v40 }
 0x1fe   : > { %v2411_v57 = vadd.f32 %v2410_v2, %v2380_v24 }
 0x214   : > { %v3055_v3 = vpop.f32.mrb[0].mxu1 }
 0x215   : > { %v2265_v61 = vpop.f32.mrb[1].mxu1  ;;  %v2383_v59 = vmul.f32 %v3055_v3, %v3055_v3 }
 0x216   : > { %v2343_v45 = vadd.f32 %v2342_v9, %v2265_v61  ;;  %v2381_v22 = vmul.f32 %v2265_v61, %v2265_v61  ;;  %v3056_v58 = vpop.f32.mrb[2].mxu1 }
 0x217   : > { %v2964_v5 = vpack.c.bf16 %v3056_v58, %v3055_v3  ;;  %v2268_v0 = vpop.f32.mrb[3].mxu1  ;;  %v2384_v63 = vmul.f32 %v3056_v58, %v3056_v58 }
 0x218   : > { %v2412_v44 = vadd.f32 %v2411_v57, %v2381_v22  ;;  %v2344_v7 = vadd.f32 %v2343_v45, %v2268_v0  ;;  %v2382_v11 = vmul.f32 %v2268_v0, %v2268_v0  ;;  %v2959_v60 = vpack.c.bf16 %v2268_v0, %v2265_v61 }
 0x219   : > { %3005 = vst [vmem:[%s4134_s10 + $0x48] sm:$0xff] %v2964_v5  }
 0x21a   : > { %v2345_v10 = vadd.f32 %v3055_v3, %v2344_v7  ;;  %v2413_v51 = vadd.f32 %v2412_v44, %v2382_v11  ;;  %3004 = vst [vmem:[%s4134_s10 + $0x40] sm:$0xff] %v2959_v60  }
 0x21c   : > { %v2414_v12 = vadd.f32 %v2413_v51, %v2383_v59  ;;  %v2346_v14 = vadd.f32 %v3056_v58, %v2345_v10 }
 0x21e   : > { %v2415_v26 = vadd.f32 %v2414_v12, %v2384_v63 }
 0x234   : > { %v3059_v38 = vpop.f32.mrb[4].mxu1 }
 0x235   : > { %v2281_v33 = vpop.f32.mrb[5].mxu1  ;;  %v2387_v56 = vmul.f32 %v3059_v38, %v3059_v38 }
 0x236   : > { %v2347_v20 = vadd.f32 %v2346_v14, %v2281_v33  ;;  %v2385_v4 = vmul.f32 %v2281_v33, %v2281_v33  ;;  %v3060_v15 = vpop.f32.mrb[6].mxu1 }
 0x237   : > { %v2974_v6 = vpack.c.bf16 %v3060_v15, %v3059_v38  ;;  %v2284_v16 = vpop.f32.mrb[7].mxu1  ;;  %v2388_v47 = vmul.f32 %v3060_v15, %v3060_v15 }
 0x238   : > { %v2416_v17 = vadd.f32 %v2415_v26, %v2385_v4  ;;  %v2348_v19 = vadd.f32 %v2347_v20, %v2284_v16  ;;  %v2386_v21 = vmul.f32 %v2284_v16, %v2284_v16  ;;  %v2969_v23 = vpack.c.bf16 %v2284_v16, %v2281_v33 }
 0x239   : > { %3007 = vst [vmem:[%s4134_s10 + $0x58] sm:$0xff] %v2974_v6  }
 0x23a   : > { %v2349_v25 = vadd.f32 %v3059_v38, %v2348_v19  ;;  %v2417_v49 = vadd.f32 %v2416_v17, %v2386_v21  ;;  %3006 = vst [vmem:[%s4134_s10 + $0x50] sm:$0xff] %v2969_v23  }
 0x23c   : > { %v2418_v28 = vadd.f32 %v2417_v49, %v2387_v56  ;;  %v2350_v27 = vadd.f32 %v3060_v15, %v2349_v25 }
 0x23e   : > { %v2419_v13 = vadd.f32 %v2418_v28, %v2388_v47 }
 0x254   : > { %v3063_v29 = vpop.f32.mrb[8].mxu1 }
 0x255   : > { %v2297_v42 = vpop.f32.mrb[9].mxu1  ;;  %v2391_v41 = vmul.f32 %v3063_v29, %v3063_v29 }
 0x256   : > { %v2351_v62 = vadd.f32 %v2350_v27, %v2297_v42  ;;  %v2389_v32 = vmul.f32 %v2297_v42, %v2297_v42  ;;  %v3064_v30 = vpop.f32.mrb[10].mxu1 }
 0x257   : > { %v2984_v31 = vpack.c.bf16 %v3064_v30, %v3063_v29  ;;  %v2300_v35 = vpop.f32.mrb[11].mxu1  ;;  %v2392_v43 = vmul.f32 %v3064_v30, %v3064_v30 }
 0x258   : > { %v2420_v36 = vadd.f32 %v2419_v13, %v2389_v32  ;;  %v2352_v37 = vadd.f32 %v2351_v62, %v2300_v35  ;;  %v2390_v48 = vmul.f32 %v2300_v35, %v2300_v35  ;;  %v2979_v34 = vpack.c.bf16 %v2300_v35, %v2297_v42 }
 0x259   : > { %3009 = vst [vmem:[%s4134_s10 + $0x68] sm:$0xff] %v2984_v31  }
 0x25a   : > { %v2353_v53 = vadd.f32 %v3063_v29, %v2352_v37  ;;  %v2421_v39 = vadd.f32 %v2420_v36, %v2390_v48  ;;  %3008 = vst [vmem:[%s4134_s10 + $0x60] sm:$0xff] %v2979_v34  }
 0x25c   : > { %v2422_v8 = vadd.f32 %v2421_v39, %v2391_v41  ;;  %v2354_v46 = vadd.f32 %v3064_v30, %v2353_v53 }
 0x25e   : > { %v2423_v50 = vadd.f32 %v2422_v8, %v2392_v43 }
 0x271   : > { %v3067_v52 = vpop.f32.mrb[12].mxu1 }
 0x272   : > { %v2313_v55 = vpop.f32.mrb[13].mxu1  ;;  %v2395_v61 = vmul.f32 %v3067_v52, %v3067_v52 }
 0x273   : > { %v2355_v54 = vadd.f32 %v2354_v46, %v2313_v55  ;;  %v2393_v18 = vmul.f32 %v2313_v55, %v2313_v55  ;;  %v3068_v40 = vpop.f32.mrb[14].mxu1 }
 0x274   : > { %v2994_v1 = vpack.c.bf16 %v3068_v40, %v3067_v52  ;;  %v2316_v24 = vpop.f32.mrb[15].mxu1  ;;  %v2396_v58 = vmul.f32 %v3068_v40, %v3068_v40 }
 0x275   : > { %v2424_v2 = vadd.f32 %v2423_v50, %v2393_v18  ;;  %v2356_v9 = vadd.f32 %v2355_v54, %v2316_v24  ;;  %v2394_v57 = vmul.f32 %v2316_v24, %v2316_v24  ;;  %v2989_v3 = vpack.c.bf16 %v2316_v24, %v2313_v55 }
 0x276   : > { %3011 = vst [vmem:[%s4134_s10 + $0x78] sm:$0xff] %v2994_v1  }
 0x277   : > { %v2357_v45 = vadd.f32 %v3067_v52, %v2356_v9  ;;  %v2425_v22 = vadd.f32 %v2424_v2, %v2394_v57  ;;  %3010 = vst [vmem:[%s4134_s10 + $0x70] sm:$0xff] %v2989_v3  }
 0x279   : > { %v2358_v5 = vadd.f32 %v3068_v40, %v2357_v45  ;;  %v2426_v0 = vadd.f32 %v2425_v22, %v2395_v61 }
 0x27b   : > { %v2359_v44 = vrot.slane %v2358_v5, 4  ;;  %v2427_v7 = vadd.f32 %v2426_v0, %v2396_v58 }
 0x27d   : > { %v2360_v11 = vadd.f32 %v2359_v44, %v2358_v5  ;;  %v2428_v60 = vrot.slane %v2427_v7, 4 }
 0x27f   : > { %v2361_v59 = vrot.slane %v2360_v11, 2  ;;  %v2429_v10 = vadd.f32 %v2428_v60, %v2427_v7 }
 0x281   : > { %v2362_v51 = vadd.f32 %v2361_v59, %v2360_v11  ;;  %v2430_v63 = vrot.slane %v2429_v10, 2 }
 0x283   : > { %v2363_v12 = vrot.slane %v2362_v51, 1  ;;  %v2431_v14 = vadd.f32 %v2430_v63, %v2429_v10 }
 0x285   : > { %v2432_v26 = vrot.slane %v2431_v14, 1  ;;  %v2364_v38 = vadd.f32 %v2363_v12, %v2362_v51 }
 0x287   : > { %v2433_v33 = vadd.f32 %v2432_v26, %v2431_v14 }
 0x289   : > { %v2435_v20 = vsel %vm2434_vm5, %v2364_v38, %v2433_v33 }
 0x28a   : > { %2436 = vst [vmem:[%s465_s13] sm:$0x3] %v2435_v20 }
 0x28b PF: > { %s18_s26 = sadd.s32 1, %s3178_s26   ;;  %s4181_s24 = smov %s3174_s25 }
 0x28c   : > { %p15_p5 = scmp.ge.s32.totalorder %s18_s26, 4   ;;  %s4182_s25 = smov %s4184_s4 }
 0x28e   :  { %17 = sbr.rel (!%p15_p5) target bundleno = 2 (0x2), region = 98 }

// kernel: conv_block_forward.3
= control target key start
LH: loop header
LB: loop body
LE: loop exit
PB: predicated region body
PF: predicated region fallthrough
CT: control target
= control target key end

     0   :  { %s4967_s24 = smov 0   ;;  %s4969_s25 = smov 0   ;;  %s6347_s0 = inlined_call_operand.vmem [shape: bf16[2,16,16,128], index: 0, kind: input, shape index: {}, may-alias: {0,1,2}]   ;;  %s6348_s1 = inlined_call_operand.vmem [shape: bf16[2,16,16,128], index: 1, kind: input, shape index: {}, may-alias: {0,1,2}]   ;;  %s6349_s2 = inlined_call_operand.vmem [shape: bf16[2,16,16,128], index: 2, kind: input, shape index: {}, may-alias: {0,1,2}]   ;;  %s6350_s3 = inlined_call_operand.vmem [shape: bf16[1152,128], index: 3, kind: input, shape index: {}]   ;;  %s6351_s4 = inlined_call_operand.vmem [shape: f32[1,128], index: 4, kind: input, shape index: {}]   ;;  %s6352_s5 = inlined_call_operand.vmem [shape: f32[1,128], index: 5, kind: input, shape index: {}]   ;;  %s6353_s6 = inlined_call_operand.vmem [shape: bf16[2,16,16,128], index: 6, kind: output, shape index: {0}]   ;;  %s6354_s7 = inlined_call_operand.vmem [shape: f32[2,1,2,128], index: 7, kind: output, shape index: {1}]  }
   0x1   :  { %s4971_s26 = smov 0  }
   0x2 LB: > { %s30_s27 = sadd.s32 1, %s4920_s25  ;;  %p3769_p0 = scmp.ge.s32.totalorder %s4924_s26, 1  ;;  %s4924_s26 = sphi %s4971_s26, %s18_s26   ;;  %s4920_s25 = sphi %s4969_s25, %s6364_s25   ;;  %s4916_s24 = sphi %s4967_s24, %s6363_s24  }
   0x3   : > { %p32_p1 = scmp.ge.s32.totalorder %s30_s27, 2  ;;  %p328_p2 = scmp.lt.s32.totalorder %s4924_s26, 3 }
   0x5   : > { %s6366_s27 = smov (%p32_p1, %s30_s27), 0  ;;  %p329_p3 = pnand %p3769_p0, %p328_p2 }
   0x6   : > { %v4780_v0 = vld [vmem:[%s6350_s3 + $0x40] sm:$0xff] (!%p329_p3)   ;;  %v4782_v2 = vld [vmem:[%s6350_s3 + $0x48] sm:$0xff] (!%p329_p3)   ;;  %p404_p4 = scmp.lt.s32.totalorder (!%p329_p3), %s4916_s24, 1  ;;  %v4784_v4 = vld [vmem:[%s6350_s3 + $0x50] sm:$0xff] (!%p329_p3)   ;;  %vm1061_vm0 = vcmask (!%p329_p3), 1043456   ;;  %vm1068_vm1 = vcmask (!%p329_p3), 1040384  }
   0x7   : > { %332 = sbr.rel (%p329_p3) target bundleno = 611 (0x263), region = 44  ;;  %v4781_v1 = vld [vmem:[%s6350_s3] sm:$0xff] (!%p329_p3)   ;;  %4219 = vmatprep.subr.bf16.mxu0 (!%p329_p3), %v4780_v0  ;;  %4739 = vmatprep.subr.bf16.mxu1 (!%p329_p3), %v4780_v0  ;;  %v4783_v3 = vld [vmem:[%s6350_s3 + $0x8] sm:$0xff] (!%p329_p3)   ;;  %v4785_v5 = vld [vmem:[%s6350_s3 + $0x10] sm:$0xff] (!%p329_p3)   ;;  %vm738_vm2 = vsmask.f32 (!%p329_p3), 4368 }
   0x8   : > { %4220 = vmatpush3.bf16.msra.mxu0 (!%p329_p3), %v4781_v1  ;;  %4747 = vmatpush3.bf16.msra.mxu1 (!%p329_p3), %v4781_v1  ;;  %v4786_v6 = vld [vmem:[%s6350_s3 + $0x58] sm:$0xff] (!%p329_p3)   ;;  %v4788_v8 = vld [vmem:[%s6350_s3 + $0x60] sm:$0xff] (!%p329_p3)   ;;  %v4790_v10 = vld [vmem:[%s6350_s3 + $0x68] sm:$0xff] (!%p329_p3)   ;;  %vm737_vm3 = vsmask.f32 (!%p329_p3), 256  ;;  %vm1819_vm10 = vcmask (!%p329_p3), 1046528  }
   0x9   : > { %4221 = vmatprep.subr.bf16.mxu0 (!%p329_p3), %v4782_v2  ;;  %4740 = vmatprep.subr.bf16.mxu1 (!%p329_p3), %v4782_v2  ;;  %v4787_v7 = vld [vmem:[%s6350_s3 + $0x18] sm:$0xff] (!%p329_p3)   ;;  %v4789_v9 = vld [vmem:[%s6350_s3 + $0x20] sm:$0xff] (!%p329_p3)   ;;  %v4791_v16 = vld [vmem:[%s6350_s3 + $0x28] sm:$0xff] (!%p329_p3)   ;;  %vm1062_vm4 = vsmask.f32 (!%p329_p3), 7938 }
   0xa   : > { %v5033_v12 = vld [vmem:[%s6351_s4] ss:$0 sm:$0xff] (!%p329_p3)  ;;  %v4792_v20 = vld [vmem:[%s6350_s3 + $0x70] sm:$0xff] (!%p329_p3)   ;;  %v4794_v26 = vld [vmem:[%s6350_s3 + $0x78] sm:$0xff] (!%p329_p3)   ;;  %vm1610_vm9 = vsmask.f32 (!%p329_p3), 7424 }
   0xb   : > { %v5042_v15 = vld [vmem:[%s6352_s5] ss:$0 sm:$0xff] (!%p329_p3)  ;;  %v4793_v23 = vld [vmem:[%s6350_s3 + $0x30] sm:$0xff] (!%p329_p3)   ;;  %v4795_v33 = vld [vmem:[%s6350_s3 + $0x38] sm:$0xff] (!%p329_p3)  }
   0xc   : > { %4222 = vmatpush3.bf16.msra.mxu0 (!%p329_p3), %v4783_v3  ;;  %4748 = vmatpush3.bf16.msra.mxu1 (!%p329_p3), %v4783_v3  ;;  %vm5068_vm5 = vmor (!%p329_p3), %vm737_vm3, %vm738_vm2  ;;  %v4800_v45 = vld [vmem:[%s6350_s3 + $0xc0] sm:$0xff] (!%p329_p3)   ;;  %v1143_v51 = vld [vmem:[#allocation2 + $0x90] sm:$0xf] (!%p329_p3) }
   0xd   : > { %4223 = vmatprep.subr.bf16.mxu0 (!%p329_p3), %v4784_v4  ;;  %4741 = vmatprep.subr.bf16.mxu1 (!%p329_p3), %v4784_v4  ;;  %v4801_v46 = vld [vmem:[%s6350_s3 + $0x140] sm:$0xff] (!%p329_p3)   ;;  %vm5081_vm6 = vmand (!%p329_p3), %vm1061_vm0, %vm1062_vm4  ;;  %v1147_v52 = vld [vmem:[#allocation2 + $0x98] sm:$0x1] (!%p329_p3) }
   0xe   : > { %s6368_s24 = smov (!%p404_p4, %s4916_s24), 1  ;;  %vm5087_vm7 = vmand %vm1068_vm1, %vm737_vm3  ;;  %v1228_v1 = vld [vmem:[#allocation2] sm:$0xf] }
   0xf   : > { %s5009_s19 = sshll.u32 %s6368_s24, 7  ;;  %vm5118_vm8 = vmand %vm1068_vm1, %vm1062_vm4 }
  0x10   : > { %4224 = vmatpush3.bf16.msra.mxu0 %v4785_v5  ;;  %4749 = vmatpush3.bf16.msra.mxu1 %v4785_v5  ;;  %s5021_s30 = scalar_lea.vmem %s6347_s0, %s5009_s19  ;;  %s426_s16 = scalar_lea.vmem %s6348_s1, %s5009_s19 }
  0x11   : > { %4225 = vmatprep.subr.bf16.mxu0 %v4786_v6  ;;  %4742 = vmatprep.subr.bf16.mxu1 %v4786_v6  ;;  %v4199_v11 = vld [vmem:[%s5021_s30 + $0x58] sm:$0xff]   ;;  %v4101_v19 = vld [vmem:[%s426_s16] sm:$0xff]   ;;  %s3966_s20 = sadd.s32 120, %s5009_s19 }
  0x12   : > { %v4082_v13 = vunpack.c.l.bf16 %v4199_v11  ;;  %v4083_v14 = vunpack.c.h.bf16 %v4199_v11  ;;  %v4102_v21 = vunpack.c.l.bf16 %v4101_v19  ;;  %v4103_v22 = vunpack.c.h.bf16 %v4101_v19  ;;  %v4200_v47 = vld [vmem:[%s5021_s30 + $0x60] sm:$0xff]   ;;  %s443_s23 = scalar_lea.vmem %s6349_s2, %s3966_s20  ;;  %s6256_s20 = scalar_lea.vmem %s6353_s6, %s5009_s19 }
  0x13   : > { %v4086_v53 = vunpack.c.l.bf16 %v4200_v47  ;;  %v4087_v54 = vunpack.c.h.bf16 %v4200_v47  ;;  %v4037_v60 = vld [vmem:[%s5021_s30] sm:$0xff]   ;;  %s3778_s19 = sshll.u32 %s6368_s24, 1 }
  0x14   : > { %4226 = vmatpush3.bf16.msra.mxu0 %v4787_v7  ;;  %4750 = vmatpush3.bf16.msra.mxu1 %v4787_v7  ;;  %v560_v17 = vmul.f32 %v4082_v13, %v5033_v12  ;;  %v561_v18 = vmul.f32 %v4083_v14, %v5033_v12  ;;  %v1189_v27 = vmul.f32 %v4102_v21, %v5033_v12  ;;  %v4039_v19 = vunpack.c.h.bf16 %v4037_v60 }
  0x15   : > { %4227 = vmatprep.subr.bf16.mxu0 %v4788_v8  ;;  %4743 = vmatprep.subr.bf16.mxu1 %v4788_v8  ;;  %v1190_v28 = vmul.f32 %v4103_v22, %v5033_v12  ;;  %v562_v4 = vmul.f32 %v4086_v53, %v5033_v12  ;;  %v563_v5 = vmul.f32 %v4087_v54, %v5033_v12  ;;  %v1150_v53 = vld [vmem:[#allocation2 + $0x9c] sm:$0xf] }
  0x16   : > { %v599_v24 = vadd.f32 %v5042_v15, %v560_v17  ;;  %v600_v25 = vadd.f32 %v5042_v15, %v561_v18  ;;  %v1198_v31 = vadd.f32 %v5042_v15, %v1189_v27 }
  0x17   : > { %v1199_v32 = vadd.f32 %v5042_v15, %v1190_v28  ;;  %v601_v17 = vadd.f32 %v5042_v15, %v562_v4  ;;  %v602_v18 = vadd.f32 %v5042_v15, %v563_v5  ;;  %v4201_v28 = vld [vmem:[%s5021_s30 + $0x68] sm:$0xff]  }
  0x18   : > { %4228 = vmatpush3.bf16.msra.mxu0 %v4789_v9  ;;  %4751 = vmatpush3.bf16.msra.mxu1 %v4789_v9  ;;  %v631_v29 = vmax.f32 %v599_v24, 0.0  ;;  %v632_v30 = vmax.f32 %v600_v25, 0.0  ;;  %v1200_v36 = vmax.f32 %v1198_v31, 0.0  ;;  %v1232_v9 = vld [vmem:[#allocation2 + $0x8] sm:$0x1]  ;;  %v4091_v31 = vunpack.c.h.bf16 %v4201_v28 }
  0x19   : > { %4229 = vmatprep.subr.bf16.mxu0 %v4790_v10  ;;  %4744 = vmatprep.subr.bf16.mxu1 %v4790_v10  ;;  %v1201_v37 = vmax.f32 %v1199_v32, 0.0  ;;  %v4038_v10 = vunpack.c.l.bf16 %v4037_v60  ;;  %v633_v24 = vmax.f32 %v601_v17, 0.0  ;;  %v634_v25 = vmax.f32 %v602_v18, 0.0  ;;  %v5114_v32 = vld [vmem:[%s5021_s30 + $0x8] sm:$0xff]   ;;  %v1154_v60 = vld [vmem:[#allocation2 + $0xa4] sm:$0x1] }
  0x1a   : > { %v3990_v34 = vpack.c.bf16 %v631_v29, %v631_v29  ;;  %v3991_v35 = vpack.c.bf16 %v632_v30, %v632_v30  ;;  %v4000_v43 = vpack.c.bf16 %v1200_v36, %v1200_v36  ;;  %v4926_v29 = vmov 0   ;;  %v1064_v4 = vld [vmem:[#allocation2 + $0xc] sm:$0xf] }
  0x1b   : > { %v4001_v44 = vpack.c.bf16 %v1201_v37, %v1201_v37  ;;  %v4090_v30 = vunpack.c.l.bf16 %v4201_v28 }
  0x1c   : > { %4230 = vmatpush3.bf16.msra.mxu0 %v4791_v16  ;;  %4752 = vmatpush3.bf16.msra.mxu1 %v4791_v16  ;;  %v928_v39 = vshrl.u32 %v3990_v34, 16  ;;  %v931_v40 = vshll.u32 %v3990_v34, 16  ;;  %v936_v41 = vshrl.u32 %v3991_v35, 16  ;;  %v939_v42 = vshll.u32 %v3991_v35, 16 }
  0x1d   : > { %4231 = vmatprep.subr.bf16.mxu0 %v4792_v20  ;;  %4745 = vmatprep.subr.bf16.mxu1 %v4792_v20  ;;  %v1209_v56 = vshrl.u32 %v4000_v43, 16  ;;  %v1212_v57 = vshll.u32 %v4000_v43, 16  ;;  %v1217_v58 = vshrl.u32 %v4001_v44, 16  ;;  %v1220_v59 = vshll.u32 %v4001_v44, 16 }
  0x1e   : > { %v930_v48 = vrot.slane %v928_v39, 7  ;;  %v938_v49 = vrot.slane %v936_v41, 7  ;;  %v538_v20 = vmul.f32 %v4038_v10, %v5033_v12  ;;  %v3992_v34 = vpack.c.bf16 %v633_v24, %v633_v24 }
  0x1f   : > { %v1211_v2 = vrot.slane %v1209_v56, 7  ;;  %v1219_v3 = vrot.slane %v1217_v58, 7  ;;  %v3993_v35 = vpack.c.bf16 %v634_v25, %v634_v25  ;;  %v564_v39 = vmul.f32 %v4090_v30, %v5033_v12 }
  0x20   : > { %4232 = vmatpush3.bf16.msra.mxu0 %v4793_v23  ;;  %4753 = vmatpush3.bf16.msra.mxu1 %v4793_v23  ;;  %v933_v61 = vor.u32 %v931_v40, %v930_v48  ;;  %v934_v62 = vrot.slane %v930_v48, 4  ;;  %v941_v63 = vor.u32 %v939_v42, %v938_v49  ;;  %v943_v0 = vrot.slane %v938_v49, 4 }
  0x21   : > { %4233 = vmatprep.subr.bf16.mxu0 %v4794_v26  ;;  %4746 = vmatprep.subr.bf16.mxu1 %v4794_v26  ;;  %v1214_v11 = vor.u32 %v1212_v57, %v1211_v2  ;;  %v1215_v13 = vrot.slane %v1211_v2, 4  ;;  %v1222_v14 = vor.u32 %v1220_v59, %v1219_v3  ;;  %v1224_v16 = vrot.slane %v1219_v3, 4 }
  0x22   : > { %v942_v6 = vsel %vm5068_vm5, %v934_v62, %v941_v63  ;;  %v1144_v7 = vsel %vm5081_vm6, %v933_v61, %v1143_v51  ;;  %v1148_v8 = vsel %vm5087_vm7, %v943_v0, %v1147_v52  ;;  %v539_v26 = vmul.f32 %v4039_v19, %v5033_v12 }
  0x23   : > { %1145 = vst [vmem:[#allocation2 + $0x90] sm:$0xf] %v1144_v7  ;;  %1146 = vst [vmem:[#allocation2 + $0x94] sm:$0xf] %v942_v6  ;;  %v1223_v21 = vsel %vm5068_vm5, %v1215_v13, %v1222_v14  ;;  %v1229_v22 = vsel %vm5081_vm6, %v1214_v11, %v1228_v1  ;;  %v1233_v23 = vsel %vm5087_vm7, %v1224_v16, %v1232_v9  ;;  %v4042_v44 = vunpack.c.l.bf16 %v5114_v32 }
  0x24   : > { %4234 = vmatpush3.bf16.msra.mxu0 %v4795_v33  ;;  %4754 = vmatpush3.bf16.msra.mxu1 %v4795_v33  ;;  %1149 = vst [vmem:[#allocation2 + $0x98] sm:$0x1] %v1148_v8  ;;  %1230 = vst [vmem:[#allocation2] sm:$0xf] %v1229_v22  ;;  %v577_v27 = vadd.f32 %v5042_v15, %v538_v20  ;;  %v578_v36 = vadd.f32 %v5042_v15, %v539_v26  ;;  %v945_v48 = vshrl.u32 %v3992_v34, 16 }
  0x25   : > { %4331 = vmatprep.subr.bf16.mxu1 %v4800_v45  ;;  %4443 = vmatprep.subr.bf16.mxu0 %v4801_v46  ;;  %1231 = vst [vmem:[#allocation2 + $0x4] sm:$0xf] %v1223_v21  ;;  %1234 = vst [vmem:[#allocation2 + $0x8] sm:$0x1] %v1233_v23  ;;  %v565_v40 = vmul.f32 %v4091_v31, %v5033_v12  ;;  %v4043_v45 = vunpack.c.h.bf16 %v5114_v32  ;;  %v948_v49 = vshll.u32 %v3992_v34, 16  ;;  %v953_v51 = vshrl.u32 %v3993_v35, 16 }
  0x26   : > { %1407 = vst [vmem:[#allocation2 + $0x4] sm:$0xf] %v4926_v29  ;;  %v609_v37 = vmax.f32 %v577_v27, 0.0  ;;  %v956_v52 = vshll.u32 %v3993_v35, 16  ;;  %v610_v54 = vmax.f32 %v578_v36, 0.0  ;;  %v947_v59 = vrot.slane %v945_v48, 7 }
  0x27   : > { %v603_v62 = vadd.f32 %v5042_v15, %v564_v39  ;;  %v604_v63 = vadd.f32 %v5042_v15, %v565_v40  ;;  %v955_v2 = vrot.slane %v953_v51, 7  ;;  %v1070_v22 = vld [vmem:[#allocation2 + $0x14] sm:$0x1]  ;;  %v540_v27 = vmul.f32 %v4042_v44, %v5033_v12 }
  0x28   : > { %v3968_v43 = vpack.c.bf16 %v609_v37, %v609_v37  ;;  %v3969_v3 = vpack.c.bf16 %v610_v54, %v610_v54  ;;  %v950_v5 = vor.u32 %v948_v49, %v947_v59  ;;  %v951_v6 = vrot.slane %v947_v59, 4 }
  0x29   : > { %v635_v8 = vmax.f32 %v603_v62, 0.0  ;;  %v958_v9 = vor.u32 %v956_v52, %v955_v2  ;;  %v960_v10 = vrot.slane %v955_v2, 4  ;;  %v636_v18 = vmax.f32 %v604_v63, 0.0  ;;  %v1161_v63 = vld [vmem:[#allocation2 + $0xb0] sm:$0x1]  ;;  %v4804_v2 = vld [vmem:[%s6350_s3 + $0xc8] sm:$0xff]  }
  0x2a   : > { %v1329_v41 = vld [vmem:[#allocation2 + $0x90] sm:$0x1]  ;;  %v741_v56 = vshrl.u32 %v3968_v43, 16  ;;  %v744_v61 = vshll.u32 %v3968_v43, 16  ;;  %v749_v11 = vshrl.u32 %v3969_v3, 16  ;;  %v752_v13 = vshll.u32 %v3969_v3, 16 }
  0x2b   : > { %v1384_v42 = vld [vmem:[#allocation2 + $0x98] sm:$0x1]  ;;  %v1330_v46 = vsel %vm5087_vm7, 0, %v1329_v41  ;;  %v1293_v57 = vld [vmem:[#allocation2] sm:$0x1]  ;;  %v1151_v14 = vsel %vm5081_vm6, %v950_v5, %v1150_v53  ;;  %v959_v19 = vsel %vm5068_vm5, %v951_v6, %v958_v9  ;;  %v1155_v20 = vsel %vm5087_vm7, %v960_v10, %v1154_v60  ;;  %v5154_v41 = vld [vmem:[%s5021_s30 + $0x70] sm:$0xff]  }
  0x2c   : > { %v1385_v47 = vsel %vm5118_vm8, 0, %v1384_v42  ;;  %1331 = vst [vmem:[#allocation2 + $0x90] sm:$0x1] %v1330_v46  ;;  %v1348_v58 = vld [vmem:[#allocation2 + $0x8] sm:$0x1]  ;;  %v1294_v0 = vsel %vm5087_vm7, 0, %v1293_v57  ;;  %v3994_v23 = vpack.c.bf16 %v635_v8, %v635_v8  ;;  %v3995_v26 = vpack.c.bf16 %v636_v18, %v636_v18 }
  0x2d   : > { %1386 = vst [vmem:[#allocation2 + $0x98] sm:$0x1] %v1385_v47  ;;  %v1349_v1 = vsel %vm5118_vm8, 0, %v1348_v58  ;;  %1295 = vst [vmem:[#allocation2] sm:$0x1] %v1294_v0  ;;  %v743_v7 = vrot.slane %v741_v56, 7  ;;  %v541_v28 = vmul.f32 %v4043_v45, %v5033_v12  ;;  %v579_v49 = vadd.f32 %v5042_v15, %v540_v27 }
  0x2e   : > { %1350 = vst [vmem:[#allocation2 + $0x8] sm:$0x1] %v1349_v1  ;;  %1406 = vst [vmem:[#allocation2] sm:$0xf] %v4926_v29  ;;  %v751_v21 = vrot.slane %v749_v11, 7  ;;  %v962_v34 = vshrl.u32 %v3994_v23, 16  ;;  %v4094_v6 = vunpack.c.l.bf16 %v5154_v41  ;;  %v4095_v27 = vunpack.c.h.bf16 %v5154_v41 }
  0x2f   : > { %1408 = vst [vmem:[#allocation2 + $0x8] sm:$0x1] %v4926_v29  ;;  %v746_v16 = vor.u32 %v744_v61, %v743_v7  ;;  %v747_v17 = vrot.slane %v743_v7, 4  ;;  %1152 = vst [vmem:[#allocation2 + $0x9c] sm:$0xf] %v1151_v14  ;;  %v965_v35 = vshll.u32 %v3994_v23, 16  ;;  %v580_v51 = vadd.f32 %v5042_v15, %v541_v28 }
  0x30   : > { %1153 = vst [vmem:[#allocation2 + $0xa0] sm:$0xf] %v959_v19  ;;  %1156 = vst [vmem:[#allocation2 + $0xa4] sm:$0x1] %v1155_v20  ;;  %v754_v31 = vor.u32 %v752_v13, %v751_v21  ;;  %v756_v32 = vrot.slane %v751_v21, 4  ;;  %v970_v39 = vshrl.u32 %v3995_v26, 16 }
  0x31   : > { %v1065_v25 = vsel %vm5081_vm6, %v746_v16, %v1064_v4  ;;  %v973_v40 = vshll.u32 %v3995_v26, 16  ;;  %v964_v45 = vrot.slane %v962_v34, 7  ;;  %v1157_v46 = vld [vmem:[#allocation2 + $0xa8] sm:$0xf]  ;;  %v4802_v61 = vld [vmem:[%s6350_s3 + $0x80] sm:$0xff]   ;;  %v611_v0 = vmax.f32 %v579_v49, 0.0 }
  0x32   : > { %1066 = vst [vmem:[#allocation2 + $0xc] sm:$0xf] %v1065_v25  ;;  %v755_v43 = vsel %vm5068_vm5, %v747_v17, %v754_v31  ;;  %v1071_v44 = vsel %vm5087_vm7, %v756_v32, %v1070_v22  ;;  %v972_v57 = vrot.slane %v970_v39, 7  ;;  %v4190_v7 = vld [vmem:[%s5021_s30 + $0x10] sm:$0xff]   ;;  %v4803_v16 = vld [vmem:[%s6350_s3 + $0x100] sm:$0xff]   ;;  %v4805_v17 = vld [vmem:[%s6350_s3 + $0x88] sm:$0xff]  }
  0x33   : > { %v5145_v24 = vld [vmem:[#allocation2 + $0x90] sm:$0xff]   ;;  %1067 = vst [vmem:[#allocation2 + $0x10] sm:$0xf] %v755_v43  ;;  %1072 = vst [vmem:[#allocation2 + $0x14] sm:$0x1] %v1071_v44  ;;  %v967_v54 = vor.u32 %v965_v35, %v964_v45  ;;  %v968_v56 = vrot.slane %v964_v45, 4  ;;  %v3970_v26 = vpack.c.bf16 %v611_v0, %v611_v0  ;;  %v4046_v31 = vunpack.c.l.bf16 %v4190_v7 }
  0x34   : > { %v4797_v30 = vld [vmem:[#allocation2 + $0x98] ss:$0 sps:$4 sm:$0x11]   ;;  %v1756_v36 = vshrl.u32 %v5145_v24, 16  ;;  %v1758_v37 = vshll.u32 %v5145_v24, 16  ;;  %v975_v5 = vor.u32 %v973_v40, %v972_v57  ;;  %v977_v20 = vrot.slane %v972_v57, 4 }
  0x35   : > { %v1763_v42 = vshll.u32 %v4797_v30, 16  ;;  %v5160_v48 = vld [vmem:[#allocation2] sm:$0xff]   ;;  %v1158_v13 = vsel %vm5081_vm6, %v967_v54, %v1157_v46  ;;  %v4810_v22 = vld [vmem:[%s6350_s3 + $0xd0] sm:$0xff]   ;;  %v4813_v23 = vld [vmem:[%s6350_s3 + $0x148] sm:$0xff]   ;;  %v612_v25 = vmax.f32 %v580_v51, 0.0  ;;  %v4047_v32 = vunpack.c.h.bf16 %v4190_v7 }
  0x36   : > { %v1760_v47 = vrot.slane %v1758_v37, 1  ;;  %v5164_v53 = vld [vmem:[#allocation2 + $0x8] ss:$0 sps:$4 sm:$0x11]   ;;  %v1612_v59 = vshrl.u32 %v5160_v48, 16  ;;  %v1614_v60 = vshll.u32 %v5160_v48, 16  ;;  %v976_v19 = vsel %vm5068_vm5, %v968_v56, %v975_v5 }
  0x37   : > { %v1765_v52 = vrot.slane %v1763_v42, 1  ;;  %v1332_v62 = vld [vmem:[#allocation2 + $0x9c] sm:$0x1]  ;;  %v1619_v1 = vshll.u32 %v5164_v53, 16  ;;  %v1387_v4 = vld [vmem:[#allocation2 + $0xa4] sm:$0x1]  ;;  %v1162_v30 = vsel %vm5087_vm7, %v977_v20, %v1161_v63  ;;  %v567_v43 = vmul.f32 %v4095_v27, %v5033_v12 }
  0x38   : > { %v1761_v58 = vor.u32 %v1760_v47, %v1756_v36  ;;  %v1333_v3 = vsel %vm5087_vm7, 0, %v1332_v62  ;;  %v1616_v9 = vrot.slane %v1614_v60, 1  ;;  %v1388_v10 = vsel %vm5118_vm8, 0, %v1387_v4  ;;  %1159 = vst [vmem:[#allocation2 + $0xa8] sm:$0xf] %v1158_v13  ;;  %v4811_v39 = vld [vmem:[%s6350_s3 + $0x90] sm:$0xff]  }
  0x39   : > { %1334 = vst [vmem:[#allocation2 + $0x9c] sm:$0x1] %v1333_v3  ;;  %v1296_v11 = vld [vmem:[#allocation2 + $0xc] sm:$0x1]  ;;  %v1621_v14 = vrot.slane %v1619_v1, 1  ;;  %v3971_v36 = vpack.c.bf16 %v612_v25, %v612_v25  ;;  %v758_v37 = vshrl.u32 %v3970_v26, 16  ;;  %v542_v45 = vmul.f32 %v4046_v31, %v5033_v12 }
  0x3a   : > { %v5180_v8 = vsel %vm1610_vm9, %v1761_v58, %v1765_v52  ;;  %1389 = vst [vmem:[#allocation2 + $0xa4] sm:$0x1] %v1388_v10  ;;  %v1297_v18 = vsel %vm5087_vm7, 0, %v1296_v11  ;;  %v1617_v21 = vor.u32 %v1616_v9, %v1612_v59  ;;  %1160 = vst [vmem:[#allocation2 + $0xac] sm:$0xf] %v976_v19  ;;  %v4815_v40 = vld [vmem:[%s6350_s3 + $0x108] sm:$0xff]   ;;  %v543_v52 = vmul.f32 %v4047_v32, %v5033_v12 }
  0x3b   : > { %2640 = vmatprep.mubr.bf16.mxu1 %v5180_v8  ;;  %1298 = vst [vmem:[#allocation2 + $0xc] sm:$0x1] %v1297_v18  ;;  %v1351_v28 = vld [vmem:[#allocation2 + $0x14] sm:$0x1]  ;;  %1163 = vst [vmem:[#allocation2 + $0xb0] sm:$0x1] %v1162_v30  ;;  %v606_v58 = vadd.f32 %v5042_v15, %v567_v43  ;;  %v5233_v60 = vadd.f32 %v5042_v15, %v542_v45 }
  0x3c   : > { %2641 = vmatmul.mubr.bf16.vlgmr.msra.gmra.mrb[0].mxu1 %v5145_v24  ;;  %v566_v24 = vmul.f32 %v4094_v6, %v5033_v12  ;;  %v1622_v34 = vsel %vm1610_vm9, %v1617_v21, %v1621_v14  ;;  %v1352_v35 = vsel %vm5118_vm8, 0, %v1351_v28  ;;  %v761_v41 = vshll.u32 %v3970_v26, 16  ;;  %v1073_v42 = vld [vmem:[#allocation2 + $0x18] sm:$0xf]  ;;  %v4829_v54 = vld [vmem:[%s6350_s3 + $0x150] sm:$0xff]  }
  0x3d   : > { %4332 = vmatpush3.bf16.msra.mxu1 %v4802_v61  ;;  %2544 = vmatprep.mubr.bf16.mxu0 %v1622_v34  ;;  %1353 = vst [vmem:[#allocation2 + $0x14] sm:$0x1] %v1352_v35  ;;  %v4812_v46 = vld [vmem:[%s6350_s3 + $0xd8] sm:$0xff]   ;;  %v760_v47 = vrot.slane %v758_v37, 7  ;;  %v766_v49 = vshrl.u32 %v3971_v36, 16  ;;  %v769_v51 = vshll.u32 %v3971_v36, 16  ;;  %v5236_v1 = vadd.f32 %v5042_v15, %v543_v52 }
  0x3e   : > { %4333 = vmatprep.subr.bf16.mxu1 %v4804_v2  ;;  %v605_v44 = vadd.f32 %v5042_v15, %v566_v24  ;;  %2545 = vmatmul.mubr.bf16.vlgmr.msra.gmra.mrb[0].mxu0 %v5160_v48  ;;  %v4191_v56 = vld [vmem:[%s5021_s30 + $0x18] sm:$0xff]   ;;  %v4831_v10 = vld [vmem:[%s6350_s3 + $0x110] sm:$0xff]   ;;  %v638_v18 = vmax.f32 %v606_v58, 0.0  ;;  %v613_v58 = vmax.f32 %v5233_v60, 0.0 }
  0x3f   : > { %4444 = vmatpush3.bf16.msra.mxu0 %v4803_v16  ;;  %v4050_v61 = vunpack.c.l.bf16 %v4191_v56  ;;  %v763_v63 = vor.u32 %v761_v41, %v760_v47  ;;  %v764_v0 = vrot.slane %v760_v47, 4  ;;  %v4051_v2 = vunpack.c.h.bf16 %v4191_v56  ;;  %v4814_v6 = vld [vmem:[%s6350_s3 + $0x98] sm:$0xff]   ;;  %v1335_v13 = vld [vmem:[#allocation2 + $0xa8] sm:$0x1]  ;;  %v1077_v16 = vld [vmem:[#allocation2 + $0x20] sm:$0x1] }
  0x40   : > { %v5229_v57 = vld [vmem:[#allocation2 + $0x9c] sm:$0xff]   ;;  %v637_v59 = vmax.f32 %v605_v44, 0.0  ;;  %4445 = vmatprep.subr.bf16.mxu0 %v4813_v23  ;;  %v768_v7 = vrot.slane %v766_v49, 7  ;;  %v1336_v23 = vsel %vm5087_vm7, 0, %v1335_v13  ;;  %v3997_v30 = vpack.c.bf16 %v638_v18, %v638_v18  ;;  %v1164_v47 = vld [vmem:[#allocation2 + $0xb4] sm:$0xf] }
  0x41   : > { %4334 = vmatpush3.bf16.msra.mxu1 %v4805_v17  ;;  %v4807_v62 = vld [vmem:[#allocation2 + $0xa4] ss:$0 sps:$4 sm:$0x11]   ;;  %v1768_v3 = vshrl.u32 %v5229_v57, 16  ;;  %v1770_v4 = vshll.u32 %v5229_v57, 16  ;;  %v1074_v14 = vsel %vm5081_vm6, %v763_v63, %v1073_v42  ;;  %v544_v19 = vmul.f32 %v4050_v61, %v5033_v12  ;;  %v4838_v49 = vld [vmem:[%s6350_s3 + $0x158] sm:$0xff]  }
  0x42   : > { %4335 = vmatprep.subr.bf16.mxu1 %v4810_v22  ;;  %v5240_v5 = vld [vmem:[#allocation2 + $0xc] sm:$0xff]   ;;  %v5245_v9 = vpack.c.bf16 %v637_v59, %v637_v59  ;;  %v1775_v11 = vshll.u32 %v4807_v62, 16  ;;  %v4820_v17 = vld [vmem:[%s6350_s3 + $0xe0] sm:$0xff]   ;;  %1075 = vst [vmem:[#allocation2 + $0x18] sm:$0xf] %v1074_v14  ;;  %v771_v28 = vor.u32 %v769_v51, %v768_v7  ;;  %v545_v24 = vmul.f32 %v4051_v2, %v5033_v12 }
  0x43   : > { %v1772_v20 = vrot.slane %v1770_v4, 1  ;;  %v1624_v21 = vshrl.u32 %v5240_v5, 16  ;;  %v1626_v22 = vshll.u32 %v5240_v5, 16  ;;  %4446 = vmatpush3.bf16.msra.mxu0 %v4815_v40  ;;  %v1390_v25 = vld [vmem:[#allocation2 + $0xb0] sm:$0x1]  ;;  %v773_v35 = vrot.slane %v768_v7, 4 }
  0x44   : > { %v1777_v26 = vrot.slane %v1775_v11, 1  ;;  %v5260_v27 = vld [vmem:[#allocation2 + $0x14] ss:$0 sps:$4 sm:$0x11]   ;;  %1337 = vst [vmem:[#allocation2 + $0xa8] sm:$0x1] %v1336_v23  ;;  %4447 = vmatprep.subr.bf16.mxu0 %v4829_v54  ;;  %v772_v37 = vsel %vm5068_vm5, %v764_v0, %v771_v28  ;;  %v583_v63 = vadd.f32 %v5042_v15, %v544_v19  ;;  %v584_v0 = vadd.f32 %v5042_v15, %v545_v24 }
  0x45   : > { %4336 = vmatpush3.bf16.msra.mxu1 %v4811_v39  ;;  %v1773_v31 = vor.u32 %v1772_v20, %v1768_v3  ;;  %v1628_v32 = vrot.slane %v1626_v22, 1  ;;  %v1391_v34 = vsel %vm5118_vm8, 0, %v1390_v25  ;;  %v1631_v36 = vshll.u32 %v5260_v27, 16  ;;  %v4821_v39 = vld [vmem:[%s6350_s3 + $0xa0] sm:$0xff]   ;;  %v4822_v40 = vld [vmem:[%s6350_s3 + $0xe8] sm:$0xff]  }
  0x46   : > { %4337 = vmatprep.subr.bf16.mxu1 %v4812_v46  ;;  %1392 = vst [vmem:[#allocation2 + $0xb0] sm:$0x1] %v1391_v34  ;;  %v979_v41 = vshrl.u32 %v5245_v9, 16  ;;  %v982_v42 = vshll.u32 %v5245_v9, 16  ;;  %1076 = vst [vmem:[#allocation2 + $0x1c] sm:$0xf] %v772_v37  ;;  %v1078_v45 = vsel %vm5087_vm7, %v773_v35, %v1077_v16 }
  0x47   : > { %v5277_v43 = vsel %vm1610_vm9, %v1773_v31, %v1777_v26  ;;  %v1629_v44 = vor.u32 %v1628_v32, %v1624_v21  ;;  %v987_v46 = vshrl.u32 %v3997_v30, 16  ;;  %4448 = vmatpush3.bf16.msra.mxu0 %v4831_v10  ;;  %v1633_v51 = vrot.slane %v1631_v36, 1  ;;  %1079 = vst [vmem:[#allocation2 + $0x20] sm:$0x1] %v1078_v45  ;;  %v1168_v56 = vld [vmem:[#allocation2 + $0xbc] sm:$0x1] }
  0x48   : > { %2648 = vmatprep.mubr.bf16.mxu1 %v5277_v43  ;;  %v981_v52 = vrot.slane %v979_v41, 7  ;;  %v990_v54 = vshll.u32 %v3997_v30, 16  ;;  %v4823_v59 = vld [vmem:[%s6350_s3 + $0xa8] sm:$0xff]   ;;  %v614_v62 = vmax.f32 %v5236_v1, 0.0  ;;  %4449 = vmatprep.subr.bf16.mxu0 %v4838_v49  ;;  %v5305_v11 = vld [vmem:[%s5021_s30 + $0x20] sm:$0xff]   ;;  %v615_v18 = vmax.f32 %v583_v63, 0.0 }
  0x49   : > { %4338 = vmatpush3.bf16.msra.mxu1 %v4814_v6  ;;  %v989_v61 = vrot.slane %v987_v46, 7  ;;  %v5294_v2 = vsel %vm1610_vm9, %v1629_v44, %v1633_v51  ;;  %v1299_v3 = vld [vmem:[#allocation2 + $0x18] sm:$0x1]  ;;  %v1080_v23 = vld [vmem:[#allocation2 + $0x24] sm:$0xf]  ;;  %v4830_v30 = vld [vmem:[%s6350_s3 + $0xb0] sm:$0xff]   ;;  %v4054_v24 = vunpack.c.l.bf16 %v5305_v11 }
  0x4a   : > { %4339 = vmatprep.subr.bf16.mxu1 %v4820_v17  ;;  %2649 = vmatmul.mubr.bf16.gmra.mrb[4].mxu1 %v5229_v57  ;;  %v984_v60 = vor.u32 %v982_v42, %v981_v52  ;;  %v985_v4 = vrot.slane %v981_v52, 4  ;;  %v3972_v57 = vpack.c.bf16 %v613_v58, %v613_v58  ;;  %v4839_v6 = vld [vmem:[%s6350_s3 + $0x118] sm:$0xff]   ;;  %v1300_v7 = vsel %vm5087_vm7, 0, %v1299_v3  ;;  %v4828_v17 = vld [vmem:[%s6350_s3 + $0xf0] sm:$0xff]   ;;  %v4844_v37 = vld [vmem:[%s6350_s3 + $0x160] sm:$0xff]  }
  0x4b   : > { %2552 = vmatprep.mubr.bf16.mxu0 %v5294_v2  ;;  %v5300_v1 = vld [vmem:[#allocation2 + $0xa8] sm:$0xff]   ;;  %v992_v15 = vor.u32 %v990_v54, %v989_v61  ;;  %v994_v9 = vrot.slane %v989_v61, 4  ;;  %v3973_v10 = vpack.c.bf16 %v614_v62, %v614_v62  ;;  %1301 = vst [vmem:[#allocation2 + $0x18] sm:$0x1] %v1300_v7  ;;  %4450 = vmatpush3.bf16.msra.mxu0 %v4839_v6  ;;  %v616_v35 = vmax.f32 %v584_v0, 0.0  ;;  %v4832_v44 = vld [vmem:[%s6350_s3 + $0xf8] sm:$0xff]  }
  0x4c   : > { %2553 = vmatmul.mubr.bf16.gmra.mrb[4].mxu0 %v5240_v5  ;;  %v1165_v13 = vsel %vm5081_vm6, %v984_v60, %v1164_v47  ;;  %v775_v14 = vshrl.u32 %v3972_v57, 16  ;;  %v778_v16 = vshll.u32 %v3972_v57, 16  ;;  %v1780_v20 = vshrl.u32 %v5300_v1, 16  ;;  %4451 = vmatprep.subr.bf16.mxu0 %v4844_v37  ;;  %v4846_v51 = vld [vmem:[%s6350_s3 + $0x120] sm:$0xff]   ;;  %v1084_v58 = vld [vmem:[#allocation2 + $0x2c] sm:$0x1] }
  0x4d   : > { %4340 = vmatpush3.bf16.msra.mxu1 %v4821_v39  ;;  %v4817_v19 = vld [vmem:[#allocation2 + $0xb0] ss:$0 sps:$4 sm:$0x11]   ;;  %v993_v21 = vsel %vm5068_vm5, %v985_v4, %v992_v15  ;;  %1166 = vst [vmem:[#allocation2 + $0xb4] sm:$0xf] %v1165_v13  ;;  %v1169_v22 = vsel %vm5087_vm7, %v994_v9, %v1168_v56  ;;  %v1782_v25 = vshll.u32 %v5300_v1, 16  ;;  %v3974_v36 = vpack.c.bf16 %v615_v18, %v615_v18 }
  0x4e   : > { %4341 = vmatprep.subr.bf16.mxu1 %v4822_v40  ;;  %1167 = vst [vmem:[#allocation2 + $0xb8] sm:$0xf] %v993_v21  ;;  %1170 = vst [vmem:[#allocation2 + $0xbc] sm:$0x1] %v1169_v22  ;;  %v777_v26 = vrot.slane %v775_v14, 7  ;;  %v783_v28 = vshrl.u32 %v3973_v10, 16  ;;  %v3975_v47 = vpack.c.bf16 %v616_v35, %v616_v35  ;;  %v4055_v9 = vunpack.c.h.bf16 %v5305_v11 }
  0x4f   : > { %v1787_v31 = vshll.u32 %v4817_v19, 16  ;;  %v1354_v32 = vld [vmem:[#allocation2 + $0x20] sm:$0x1]  ;;  %v786_v34 = vshll.u32 %v3973_v10, 16  ;;  %v1784_v39 = vrot.slane %v1782_v25, 1  ;;  %v792_v49 = vshrl.u32 %v3974_v36, 16  ;;  %4452 = vmatpush3.bf16.msra.mxu0 %v4846_v51 }
  0x50   : > { %v1355_v40 = vsel %vm5118_vm8, 0, %v1354_v32  ;;  %v780_v41 = vor.u32 %v778_v16, %v777_v26  ;;  %v781_v42 = vrot.slane %v777_v26, 4  ;;  %v785_v46 = vrot.slane %v783_v28, 7  ;;  %v1087_v4 = vld [vmem:[#allocation2 + $0x30] sm:$0xf]  ;;  %v4836_v15 = vld [vmem:[%s6350_s3 + $0x1c0] sm:$0xff]  }
  0x51   : > { %4342 = vmatpush3.bf16.msra.mxu1 %v4823_v59  ;;  %v1789_v45 = vrot.slane %v1787_v31, 1  ;;  %1356 = vst [vmem:[#allocation2 + $0x20] sm:$0x1] %v1355_v40  ;;  %v1821_v52 = vrot.slane %v5164_v53, 1  ;;  %v1785_v54 = vor.u32 %v1784_v39, %v1780_v20  ;;  %v4833_v59 = vld [vmem:[%s6350_s3 + $0xb8] sm:$0xff]   ;;  %v795_v61 = vshll.u32 %v3974_v36, 16 }
  0x52   : > { %4343 = vmatprep.subr.bf16.mxu1 %v4828_v17  ;;  %v1081_v56 = vsel %vm5081_vm6, %v780_v41, %v1080_v23  ;;  %v5340_v62 = vld [vmem:[#allocation2 + $0x18] sm:$0xff]   ;;  %v788_v63 = vor.u32 %v786_v34, %v785_v46  ;;  %v790_v0 = vrot.slane %v785_v46, 4  ;;  %v794_v3 = vrot.slane %v792_v49, 7  ;;  %v4193_v13 = vld [vmem:[%s5021_s30 + $0x28] sm:$0xff]  }
  0x53   : > { %1082 = vst [vmem:[#allocation2 + $0x24] sm:$0xf] %v1081_v56  ;;  %v800_v60 = vshrl.u32 %v3975_v47, 16  ;;  %v5343_v57 = vsel %vm1610_vm9, %v1785_v54, %v1789_v45  ;;  %v803_v7 = vshll.u32 %v3975_v47, 16  ;;  %v546_v10 = vmul.f32 %v4054_v24, %v5033_v12  ;;  %v4850_v11 = vld [vmem:[%s6350_s3 + $0x168] sm:$0xff]   ;;  %v4899_v38 = vld [vmem:[#allocation2 + $0x18] sm:$0xff]  }
  0x54   : > { %v1338_v6 = vld [vmem:[#allocation2 + $0xb4] sm:$0x1]  ;;  %2656 = vmatprep.mubr.bf16.mxu1 %v5343_v57  ;;  %v1636_v14 = vshrl.u32 %v5340_v62, 16  ;;  %v1638_v16 = vshll.u32 %v5340_v62, 16  ;;  %v789_v19 = vsel %vm5068_vm5, %v781_v42, %v788_v63  ;;  %v1085_v20 = vsel %vm5087_vm7, %v790_v0, %v1084_v58  ;;  %v1091_v23 = vld [vmem:[#allocation2 + $0x38] sm:$0x1]  ;;  %4453 = vmatprep.subr.bf16.mxu0 %v4850_v11 }
  0x55   : > { %4344 = vmatpush3.bf16.msra.mxu1 %v4830_v30  ;;  %v1339_v17 = vsel %vm5087_vm7, 0, %v1338_v6  ;;  %v1393_v18 = vld [vmem:[#allocation2 + $0xbc] sm:$0x1]  ;;  %1083 = vst [vmem:[#allocation2 + $0x28] sm:$0xf] %v789_v19  ;;  %v797_v21 = vor.u32 %v795_v61, %v794_v3  ;;  %v798_v22 = vrot.slane %v794_v3, 4  ;;  %v4058_v35 = vunpack.c.l.bf16 %v4193_v13 }
  0x56   : > { %4345 = vmatprep.subr.bf16.mxu1 %v4832_v44  ;;  %2657 = vmatmul.mubr.bf16.gmra.mrb[8].mxu1 %v5300_v1  ;;  %1340 = vst [vmem:[#allocation2 + $0xb4] sm:$0x1] %v1339_v17  ;;  %v1394_v12 = vsel %vm5118_vm8, 0, %v1393_v18  ;;  %v1640_v25 = vrot.slane %v1638_v16, 1  ;;  %1086 = vst [vmem:[#allocation2 + $0x2c] sm:$0x1] %v1085_v20  ;;  %v4059_v36 = vunpack.c.h.bf16 %v4193_v13 }
  0x57   : > { %1395 = vst [vmem:[#allocation2 + $0xbc] sm:$0x1] %v1394_v12  ;;  %v802_v26 = vrot.slane %v800_v60, 7  ;;  %v5369_v1 = vld [vmem:[%s6351_s4] ss:$0 sm:$0xff]  ;;  %v1088_v32 = vsel %vm5081_vm6, %v797_v21, %v1087_v4  ;;  %v1820_v34 = vrot.slane %v5160_v48, 1 }
  0x58   : > { %v547_v28 = vmul.f32 %v5369_v1, %v4055_v9  ;;  %v5375_v30 = vld [vmem:[%s6352_s5] ss:$0 sm:$0xff]  ;;  %1089 = vst [vmem:[#allocation2 + $0x30] sm:$0xf] %v1088_v32  ;;  %v4851_v41 = vld [vmem:[%s6350_s3 + $0x128] sm:$0xff]   ;;  %v1641_v42 = vor.u32 %v1640_v25, %v1636_v14  ;;  %v548_v47 = vmul.f32 %v5369_v1, %v4058_v35  ;;  %v5390_v48 = vld [vmem:[%s5021_s30 + $0x30] sm:$0xff]   ;;  %v549_v61 = vmul.f32 %v5369_v1, %v4059_v36 }
  0x59   : > { %4346 = vmatpush3.bf16.msra.mxu1 %v4833_v59  ;;  %v585_v24 = vadd.f32 %v5375_v30, %v546_v10  ;;  %v5378_v31 = vld [vmem:[#allocation2 + $0x20] ss:$0 sps:$4 sm:$0x11]   ;;  %v805_v37 = vor.u32 %v803_v7, %v802_v26  ;;  %v807_v39 = vrot.slane %v802_v26, 4  ;;  %4454 = vmatpush3.bf16.msra.mxu0 %v4851_v41  ;;  %v5402_v0 = vsel %vm1819_vm10, %v1820_v34, %v1821_v52  ;;  %v1094_v16 = vld [vmem:[#allocation2 + $0x3c] sm:$0xf] }
  0x5a   : > { %4555 = vmatprep.subr.bf16.mxu1 %v4836_v15  ;;  %v586_v40 = vadd.f32 %v5375_v30, %v547_v28  ;;  %v1643_v44 = vshll.u32 %v5378_v31, 16  ;;  %v1302_v45 = vld [vmem:[#allocation2 + $0x24] sm:$0x1]  ;;  %v587_v60 = vadd.f32 %v5375_v30, %v548_v47  ;;  %v588_v15 = vadd.f32 %v5375_v30, %v549_v61 }
  0x5b   : > { %v617_v46 = vmax.f32 %v585_v24, 0.0  ;;  %v1303_v49 = vsel %vm5087_vm7, 0, %v1302_v45  ;;  %v806_v51 = vsel %vm5068_vm5, %v798_v22, %v805_v37  ;;  %v1092_v54 = vsel %vm5087_vm7, %v807_v39, %v1091_v23  ;;  %v1098_v23 = vld [vmem:[#allocation2 + $0x44] sm:$0x1] }
  0x5c   : > { %v618_v56 = vmax.f32 %v586_v40, 0.0  ;;  %v1645_v58 = vrot.slane %v1643_v44, 1  ;;  %1304 = vst [vmem:[#allocation2 + $0x24] sm:$0x1] %v1303_v49  ;;  %1090 = vst [vmem:[#allocation2 + $0x34] sm:$0xf] %v806_v51  ;;  %v4062_v9 = vunpack.c.l.bf16 %v5390_v48  ;;  %v4063_v45 = vunpack.c.h.bf16 %v5390_v48 }
  0x5d   : > { %1093 = vst [vmem:[#allocation2 + $0x38] sm:$0x1] %v1092_v54  ;;  %v3976_v59 = vpack.c.bf16 %v617_v46, %v617_v46  ;;  %v4824_v63 = vld [vmem:[#allocation2 + $0xb4] sm:$0xff]   ;;  %v1357_v53 = vld [vmem:[#allocation2 + $0x2c] sm:$0x1]  ;;  %v619_v25 = vmax.f32 %v587_v60, 0.0 }
  0x5e   : > { %v3977_v3 = vpack.c.bf16 %v618_v56, %v618_v56  ;;  %v5406_v4 = vsel %vm1610_vm9, %v1641_v42, %v1645_v58  ;;  %v4825_v6 = vld [vmem:[#allocation2 + $0xbc] ss:$0 sps:$4 sm:$0x11]   ;;  %v1792_v10 = vshrl.u32 %v4824_v63, 16  ;;  %v1794_v13 = vshll.u32 %v4824_v63, 16 }
  0x5f   : > { %v809_v7 = vshrl.u32 %v3976_v59, 16  ;;  %2560 = vmatprep.mubr.bf16.mxu0 %v5406_v4  ;;  %v812_v14 = vshll.u32 %v3976_v59, 16  ;;  %v1799_v17 = vshll.u32 %v4825_v6, 16  ;;  %v1358_v18 = vsel %vm5118_vm8, 0, %v1357_v53  ;;  %v1305_v19 = vld [vmem:[#allocation2 + $0x30] sm:$0x1] }
  0x60   : > { %v817_v52 = vshrl.u32 %v3977_v3, 16  ;;  %2561 = vmatmul.mubr.bf16.gmra.mrb[8].mxu0 %v5340_v62  ;;  %v820_v12 = vshll.u32 %v3977_v3, 16  ;;  %v1796_v20 = vrot.slane %v1794_v13, 1  ;;  %1359 = vst [vmem:[#allocation2 + $0x2c] sm:$0x1] %v1358_v18  ;;  %v1306_v21 = vsel %vm5087_vm7, 0, %v1305_v19 }
  0x61   : > { %v811_v11 = vrot.slane %v809_v7, 7  ;;  %v1801_v26 = vrot.slane %v1799_v17, 1  ;;  %1307 = vst [vmem:[#allocation2 + $0x30] sm:$0x1] %v1306_v21  ;;  %v620_v32 = vmax.f32 %v588_v15, 0.0  ;;  %v3978_v40 = vpack.c.bf16 %v619_v25, %v619_v25  ;;  %v4195_v46 = vld [vmem:[%s5021_s30 + $0x38] sm:$0xff]  }
  0x62   : > { %v819_v22 = vrot.slane %v817_v52, 7  ;;  %v1797_v34 = vor.u32 %v1796_v20, %v1792_v10  ;;  %v1823_v3 = vrot.slane %v5240_v5, 1  ;;  %v1101_v6 = vld [vmem:[#allocation2 + $0x48] sm:$0xf]  ;;  %v550_v7 = vmul.f32 %v5369_v1, %v4062_v9  ;;  %v1105_v13 = vld [vmem:[#allocation2 + $0x50] sm:$0x1] }
  0x63   : > { %v814_v28 = vor.u32 %v812_v14, %v811_v11  ;;  %v815_v24 = vrot.slane %v811_v11, 4  ;;  %v5416_v35 = vld [vmem:[#allocation2 + $0x24] sm:$0xff]   ;;  %v3979_v44 = vpack.c.bf16 %v620_v32, %v620_v32  ;;  %v826_v48 = vshrl.u32 %v3978_v40, 16  ;;  %v4858_v9 = vld [vmem:[%s6350_s3 + $0x170] sm:$0xff]  }
  0x64   : > { %v1360_v36 = vld [vmem:[#allocation2 + $0x38] sm:$0x1]  ;;  %v822_v37 = vor.u32 %v820_v12, %v819_v22  ;;  %v824_v39 = vrot.slane %v819_v22, 4  ;;  %v5425_v47 = vsel %vm1610_vm9, %v1797_v34, %v1801_v26  ;;  %v1648_v49 = vshrl.u32 %v5416_v35, 16  ;;  %v4837_v11 = vld [vmem:[%s6350_s3 + $0x180] sm:$0xff]   ;;  %v4845_v26 = vld [vmem:[%s6350_s3 + $0x1c8] sm:$0xff]   ;;  %4455 = vmatprep.subr.bf16.mxu0 %v4858_v9 }
  0x65   : > { %v1361_v41 = vsel %vm5118_vm8, 0, %v1360_v36  ;;  %v1095_v42 = vsel %vm5081_vm6, %v814_v28, %v1094_v16  ;;  %v1650_v51 = vshll.u32 %v5416_v35, 16  ;;  %2664 = vmatprep.mubr.bf16.mxu1 %v5425_v47  ;;  %v829_v58 = vshll.u32 %v3978_v40, 16  ;;  %v4859_v28 = vld [vmem:[%s6350_s3 + $0x130] sm:$0xff]   ;;  %v4900_v55 = vld [vmem:[#allocation2 + $0x24] sm:$0xff]  }
  0x66   : > { %1362 = vst [vmem:[#allocation2 + $0x38] sm:$0x1] %v1361_v41  ;;  %v823_v54 = vsel %vm5068_vm5, %v815_v24, %v822_v37  ;;  %1096 = vst [vmem:[#allocation2 + $0x3c] sm:$0xf] %v1095_v42  ;;  %v1099_v56 = vsel %vm5087_vm7, %v824_v39, %v1098_v23  ;;  %v834_v59 = vshrl.u32 %v3979_v44, 16  ;;  %2665 = vmatmul.mubr.bf16.gmra.mrb[12].mxu1 %v4824_v63  ;;  %v837_v60 = vshll.u32 %v3979_v44, 16 }
  0x67   : > { %1097 = vst [vmem:[#allocation2 + $0x40] sm:$0xf] %v823_v54  ;;  %v1652_v61 = vrot.slane %v1650_v51, 1  ;;  %1100 = vst [vmem:[#allocation2 + $0x44] sm:$0x1] %v1099_v56  ;;  %2705 = vmatprep.mubr.bf16.mxu1 %v5240_v5  ;;  %v828_v10 = vrot.slane %v826_v48, 7  ;;  %v551_v53 = vmul.f32 %v5369_v1, %v4063_v45  ;;  %v4066_v14 = vunpack.c.l.bf16 %v4195_v46  ;;  %4456 = vmatpush3.bf16.msra.mxu0 %v4859_v28 }
  0x68   : > { %v5436_v15 = vld [vmem:[#allocation2 + $0x2c] ss:$0 sps:$4 sm:$0x11]   ;;  %v4067_v52 = vunpack.c.h.bf16 %v4195_v46  ;;  %v5440_v17 = vld [vmem:[#allocation2 + $0x30] sm:$0xff]   ;;  %v1824_v63 = vrot.slane %v5260_v27, 1  ;;  %v836_v18 = vrot.slane %v834_v59, 7  ;;  %v589_v19 = vadd.f32 %v5375_v30, %v550_v7 }
  0x69   : > { %v1653_v16 = vor.u32 %v1652_v61, %v1648_v49  ;;  %v1655_v5 = vshll.u32 %v5436_v15, 16  ;;  %v831_v12 = vor.u32 %v829_v58, %v828_v10  ;;  %v832_v20 = vrot.slane %v828_v10, 4  ;;  %v4847_v59 = vld [vmem:[%s6350_s3 + $0x188] sm:$0xff]   ;;  %v5493_v10 = vld [vmem:[%s5021_s30 + $0x40] sm:$0xff]  }
  0x6a   : > { %v590_v21 = vadd.f32 %v5375_v30, %v551_v53  ;;  %v1660_v22 = vshrl.u32 %v5440_v17, 16  ;;  %v1662_v27 = vshll.u32 %v5440_v17, 16  ;;  %v839_v23 = vor.u32 %v837_v60, %v836_v18  ;;  %v4854_v60 = vld [vmem:[%s6350_s3 + $0x1d0] sm:$0xff]  }
  0x6b   : > { %v841_v25 = vrot.slane %v836_v18, 4  ;;  %v1657_v24 = vrot.slane %v1655_v5, 1  ;;  %v1102_v34 = vsel %vm5081_vm6, %v831_v12, %v1101_v6  ;;  %v552_v36 = vmul.f32 %v5369_v1, %v4066_v14  ;;  %v4864_v5 = vld [vmem:[%s6350_s3 + $0x178] sm:$0xff]  }
  0x6c   : > { %v553_v37 = vmul.f32 %v5369_v1, %v4067_v52  ;;  %v1664_v39 = vrot.slane %v1662_v27, 1  ;;  %v840_v41 = vsel %vm5068_vm5, %v832_v20, %v839_v23  ;;  %1103 = vst [vmem:[#allocation2 + $0x48] sm:$0xf] %v1102_v34  ;;  %v621_v44 = vmax.f32 %v589_v19, 0.0  ;;  %v1108_v19 = vld [vmem:[#allocation2 + $0x54] sm:$0xf]  ;;  %4457 = vmatprep.subr.bf16.mxu0 %v4864_v5 }
  0x6d   : > { %v5460_v32 = vld [vmem:[#allocation2 + $0x38] ss:$0 sps:$4 sm:$0x11]   ;;  %v1308_v40 = vld [vmem:[#allocation2 + $0x3c] sm:$0x1]  ;;  %v1106_v42 = vsel %vm5087_vm7, %v841_v25, %v1105_v13  ;;  %v5471_v45 = vsel %vm1610_vm9, %v1653_v16, %v1657_v24  ;;  %v622_v54 = vmax.f32 %v590_v21, 0.0  ;;  %v5481_v58 = vsel %vm1819_vm10, %v1823_v3, %v1824_v63 }
  0x6e   : > { %v1667_v46 = vshll.u32 %v5460_v32, 16  ;;  %v1309_v49 = vsel %vm5087_vm7, 0, %v1308_v40  ;;  %v1363_v51 = vld [vmem:[#allocation2 + $0x44] sm:$0x1]  ;;  %1104 = vst [vmem:[#allocation2 + $0x4c] sm:$0xf] %v840_v41  ;;  %2568 = vmatprep.mubr.bf16.mxu0 %v5471_v45  ;;  %v1665_v56 = vor.u32 %v1664_v39, %v1660_v22  ;;  %2706 = vmatmul.mubr.bf16.vlgmr.msra.gmra.mrb[16].mxu1 %v5402_v0  ;;  %v3980_v61 = vpack.c.bf16 %v621_v44, %v621_v44 }
  0x6f   : > { %1107 = vst [vmem:[#allocation2 + $0x50] sm:$0x1] %v1106_v42  ;;  %1310 = vst [vmem:[#allocation2 + $0x3c] sm:$0x1] %v1309_v49  ;;  %v1364_v48 = vsel %vm5118_vm8, 0, %v1363_v51  ;;  %2569 = vmatmul.mubr.bf16.gmra.mrb[12].mxu0 %v5416_v35  ;;  %4556 = vmatpush3.bf16.msra.mxu1 %v4837_v11  ;;  %v3981_v0 = vpack.c.bf16 %v622_v54, %v622_v54  ;;  %v591_v7 = vadd.f32 %v5375_v30, %v552_v36  ;;  %v4865_v27 = vld [vmem:[%s6350_s3 + $0x138] sm:$0xff]  }
  0x70   : > { %v1669_v6 = vrot.slane %v1667_v46, 1  ;;  %1365 = vst [vmem:[#allocation2 + $0x44] sm:$0x1] %v1364_v48  ;;  %v592_v3 = vadd.f32 %v5375_v30, %v553_v37  ;;  %2713 = vmatprep.mubr.bf16.mxu1 %v5340_v62  ;;  %v1826_v13 = vrot.slane %v5340_v62, 1  ;;  %v1827_v53 = vrot.slane %v5378_v31, 1  ;;  %4557 = vmatprep.subr.bf16.mxu1 %v4845_v26  ;;  %v4855_v24 = vld [vmem:[%s6350_s3 + $0x190] sm:$0xff]  }
  0x71   : > { %v843_v14 = vshrl.u32 %v3980_v61, 16  ;;  %v846_v52 = vshll.u32 %v3980_v61, 16  ;;  %v851_v63 = vshrl.u32 %v3981_v0, 16  ;;  %v854_v18 = vshll.u32 %v3981_v0, 16  ;;  %v1112_v12 = vld [vmem:[#allocation2 + $0x5c] sm:$0x1]  ;;  %4458 = vmatpush3.bf16.msra.mxu0 %v4865_v27 }
  0x72   : > { %v5499_v16 = vsel %vm1610_vm9, %v1665_v56, %v1669_v6  ;;  %v623_v9 = vmax.f32 %v591_v7, 0.0  ;;  %v1829_v20 = vrot.slane %v5416_v35, 1  ;;  %v624_v21 = vmax.f32 %v592_v3, 0.0  ;;  %v4862_v36 = vld [vmem:[%s6350_s3 + $0x1d8] sm:$0xff]   ;;  %v5531_v61 = vld [vmem:[%s5021_s30 + $0x48] sm:$0xff]  }
  0x73   : > { %2576 = vmatprep.mubr.bf16.mxu0 %v5499_v16  ;;  %v845_v11 = vrot.slane %v843_v14, 7  ;;  %v4070_v22 = vunpack.c.l.bf16 %v5493_v10  ;;  %v1311_v23 = vld [vmem:[#allocation2 + $0x48] sm:$0x1]  ;;  %4558 = vmatpush3.bf16.msra.mxu1 %v4847_v59  ;;  %v853_v25 = vrot.slane %v851_v63, 7  ;;  %v1830_v26 = vrot.slane %v5436_v15, 1 }
  0x74   : > { %v3982_v28 = vpack.c.bf16 %v623_v9, %v623_v9  ;;  %v4071_v34 = vunpack.c.h.bf16 %v5493_v10  ;;  %v1312_v37 = vsel %vm5087_vm7, 0, %v1311_v23  ;;  %v3983_v15 = vpack.c.bf16 %v624_v21, %v624_v21  ;;  %4559 = vmatprep.subr.bf16.mxu1 %v4854_v60  ;;  %v4863_v60 = vld [vmem:[%s6350_s3 + $0x198] sm:$0xff]   ;;  %v1115_v10 = vld [vmem:[#allocation2 + $0x60] sm:$0xf]  ;;  %v1119_v5 = vld [vmem:[#allocation2 + $0x68] sm:$0x1] }
  0x75   : > { %v848_v40 = vor.u32 %v846_v52, %v845_v11  ;;  %v849_v41 = vrot.slane %v845_v11, 4  ;;  %1313 = vst [vmem:[#allocation2 + $0x48] sm:$0x1] %v1312_v37  ;;  %v856_v46 = vor.u32 %v854_v18, %v853_v25  ;;  %v858_v49 = vrot.slane %v853_v25, 4  ;;  %v4868_v25 = vld [vmem:[%s6350_s3 + $0x1e0] sm:$0xff]  }
  0x76   : > { %v1366_v39 = vld [vmem:[#allocation2 + $0x50] sm:$0x1]  ;;  %v5520_v42 = vld [vmem:[#allocation2 + $0x3c] sm:$0xff]   ;;  %v860_v51 = vshrl.u32 %v3982_v28, 16  ;;  %2714 = vmatmul.mubr.bf16.gmra.mrb[20].mxu1 %v5481_v58  ;;  %v863_v48 = vshll.u32 %v3982_v28, 16  ;;  %v554_v59 = vmul.f32 %v5369_v1, %v4070_v22  ;;  %v868_v63 = vshrl.u32 %v3983_v15, 16 }
  0x77   : > { %v1367_v44 = vsel %vm5118_vm8, 0, %v1366_v39  ;;  %v5524_v54 = vld [vmem:[#allocation2 + $0x44] ss:$0 sps:$4 sm:$0x11]   ;;  %v1109_v56 = vsel %vm5081_vm6, %v848_v40, %v1108_v19  ;;  %2577 = vmatmul.mubr.bf16.gmra.mrb[16].mxu0 %v5440_v17  ;;  %v1672_v6 = vshrl.u32 %v5520_v42, 16  ;;  %v1674_v0 = vshll.u32 %v5520_v42, 16  ;;  %2721 = vmatprep.mubr.bf16.mxu1 %v5416_v35 }
  0x78   : > { %1368 = vst [vmem:[#allocation2 + $0x50] sm:$0x1] %v1367_v44  ;;  %v857_v7 = vsel %vm5068_vm5, %v849_v41, %v856_v46  ;;  %1110 = vst [vmem:[#allocation2 + $0x54] sm:$0xf] %v1109_v56  ;;  %v1113_v3 = vsel %vm5087_vm7, %v858_v49, %v1112_v12  ;;  %v1679_v14 = vshll.u32 %v5524_v54, 16  ;;  %v862_v52 = vrot.slane %v860_v51, 7  ;;  %4560 = vmatpush3.bf16.msra.mxu1 %v4855_v24 }
  0x79   : > { %1111 = vst [vmem:[#allocation2 + $0x58] sm:$0xf] %v857_v7  ;;  %1114 = vst [vmem:[#allocation2 + $0x5c] sm:$0x1] %v1113_v3  ;;  %v871_v18 = vshll.u32 %v3983_v15, 16  ;;  %v1676_v19 = vrot.slane %v1674_v0, 1  ;;  %v5550_v9 = vsel %vm1819_vm10, %v1826_v13, %v1827_v53  ;;  %v555_v11 = vmul.f32 %v5369_v1, %v4071_v34  ;;  %4561 = vmatprep.subr.bf16.mxu1 %v4862_v36 }
  0x7a   : > { %v593_v12 = vadd.f32 %v5375_v30, %v554_v59  ;;  %v1681_v21 = vrot.slane %v1679_v14, 1  ;;  %v865_v22 = vor.u32 %v863_v48, %v862_v52  ;;  %v866_v27 = vrot.slane %v862_v52, 4  ;;  %v5583_v51 = vld [vmem:[%s5021_s30 + $0x50] sm:$0xff]  }
  0x7b   : > { %v870_v23 = vrot.slane %v868_v63, 7  ;;  %v1677_v31 = vor.u32 %v1676_v19, %v1672_v6  ;;  %v594_v62 = vadd.f32 %v5375_v30, %v555_v11  ;;  %v4074_v13 = vunpack.c.l.bf16 %v5531_v61  ;;  %v1122_v63 = vld [vmem:[#allocation2 + $0x6c] sm:$0xf]  ;;  %v5597_v19 = vld [vmem:[%s6350_s3 + $0x200] sm:$0xff]  }
  0x7c   : > { %v625_v28 = vmax.f32 %v593_v12, 0.0  ;;  %v5559_v53 = vld [vmem:[#allocation2 + $0x48] sm:$0xff]   ;;  %v5564_v24 = vsel %vm1819_vm10, %v1829_v20, %v1830_v26  ;;  %v1116_v37 = vsel %vm5081_vm6, %v865_v22, %v1115_v10  ;;  %4562 = vmatpush3.bf16.msra.mxu1 %v4863_v60  ;;  %v4075_v35 = vunpack.c.h.bf16 %v5531_v61  ;;  %4691 = vmatprep.subr.bf16.mxu0 %v5597_v19 }
  0x7d   : > { %v873_v34 = vor.u32 %v871_v18, %v870_v23  ;;  %v875_v36 = vrot.slane %v870_v23, 4  ;;  %v5569_v39 = vsel %vm1610_vm9, %v1677_v31, %v1681_v21  ;;  %1117 = vst [vmem:[#allocation2 + $0x60] sm:$0xf] %v1116_v37  ;;  %v626_v41 = vmax.f32 %v594_v62, 0.0  ;;  %4563 = vmatprep.subr.bf16.mxu1 %v4868_v25  ;;  %v1126_v21 = vld [vmem:[#allocation2 + $0x74] sm:$0x1] }
  0x7e   : > { %v3984_v15 = vpack.c.bf16 %v625_v28, %v625_v28  ;;  %2584 = vmatprep.mubr.bf16.mxu0 %v5569_v39  ;;  %v1684_v20 = vshrl.u32 %v5559_v53, 16  ;;  %v1686_v26 = vshll.u32 %v5559_v53, 16  ;;  %2722 = vmatmul.mubr.bf16.gmra.mrb[24].mxu1 %v5550_v9  ;;  %v556_v60 = vmul.f32 %v5369_v1, %v4074_v13 }
  0x7f   : > { %v5571_v40 = vld [vmem:[#allocation2 + $0x50] ss:$0 sps:$4 sm:$0x11]   ;;  %v1314_v44 = vld [vmem:[#allocation2 + $0x54] sm:$0x1]  ;;  %v874_v46 = vsel %vm5068_vm5, %v866_v27, %v873_v34  ;;  %v1120_v49 = vsel %vm5087_vm7, %v875_v36, %v1119_v5  ;;  %2585 = vmatmul.mubr.bf16.gmra.mrb[20].mxu0 %v5520_v42  ;;  %2729 = vmatprep.mubr.bf16.mxu1 %v5440_v17  ;;  %v3985_v61 = vpack.c.bf16 %v626_v41, %v626_v41  ;;  %v1832_v11 = vrot.slane %v5440_v17, 1 }
  0x80   : > { %v1691_v56 = vshll.u32 %v5571_v40, 16  ;;  %v1315_v48 = vsel %vm5087_vm7, 0, %v1314_v44  ;;  %v1369_v59 = vld [vmem:[#allocation2 + $0x5c] sm:$0x1]  ;;  %1118 = vst [vmem:[#allocation2 + $0x64] sm:$0xf] %v874_v46  ;;  %v557_v18 = vmul.f32 %v5369_v1, %v4075_v35  ;;  %v595_v22 = vadd.f32 %v5375_v30, %v556_v60 }
  0x81   : > { %1121 = vst [vmem:[#allocation2 + $0x68] sm:$0x1] %v1120_v49  ;;  %v1688_v6 = vrot.slane %v1686_v26, 1  ;;  %1316 = vst [vmem:[#allocation2 + $0x54] sm:$0x1] %v1315_v48  ;;  %v1370_v0 = vsel %vm5118_vm8, 0, %v1369_v59  ;;  %v4078_v31 = vunpack.c.l.bf16 %v5583_v51  ;;  %v4079_v46 = vunpack.c.h.bf16 %v5583_v51 }
  0x82   : > { %v877_v7 = vshrl.u32 %v3984_v15, 16  ;;  %v880_v3 = vshll.u32 %v3984_v15, 16  ;;  %v1693_v10 = vrot.slane %v1691_v56, 1  ;;  %1371 = vst [vmem:[#allocation2 + $0x5c] sm:$0x1] %v1370_v0  ;;  %v885_v14 = vshrl.u32 %v3985_v61, 16 }
  0x83   : > { %v888_v52 = vshll.u32 %v3985_v61, 16  ;;  %v1689_v5 = vor.u32 %v1688_v6, %v1684_v20  ;;  %v1833_v27 = vrot.slane %v5460_v32, 1  ;;  %v596_v25 = vadd.f32 %v5375_v30, %v557_v18  ;;  %v4870_v36 = vld [vmem:[%s6350_s3 + $0x1a0] sm:$0xff]   ;;  %v4871_v35 = vld [vmem:[%s6350_s3 + $0x1e8] sm:$0xff]  }
  0x84   : > { %v879_v12 = vrot.slane %v877_v7, 7  ;;  %v887_v23 = vrot.slane %v885_v14, 7  ;;  %v1317_v28 = vld [vmem:[#allocation2 + $0x60] sm:$0x1]  ;;  %v627_v17 = vmax.f32 %v595_v22, 0.0  ;;  %v558_v6 = vmul.f32 %v5369_v1, %v4078_v31  ;;  %4564 = vmatpush3.bf16.msra.mxu1 %v4870_v36  ;;  %v4873_v22 = vld [vmem:[%s6350_s3 + $0x1a8] sm:$0xff]  }
  0x85   : > { %v5606_v62 = vsel %vm1610_vm9, %v1689_v5, %v1693_v10  ;;  %v1318_v32 = vsel %vm5087_vm7, 0, %v1317_v28  ;;  %v628_v15 = vmax.f32 %v596_v25, 0.0  ;;  %v559_v0 = vmul.f32 %v5369_v1, %v4079_v46  ;;  %4565 = vmatprep.subr.bf16.mxu1 %v4871_v35 }
  0x86   : > { %v882_v13 = vor.u32 %v880_v3, %v879_v12  ;;  %v883_v34 = vrot.slane %v879_v12, 4  ;;  %2592 = vmatprep.mubr.bf16.mxu0 %v5606_v62  ;;  %v890_v37 = vor.u32 %v888_v52, %v887_v23  ;;  %v892_v41 = vrot.slane %v887_v23, 4  ;;  %2730 = vmatmul.mubr.bf16.gmra.mrb[28].mxu1 %v5564_v24  ;;  %1319 = vst [vmem:[#allocation2 + $0x60] sm:$0x1] %v1318_v32  ;;  %v1129_v52 = vld [vmem:[#allocation2 + $0x78] sm:$0xf] }
  0x87   : > { %v3986_v44 = vpack.c.bf16 %v627_v17, %v627_v17  ;;  %2593 = vmatmul.mubr.bf16.gmra.mrb[24].mxu0 %v5559_v53  ;;  %2737 = vmatprep.mubr.bf16.mxu1 %v5520_v42  ;;  %v3987_v61 = vpack.c.bf16 %v628_v15, %v628_v15  ;;  %v1133_v12 = vld [vmem:[#allocation2 + $0x80] sm:$0x1]  ;;  %v5643_v25 = vsel %vm1819_vm10, %v1832_v11, %v1833_v27  ;;  %v4876_v11 = vld [vmem:[%s6350_s3 + $0x1b0] sm:$0xff]  }
  0x88   : > { %v1372_v20 = vld [vmem:[#allocation2 + $0x68] sm:$0x1]  ;;  %v1123_v26 = vsel %vm5081_vm6, %v882_v13, %v1122_v63  ;;  %v5622_v49 = vld [vmem:[#allocation2 + $0x54] sm:$0xff]   ;;  %v891_v48 = vsel %vm5068_vm5, %v883_v34, %v890_v37  ;;  %v1127_v59 = vsel %vm5087_vm7, %v892_v41, %v1126_v21  ;;  %v597_v21 = vadd.f32 %v5375_v30, %v558_v6  ;;  %4566 = vmatpush3.bf16.msra.mxu1 %v4873_v22 }
  0x89   : > { %v1373_v56 = vsel %vm5118_vm8, 0, %v1372_v20  ;;  %1124 = vst [vmem:[#allocation2 + $0x6c] sm:$0xf] %v1123_v26  ;;  %v5631_v60 = vld [vmem:[#allocation2 + $0x5c] ss:$0 sps:$4 sm:$0x11]   ;;  %v598_v28 = vadd.f32 %v5375_v30, %v559_v0 }
  0x8a   : > { %1374 = vst [vmem:[#allocation2 + $0x68] sm:$0x1] %v1373_v56  ;;  %1125 = vst [vmem:[#allocation2 + $0x70] sm:$0xf] %v891_v48  ;;  %v894_v51 = vshrl.u32 %v3986_v44, 16  ;;  %v1696_v7 = vshrl.u32 %v5622_v49, 16 }
  0x8b   : > { %1128 = vst [vmem:[#allocation2 + $0x74] sm:$0x1] %v1127_v59  ;;  %v1698_v3 = vshll.u32 %v5622_v49, 16  ;;  %v897_v10 = vshll.u32 %v3986_v44, 16  ;;  %v902_v14 = vshrl.u32 %v3987_v61, 16  ;;  %v1703_v63 = vshll.u32 %v5631_v60, 16 }
  0x8c   : > { %v896_v18 = vrot.slane %v894_v51, 7  ;;  %v905_v5 = vshll.u32 %v3987_v61, 16  ;;  %v4874_v13 = vld [vmem:[%s6350_s3 + $0x1f0] sm:$0xff]   ;;  %v629_v32 = vmax.f32 %v597_v21, 0.0  ;;  %v630_v20 = vmax.f32 %v598_v28, 0.0 }
  0x8d   : > { %v1700_v23 = vrot.slane %v1698_v3, 1  ;;  %v904_v31 = vrot.slane %v902_v14, 7  ;;  %v1705_v34 = vrot.slane %v1703_v63, 1  ;;  %v5649_v41 = vld [vmem:[#allocation2 + $0x60] sm:$0xff]   ;;  %4567 = vmatprep.subr.bf16.mxu1 %v4874_v13  ;;  %v1835_v26 = vrot.slane %v5520_v42, 1 }
  0x8e   : > { %v899_v17 = vor.u32 %v897_v10, %v896_v18  ;;  %v900_v36 = vrot.slane %v896_v18, 4  ;;  %2738 = vmatmul.mubr.bf16.gmra.mrb[32].mxu1 %v5643_v25  ;;  %v1836_v44 = vrot.slane %v5524_v54, 1  ;;  %v3988_v56 = vpack.c.bf16 %v629_v32, %v629_v32 }
  0x8f   : > { %v1701_v37 = vor.u32 %v1700_v23, %v1696_v7  ;;  %v907_v15 = vor.u32 %v905_v5, %v904_v31  ;;  %v909_v35 = vrot.slane %v904_v31, 4  ;;  %v1708_v61 = vshrl.u32 %v5649_v41, 16  ;;  %2745 = vmatprep.mubr.bf16.mxu1 %v5559_v53  ;;  %4568 = vmatpush3.bf16.msra.mxu1 %v4876_v11  ;;  %v1136_v31 = vld [vmem:[#allocation2 + $0x84] sm:$0xf] }
  0x90   : > { %v1320_v27 = vld [vmem:[#allocation2 + $0x6c] sm:$0x1]  ;;  %v1130_v46 = vsel %vm5081_vm6, %v899_v17, %v1129_v52  ;;  %v1710_v6 = vshll.u32 %v5649_v41, 16  ;;  %v3989_v3 = vpack.c.bf16 %v630_v20, %v630_v20  ;;  %v911_v52 = vshrl.u32 %v3988_v56, 16  ;;  %v4877_v17 = vld [vmem:[%s6350_s3 + $0x1f8] sm:$0xff]  }
  0x91   : > { %v5660_v48 = vsel %vm1610_vm9, %v1701_v37, %v1705_v34  ;;  %v5662_v59 = vld [vmem:[#allocation2 + $0x68] ss:$0 sps:$4 sm:$0x11]   ;;  %v908_v51 = vsel %vm5068_vm5, %v900_v36, %v907_v15  ;;  %1131 = vst [vmem:[#allocation2 + $0x78] sm:$0xf] %v1130_v46  ;;  %v1134_v54 = vsel %vm5087_vm7, %v909_v35, %v1133_v12  ;;  %v1321_v0 = vsel %vm5087_vm7, 0, %v1320_v27  ;;  %4569 = vmatprep.subr.bf16.mxu1 %v4877_v17 }
  0x92   : > { %2600 = vmatprep.mubr.bf16.mxu0 %v5660_v48  ;;  %v1375_v7 = vld [vmem:[#allocation2 + $0x74] sm:$0x1]  ;;  %1132 = vst [vmem:[#allocation2 + $0x7c] sm:$0xf] %v908_v51  ;;  %1135 = vst [vmem:[#allocation2 + $0x80] sm:$0x1] %v1134_v54  ;;  %v5679_v22 = vsel %vm1819_vm10, %v1835_v26, %v1836_v44 }
  0x93   : > { %2601 = vmatmul.mubr.bf16.gmra.mrb[28].mxu0 %v5622_v49  ;;  %v1715_v10 = vshll.u32 %v5662_v59, 16  ;;  %1322 = vst [vmem:[#allocation2 + $0x6c] sm:$0x1] %v1321_v0  ;;  %v1376_v14 = vsel %vm5118_vm8, 0, %v1375_v7  ;;  %v914_v63 = vshll.u32 %v3988_v56, 16  ;;  %v1712_v18 = vrot.slane %v1710_v6, 1 }
  0x94   : > { %1377 = vst [vmem:[#allocation2 + $0x74] sm:$0x1] %v1376_v14  ;;  %v919_v5 = vshrl.u32 %v3989_v3, 16  ;;  %v922_v12 = vshll.u32 %v3989_v3, 16  ;;  %v913_v23 = vrot.slane %v911_v52, 7  ;;  %v1838_v36 = vrot.slane %v5559_v53, 1 }
  0x95   : > { %v1717_v21 = vrot.slane %v1715_v10, 1  ;;  %v1713_v28 = vor.u32 %v1712_v18, %v1708_v61  ;;  %v1140_v34 = vld [vmem:[#allocation2 + $0x8c] sm:$0x1]  ;;  %v4879_v27 = vld [vmem:[%s6350_s3 + $0x1b8] sm:$0xff]   ;;  %v1839_v46 = vrot.slane %v5571_v40, 1 }
  0x96   : > { %v921_v13 = vrot.slane %v919_v5, 7  ;;  %v916_v32 = vor.u32 %v914_v63, %v913_v23  ;;  %v917_v37 = vrot.slane %v913_v23, 4  ;;  %2746 = vmatmul.mubr.bf16.gmra.mrb[36].mxu1 %v5679_v22  ;;  %v4203_v0 = vld [vmem:[%s5021_s30 + $0x78] sm:$0xff]  }
  0x97   : > { %v5686_v15 = vsel %vm1610_vm9, %v1713_v28, %v1717_v21  ;;  %2753 = vmatprep.mubr.bf16.mxu1 %v5622_v49  ;;  %4570 = vmatpush3.bf16.msra.mxu1 %v4879_v27  ;;  %v4098_v7 = vunpack.c.l.bf16 %v4203_v0  ;;  %v4099_v3 = vunpack.c.h.bf16 %v4203_v0  ;;  %v5715_v63 = vsel %vm1819_vm10, %v1838_v36, %v1839_v46 }
  0x98   : > { %v1323_v35 = vld [vmem:[#allocation2 + $0x78] sm:$0x1]  ;;  %v924_v20 = vor.u32 %v922_v12, %v921_v13  ;;  %v926_v11 = vrot.slane %v921_v13, 4  ;;  %2608 = vmatprep.mubr.bf16.mxu0 %v5686_v15  ;;  %v1137_v56 = vsel %vm5081_vm6, %v916_v32, %v1136_v31  ;;  %v1841_v21 = vrot.slane %v5622_v49, 1 }
  0x99   : > { %v1324_v26 = vsel %vm5087_vm7, 0, %v1323_v35  ;;  %v1378_v44 = vld [vmem:[#allocation2 + $0x80] sm:$0x1]  ;;  %1138 = vst [vmem:[#allocation2 + $0x84] sm:$0xf] %v1137_v56  ;;  %v568_v18 = vmul.f32 %v5369_v1, %v4098_v7  ;;  %v569_v5 = vmul.f32 %v5369_v1, %v4099_v3  ;;  %v1842_v31 = vrot.slane %v5631_v60, 1 }
  0x9a   : > { %v5699_v61 = vld [vmem:[#allocation2 + $0x6c] sm:$0xff]   ;;  %1325 = vst [vmem:[#allocation2 + $0x78] sm:$0x1] %v1324_v26  ;;  %v1379_v51 = vsel %vm5118_vm8, 0, %v1378_v44  ;;  %v925_v54 = vsel %vm5068_vm5, %v917_v37, %v924_v20  ;;  %v1141_v6 = vsel %vm5087_vm7, %v926_v11, %v1140_v34  ;;  %v4890_v1 = vld [vmem:[%s6352_s5] ss:$0 sm:$0xff] }
  0x9b   : > { %2609 = vmatmul.mubr.bf16.gmra.mrb[32].mxu0 %v5649_v41  ;;  %v5709_v40 = vld [vmem:[#allocation2 + $0x74] ss:$0 sps:$4 sm:$0x11]   ;;  %1380 = vst [vmem:[#allocation2 + $0x80] sm:$0x1] %v1379_v51  ;;  %v1720_v10 = vshrl.u32 %v5699_v61, 16  ;;  %v607_v28 = vadd.f32 %v5375_v30, %v568_v18  ;;  %v608_v36 = vadd.f32 %v4890_v1, %v569_v5  ;;  %v5744_v46 = vsel %vm1819_vm10, %v1841_v21, %v1842_v31 }
  0x9c   : > { %1139 = vst [vmem:[#allocation2 + $0x88] sm:$0xf] %v925_v54  ;;  %1142 = vst [vmem:[#allocation2 + $0x8c] sm:$0x1] %v1141_v6  ;;  %v1722_v14 = vshll.u32 %v5699_v61, 16  ;;  %v1727_v52 = vshll.u32 %v5709_v40, 16 }
  0x9d   : > { %v639_v32 = vmax.f32 %v607_v28, 0.0  ;;  %v640_v51 = vmax.f32 %v608_v36, 0.0  ;;  %v1171_v18 = vld [vmem:[#allocation2 + $0xc0] sm:$0xf]  ;;  %v1175_v1 = vld [vmem:[#allocation2 + $0xc8] sm:$0x1] }
  0x9e   : > { %v1724_v12 = vrot.slane %v1722_v14, 1  ;;  %v1729_v23 = vrot.slane %v1727_v52, 1  ;;  %2754 = vmatmul.mubr.bf16.gmra.mrb[40].mxu1 %v5715_v63  ;;  %v1844_v14 = vrot.slane %v5649_v41, 1  ;;  %v1845_v52 = vrot.slane %v5662_v59, 1 }
  0x9f   : > { %2761 = vmatprep.mubr.bf16.mxu1 %v5649_v41  ;;  %v3998_v27 = vpack.c.bf16 %v639_v32, %v639_v32  ;;  %v3999_v3 = vpack.c.bf16 %v640_v51, %v640_v51 }
  0xa0   : > { %v1725_v13 = vor.u32 %v1724_v12, %v1720_v10  ;;  %v1326_v17 = vld [vmem:[#allocation2 + $0x84] sm:$0x1]  ;;  %v5760_v36 = vsel %vm1819_vm10, %v1844_v14, %v1845_v52 }
  0xa1   : > { %v5723_v34 = vld [vmem:[#allocation2 + $0x78] sm:$0xff]   ;;  %v1327_v30 = vsel %vm5087_vm7, 0, %v1326_v17  ;;  %v996_v54 = vshrl.u32 %v3998_v27, 16  ;;  %v999_v6 = vshll.u32 %v3998_v27, 16  ;;  %v1004_v21 = vshrl.u32 %v3999_v3, 16 }
  0xa2   : > { %v5730_v37 = vsel %vm1610_vm9, %v1725_v13, %v1729_v23  ;;  %v5732_v60 = vld [vmem:[#allocation2 + $0x80] ss:$0 sps:$4 sm:$0x11]   ;;  %v1732_v35 = vshrl.u32 %v5723_v34, 16  ;;  %v1734_v20 = vshll.u32 %v5723_v34, 16  ;;  %v1007_v31 = vshll.u32 %v3999_v3, 16 }
  0xa3   : > { %2616 = vmatprep.mubr.bf16.mxu0 %v5730_v37  ;;  %1328 = vst [vmem:[#allocation2 + $0x84] sm:$0x1] %v1327_v30  ;;  %v1381_v11 = vld [vmem:[#allocation2 + $0x8c] sm:$0x1]  ;;  %v1739_v26 = vshll.u32 %v5732_v60, 16  ;;  %v998_v10 = vrot.slane %v996_v54, 7 }
  0xa4   : > { %2617 = vmatmul.mubr.bf16.gmra.mrb[36].mxu0 %v5699_v61  ;;  %v1382_v44 = vsel %vm5118_vm8, 0, %v1381_v11  ;;  %v1736_v56 = vrot.slane %v1734_v20, 1  ;;  %v1006_v13 = vrot.slane %v1004_v21, 7  ;;  %v1847_v54 = vrot.slane %v5699_v61, 1  ;;  %v5802_v21 = vld [vmem:[#allocation2 + $0x90] sm:$0xff]  }
  0xa5   : > { %1383 = vst [vmem:[#allocation2 + $0x8c] sm:$0x1] %v1382_v44  ;;  %v1741_v0 = vrot.slane %v1739_v26, 1  ;;  %v1001_v12 = vor.u32 %v999_v6, %v998_v10  ;;  %v1002_v28 = vrot.slane %v998_v10, 4  ;;  %v1848_v6 = vrot.slane %v5709_v40, 1 }
  0xa6   : > { %v1737_v7 = vor.u32 %v1736_v56, %v1732_v35  ;;  %2762 = vmatmul.mubr.bf16.gmra.mrb[44].mxu1 %v5744_v46  ;;  %v1009_v35 = vor.u32 %v1007_v31, %v1006_v13  ;;  %v1011_v20 = vrot.slane %v1006_v13, 4  ;;  %v1850_v52 = vrot.slane %v5723_v34, 1  ;;  %v4881_v13 = vld [vmem:[%s6350_s3 + $0x220] sm:$0xff]  }
  0xa7   : > { %2769 = vmatprep.mubr.bf16.mxu1 %v5699_v61  ;;  %v1172_v17 = vsel %vm5081_vm6, %v1001_v12, %v1171_v18  ;;  %v5780_v10 = vsel %vm1819_vm10, %v1847_v54, %v1848_v6  ;;  %v1851_v18 = vrot.slane %v5732_v60, 1  ;;  %v4872_v12 = vld [vmem:[%s6350_s3 + $0x208] sm:$0xff]   ;;  %v4875_v60 = vld [vmem:[%s6350_s3 + $0x210] sm:$0xff]  }
  0xa8   : > { %v5750_v5 = vsel %vm1610_vm9, %v1737_v7, %v1741_v0  ;;  %1173 = vst [vmem:[#allocation2 + $0xc0] sm:$0xf] %v1172_v17  ;;  %v1010_v26 = vsel %vm5068_vm5, %v1002_v28, %v1009_v35  ;;  %v1176_v44 = vsel %vm5087_vm7, %v1011_v20, %v1175_v1  ;;  %v4105_v17 = vld [vmem:[%s443_s23] sm:$0xff]   ;;  %s465_s23 = scalar_lea.vmem %s6354_s7, %s3778_s19 }
  0xa9   : > { %2624 = vmatprep.mubr.bf16.mxu0 %v5750_v5  ;;  %1174 = vst [vmem:[#allocation2 + $0xc4] sm:$0xf] %v1010_v26  ;;  %1177 = vst [vmem:[#allocation2 + $0xc8] sm:$0x1] %v1176_v44  ;;  %v4106_v1 = vunpack.c.l.bf16 %v4105_v17  ;;  %v3817_v20 = vld [vmem:[%s6351_s4] ss:$0 sm:$0xff] }
  0xaa   : > { %v5754_v23 = vld [vmem:[#allocation2 + $0x84] sm:$0xff]   ;;  %v3818_v44 = vld [vmem:[%s6352_s5] ss:$0 sm:$0xff] }
  0xab   : > { %v1744_v32 = vshrl.u32 %v5754_v23, 16  ;;  %v1746_v30 = vshll.u32 %v5754_v23, 16  ;;  %v4882_v26 = vld [vmem:[%s6350_s3 + $0x228] sm:$0xff]  }
  0xac   : > { %2625 = vmatmul.mubr.bf16.gmra.mrb[40].mxu0 %v5723_v34  ;;  %v4867_v59 = vld [vmem:[#allocation2 + $0x8c] ss:$0 sps:$4 sm:$0x11]  }
  0xad   : > { %v1751_v11 = vshll.u32 %v4867_v59, 16  ;;  %v1748_v27 = vrot.slane %v1746_v30, 1  ;;  %v1854_v31 = vrot.slane %v4867_v59, 1  ;;  %v5822_v59 = vld [vmem:[#allocation2 + $0x9c] sm:$0xff]  }
  0xae   : > { %2770 = vmatmul.mubr.bf16.gmra.mrb[48].mxu1 %v5760_v36  ;;  %v4893_v30 = vld [vmem:[#allocation2 + $0x98] ss:$0 sps:$4 sm:$0x11]  }
  0xaf   : > { %v1753_v56 = vrot.slane %v1751_v11, 1  ;;  %v1749_v51 = vor.u32 %v1748_v27, %v1744_v32  ;;  %2777 = vmatprep.mubr.bf16.mxu1 %v5723_v34  ;;  %v1341_v7 = vld [vmem:[#allocation2 + $0xc0] sm:$0x1]  ;;  %v1856_v32 = vrot.slane %v5802_v21, 1  ;;  %v1857_v35 = vrot.slane %v4893_v30, 1 }
  0xb0   : > { %v1342_v3 = vsel %vm5087_vm7, 0, %v1341_v7  ;;  %v1396_v14 = vld [vmem:[#allocation2 + $0xc8] sm:$0x1]  ;;  %v4107_v11 = vunpack.c.h.bf16 %v4105_v17  ;;  %v1246_v27 = vmul.f32 %v4106_v1, %v3817_v20 }
  0xb1   : > { %v5773_v0 = vsel %vm1610_vm9, %v1749_v51, %v1753_v56  ;;  %1343 = vst [vmem:[#allocation2 + $0xc0] sm:$0x1] %v1342_v3  ;;  %v1397_v40 = vsel %vm5118_vm8, 0, %v1396_v14  ;;  %v5837_v54 = vsel %vm1819_vm10, %v1856_v32, %v1857_v35  ;;  %v4883_v3 = vld [vmem:[%s6350_s3 + $0x230] sm:$0xff]  }
  0xb2   : > { %2632 = vmatprep.mubr.bf16.mxu0 %v5773_v0  ;;  %1398 = vst [vmem:[#allocation2 + $0xc8] sm:$0x1] %v1397_v40  ;;  %v1247_v56 = vmul.f32 %v4107_v11, %v3817_v20  ;;  %v1255_v51 = vadd.f32 %v3818_v44, %v1246_v27  ;;  %v1286_v20 = vld [vmem:[#allocation2 + $0xcc] sm:$0xf] }
  0xb4   : > { %2633 = vmatmul.mubr.bf16.gmra.mrb[44].mxu0 %v5754_v23  ;;  %v1256_v6 = vadd.f32 %v3818_v44, %v1247_v56  ;;  %v1257_v7 = vmax.f32 %v1255_v51, 0.0  ;;  %v4897_v56 = vld [vmem:[#allocation2 + $0xb0] ss:$0 sps:$4 sm:$0x11]  }
  0xb5   : > { %2866 = vmatprep.mubr.bf16.mxu0 %v5481_v58  ;;  %v5794_v58 = vsel %vm1819_vm10, %v1850_v52, %v1851_v18  ;;  %v5844_v52 = vld [vmem:[#allocation2 + $0xa8] sm:$0xff]   ;;  %v1859_v18 = vrot.slane %v5822_v59, 1  ;;  %v1863_v51 = vrot.slane %v4897_v56, 1 }
  0xb6   : > { %2778 = vmatmul.mubr.bf16.gmra.mrb[52].mxu1 %v5780_v10  ;;  %v1258_v14 = vmax.f32 %v1256_v6, 0.0  ;;  %v4002_v40 = vpack.c.bf16 %v1257_v7, %v1257_v7  ;;  %v1862_v44 = vrot.slane %v5844_v52, 1  ;;  %v1290_v6 = vld [vmem:[#allocation2 + $0xd4] sm:$0x1] }
  0xb7   : > { %2785 = vmatprep.mubr.bf16.mxu1 %v5754_v23 }
  0xb8   : > { %v1269_v17 = vshll.u32 %v4002_v40, 16  ;;  %v5867_v50 = vsel %vm1819_vm10, %v1862_v44, %v1863_v51 }
  0xbc   : > { %2867 = vmatmul.mubr.bf16.vlgmr.msra.gmra.mrb[48].mxu0 %v5294_v2  ;;  %v1853_v2 = vrot.slane %v5754_v23, 1 }
  0xbd   : > { %4692 = vmatpush3.bf16.msra.mxu0 %v5597_v19  ;;  %2874 = vmatprep.mubr.bf16.mxu0 %v5550_v9  ;;  %v4878_v19 = vld [vmem:[%s6350_s3 + $0x218] sm:$0xff]  }
  0xbe   : > { %4693 = vmatprep.subr.bf16.mxu0 %v4872_v12  ;;  %2786 = vmatmul.mubr.bf16.gmra.mrb[56].mxu1 %v5794_v58  ;;  %v5811_v28 = vsel %vm1819_vm10, %v1853_v2, %v1854_v31  ;;  %v4003_v2 = vpack.c.bf16 %v1258_v14, %v1258_v14  ;;  %v1266_v31 = vshrl.u32 %v4002_v40, 16 }
  0xbf   : > { %2793 = vmatprep.mubr.bf16.mxu1 %v5802_v21 }
  0xc0   : > { %v1274_v1 = vshrl.u32 %v4003_v2, 16  ;;  %v1277_v14 = vshll.u32 %v4003_v2, 16 }
  0xc1   : > { %4694 = vmatpush3.bf16.msra.mxu0 %v4872_v12  ;;  %v4895_v12 = vld [vmem:[#allocation2 + $0xa4] ss:$0 sps:$4 sm:$0x11]  }
  0xc2   : > { %4695 = vmatprep.subr.bf16.mxu0 %v4875_v60  ;;  %v1276_v35 = vrot.slane %v1274_v1, 7 }
  0xc4   : > { %2875 = vmatmul.mubr.bf16.gmra.mrb[52].mxu0 %v5406_v4  ;;  %v1281_v11 = vrot.slane %v1276_v35, 4 }
  0xc5   : > { %2882 = vmatprep.mubr.bf16.mxu0 %v5564_v24  ;;  %4696 = vmatpush3.bf16.msra.mxu0 %v4875_v60  ;;  %v1860_v60 = vrot.slane %v4895_v12, 1 }
  0xc6   : > { %4697 = vmatprep.subr.bf16.mxu0 %v4878_v19  ;;  %2794 = vmatmul.mubr.bf16.gmra.mrb[60].mxu1 %v5811_v28  ;;  %v1291_v7 = vsel %vm5087_vm7, %v1281_v11, %v1290_v6 }
  0xc7   : > { %2801 = vmatprep.mubr.bf16.mxu1 %v5822_v59  ;;  %v5853_v32 = vsel %vm1819_vm10, %v1859_v18, %v1860_v60  ;;  %1292 = vst [vmem:[#allocation2 + $0xd4] sm:$0x1] %v1291_v7  ;;  %v1279_v18 = vor.u32 %v1277_v14, %v1276_v35 }
  0xc9   : > { %4698 = vmatpush3.bf16.msra.mxu0 %v4878_v19  ;;  %v4884_v19 = vld [vmem:[%s6350_s3 + $0x238] sm:$0xff]  }
  0xca   : > { %4699 = vmatprep.subr.bf16.mxu0 %v4881_v13 }
  0xcc   : > { %2883 = vmatmul.mubr.bf16.gmra.mrb[56].mxu0 %v5471_v45 }
  0xcd   : > { %2890 = vmatprep.mubr.bf16.mxu0 %v5643_v25  ;;  %4700 = vmatpush3.bf16.msra.mxu0 %v4881_v13  ;;  %v1268_v13 = vrot.slane %v1266_v31, 7  ;;  %v4898_v31 = vld [vmem:[#allocation2 + $0xbc] ss:$0 sps:$4 sm:$0x11]  }
  0xce   : > { %4701 = vmatprep.subr.bf16.mxu0 %v4882_v26  ;;  %2802 = vmatmul.mubr.bf16.gmra.mrb[64].mxu1 %v5837_v54  ;;  %v1399_v2 = vld [vmem:[#allocation2 + $0xd4] sm:$0x1] }
  0xcf   : > { %2809 = vmatprep.mubr.bf16.mxu1 %v5844_v52  ;;  %v1271_v30 = vor.u32 %v1269_v17, %v1268_v13  ;;  %v1272_v40 = vrot.slane %v1268_v13, 4  ;;  %v1400_v13 = vsel %vm5118_vm8, 0, %v1399_v2 }
  0xd0   : > { %1401 = vst [vmem:[#allocation2 + $0xd4] sm:$0x1] %v1400_v13 }
  0xd1   : > { %4702 = vmatpush3.bf16.msra.mxu0 %v4882_v26  ;;  %v1287_v27 = vsel %vm5081_vm6, %v1271_v30, %v1286_v20  ;;  %v5859_v26 = vld [vmem:[#allocation2 + $0xb4] sm:$0xff]   ;;  %v1280_v17 = vsel %vm5068_vm5, %v1272_v40, %v1279_v18  ;;  %1411 = vst [vmem:[#allocation2 + $0xd4] sm:$0x1] %v4926_v29  ;;  %v4885_v18 = vld [vmem:[#allocation2 + $0xc8] ss:$0 sps:$4 sm:$0x11]  }
  0xd2   : > { %4703 = vmatprep.subr.bf16.mxu0 %v4883_v3  ;;  %1288 = vst [vmem:[#allocation2 + $0xcc] sm:$0xf] %v1287_v27  ;;  %v1865_v60 = vrot.slane %v5859_v26, 1  ;;  %1289 = vst [vmem:[#allocation2 + $0xd0] sm:$0xf] %v1280_v17 }
  0xd3   : > { %1410 = vst [vmem:[#allocation2 + $0xd0] sm:$0xf] %v4926_v29 }
  0xd4   : > { %2891 = vmatmul.mubr.bf16.gmra.mrb[60].mxu0 %v5499_v16 }
  0xd5   : > { %2898 = vmatprep.mubr.bf16.mxu0 %v5679_v22  ;;  %4704 = vmatpush3.bf16.msra.mxu0 %v4883_v3  ;;  %v5869_v3 = vld [vmem:[#allocation2 + $0xc0] sm:$0xff]  }
  0xd6   : > { %4705 = vmatprep.subr.bf16.mxu0 %v4884_v19  ;;  %2810 = vmatmul.mubr.bf16.gmra.mrb[68].mxu1 %v5853_v32 }
  0xd7   : > { %2817 = vmatprep.mubr.bf16.mxu1 %v5859_v26 }
  0xd9   : > { %4706 = vmatpush3.bf16.msra.mxu0 %v4884_v19  ;;  %v1344_v12 = vld [vmem:[#allocation2 + $0xcc] sm:$0x1]  ;;  %v1866_v19 = vrot.slane %v4898_v31, 1  ;;  %v1906_v31 = vrot.slane %v5869_v3, 1 }
  0xda   : > { %v1345_v1 = vsel %vm5087_vm7, 0, %v1344_v12 }
  0xdb   : > { %1346 = vst [vmem:[#allocation2 + $0xcc] sm:$0x1] %v1345_v1  ;;  %v5885_v30 = vsel %vm1819_vm10, %v1865_v60, %v1866_v19  ;;  %v1907_v19 = vrot.slane %v4885_v18, 1  ;;  %v1901_v1 = vshll.u32 %v4885_v18, 16 }
  0xdc   : > { %2899 = vmatmul.mubr.bf16.gmra.mrb[64].mxu0 %v5569_v39  ;;  %1409 = vst [vmem:[#allocation2 + $0xcc] sm:$0xf] %v4926_v29  ;;  %v4901_v29 = vld [vmem:[#allocation2 + $0x30] sm:$0xff]  }
  0xdd   : > { %2906 = vmatprep.mubr.bf16.mxu0 %v5715_v63  ;;  %v5940_v13 = vsel %vm1819_vm10, %v1906_v31, %v1907_v19 }
  0xde   : > { %2818 = vmatmul.mubr.bf16.gmra.mrb[72].mxu1 %v5867_v50 }
  0xdf   : > { %2825 = vmatprep.mubr.bf16.mxu1 %v5869_v3 }
  0xe4   : > { %2907 = vmatmul.mubr.bf16.gmra.mrb[68].mxu0 %v5606_v62 }
  0xe5   : > { %2914 = vmatprep.mubr.bf16.mxu0 %v5744_v46 }
  0xe6   : > { %2826 = vmatmul.mubr.bf16.gmra.mrb[76].mxu1 %v5885_v30 }
  0xe7   : > { %3027 = vmatprep.mubr.bf16.mxu1 %v5406_v4 }
  0xec   : > { %2915 = vmatmul.mubr.bf16.gmra.mrb[72].mxu0 %v5660_v48 }
  0xed   : > { %2922 = vmatprep.mubr.bf16.mxu0 %v5760_v36 }
  0xee   : > { %3028 = vmatmul.mubr.bf16.vlgmr.msra.gmra.mrb[80].mxu1 %v4899_v38 }
  0xef   : > { %3035 = vmatprep.mubr.bf16.mxu1 %v5471_v45 }
  0xf4   : > { %2923 = vmatmul.mubr.bf16.gmra.mrb[76].mxu0 %v5686_v15 }
  0xf5   : > { %2930 = vmatprep.mubr.bf16.mxu0 %v5780_v10 }
  0xf6   : > { %3036 = vmatmul.mubr.bf16.gmra.mrb[84].mxu1 %v4900_v55 }
  0xf7   : > { %3043 = vmatprep.mubr.bf16.mxu1 %v5499_v16 }
  0xfc   : > { %2931 = vmatmul.mubr.bf16.gmra.mrb[80].mxu0 %v5730_v37 }
  0xfd   : > { %2938 = vmatprep.mubr.bf16.mxu0 %v5794_v58 }
  0xfe   : > { %3044 = vmatmul.mubr.bf16.gmra.mrb[88].mxu1 %v4901_v29 }
  0xff   : > { %3051 = vmatprep.mubr.bf16.mxu1 %v5569_v39 }
 0x104   : > { %2939 = vmatmul.mubr.bf16.gmra.mrb[84].mxu0 %v5750_v5 }
 0x105   : > { %2946 = vmatprep.mubr.bf16.mxu0 %v5811_v28 }
 0x106   : > { %3052 = vmatmul.mubr.bf16.gmra.mrb[92].mxu1 %v5520_v42 }
 0x107   : > { %3059 = vmatprep.mubr.bf16.mxu1 %v5606_v62 }
 0x10c   : > { %2947 = vmatmul.mubr.bf16.gmra.mrb[88].mxu0 %v5773_v0 }
 0x10d   : > { %2954 = vmatprep.mubr.bf16.mxu0 %v5837_v54 }
 0x10e   : > { %3060 = vmatmul.mubr.bf16.gmra.mrb[96].mxu1 %v5559_v53 }
 0x10f   : > { %v4307_v33 = vpop.f32.mrb[0].mxu1  ;;  %3067 = vmatprep.mubr.bf16.mxu1 %v5660_v48 }
 0x110   : > { %v4308_v4 = vpop.f32.mrb[1].mxu1 }
 0x111   : > { %v5907_v45 = vadd.f32 %v4308_v4, %v4307_v33  ;;  %v4310_v16 = vpop.f32.mrb[2].mxu1  ;;  %v4235_v35 = vpop.f32.mrb[0].mxu0  ;;  %v1903_v4 = vrot.slane %v1901_v1, 1 }
 0x112   : > { %v4311_v39 = vpop.f32.mrb[3].mxu1  ;;  %v4236_v42 = vpop.f32.mrb[1].mxu0 }
 0x113   : > { %v5910_v20 = vadd.f32 %v4311_v39, %v4310_v16  ;;  %v5912_v11 = vadd.f32 %v4236_v42, %v4235_v35  ;;  %v4238_v62 = vpop.f32.mrb[2].mxu0 }
 0x114   : > { %2955 = vmatmul.mubr.bf16.gmra.mrb[92].mxu0 %v5180_v8  ;;  %v4239_v27 = vpop.f32.mrb[3].mxu0 }
 0x115   : > { %2962 = vmatprep.mubr.bf16.mxu0 %v5853_v32  ;;  %v5916_v44 = vadd.f32 %v4239_v27, %v4238_v62 }
 0x116   : > { %3068 = vmatmul.mubr.bf16.gmra.mrb[100].mxu1 %v5622_v49 }
 0x117   : > { %3075 = vmatprep.mubr.bf16.mxu1 %v5686_v15 }
 0x11c   : > { %2963 = vmatmul.mubr.bf16.gmra.mrb[96].mxu0 %v5277_v43 }
 0x11d   : > { %v4313_v53 = vpop.f32.mrb[4].mxu1  ;;  %2970 = vmatprep.mubr.bf16.mxu0 %v5867_v50 }
 0x11e   : > { %v4314_v48 = vpop.f32.mrb[5].mxu1  ;;  %3076 = vmatmul.mubr.bf16.gmra.mrb[104].mxu1 %v5649_v41  ;;  %v1896_v41 = vshll.u32 %v5869_v3, 16 }
 0x11f   : > { %v5922_v56 = vadd.f32 %v4314_v48, %v4313_v53  ;;  %v4316_v51 = vpop.f32.mrb[6].mxu1  ;;  %v4241_v6 = vpop.f32.mrb[4].mxu0  ;;  %3083 = vmatprep.mubr.bf16.mxu1 %v5730_v37  ;;  %v1894_v37 = vshrl.u32 %v5869_v3, 16 }
 0x120   : > { %v4317_v7 = vpop.f32.mrb[7].mxu1  ;;  %v4242_v14 = vpop.f32.mrb[5].mxu0  ;;  %v1898_v17 = vrot.slane %v1896_v41, 1 }
 0x121   : > { %v5926_v40 = vadd.f32 %v4317_v7, %v4316_v51  ;;  %v5928_v49 = vadd.f32 %v4242_v14, %v4241_v6  ;;  %v4244_v15 = vpop.f32.mrb[6].mxu0 }
 0x122   : > { %v4245_v12 = vpop.f32.mrb[7].mxu0 }
 0x123   : > { %v5930_v60 = vadd.f32 %v4245_v12, %v4244_v15 }
 0x124   : > { %2971 = vmatmul.mubr.bf16.gmra.mrb[100].mxu0 %v5343_v57 }
 0x125   : > { %2978 = vmatprep.mubr.bf16.mxu0 %v5885_v30 }
 0x126   : > { %3084 = vmatmul.mubr.bf16.gmra.mrb[108].mxu1 %v5699_v61  ;;  %v1899_v61 = vor.u32 %v1898_v17, %v1894_v37 }
 0x127   : > { %3091 = vmatprep.mubr.bf16.mxu1 %v5750_v5 }
 0x128   : > { %v5951_v16 = vsel %vm1610_vm9, %v1899_v61, %v1903_v4  ;;  %v5999_v4 = vld [vmem:[#allocation2 + $0xd4] ss:$0 sps:$4 sm:$0x11]  }
 0x129   : > { %v4319_v2 = vpop.f32.mrb[8].mxu1 }
 0x12a   : > { %v4320_v38 = vpop.f32.mrb[9].mxu1 }
 0x12b   : > { %v5942_v55 = vadd.f32 %v4320_v38, %v4319_v2  ;;  %v4322_v29 = vpop.f32.mrb[10].mxu1 }
 0x12c   : > { %2979 = vmatmul.mubr.bf16.gmra.mrb[104].mxu0 %v5425_v47  ;;  %v4323_v33 = vpop.f32.mrb[11].mxu1 }
 0x12d   : > { %2986 = vmatprep.mubr.bf16.mxu0 %v5940_v13  ;;  %v5946_v5 = vadd.f32 %v4323_v33, %v4322_v29 }
 0x12e   : > { %3092 = vmatmul.mubr.bf16.gmra.mrb[112].mxu1 %v5723_v34 }
 0x12f   : > { %3099 = vmatprep.mubr.bf16.mxu1 %v5773_v0 }
 0x133   : > { %v4247_v39 = vpop.f32.mrb[8].mxu0 }
 0x134   : > { %2987 = vmatmul.mubr.bf16.gmra.mrb[108].mxu0 %v5951_v16  ;;  %v4248_v35 = vpop.f32.mrb[9].mxu0 }
 0x135   : > { %4707 = vmatprep.mubr.bf16.mxu0 %v5550_v9  ;;  %v5955_v42 = vadd.f32 %v4248_v35, %v4247_v39  ;;  %v4250_v62 = vpop.f32.mrb[10].mxu0 }
 0x136   : > { %v4251_v27 = vpop.f32.mrb[11].mxu0  ;;  %3100 = vmatmul.mubr.bf16.gmra.mrb[116].mxu1 %v5754_v23 }
 0x137   : > { %v5957_v53 = vadd.f32 %v4251_v27, %v4250_v62  ;;  %3107 = vmatprep.mubr.bf16.mxu1 %v5180_v8 }
 0x139   : > { %v4325_v34 = vpop.f32.mrb[12].mxu1 }
 0x13a   : > { %v4326_v0 = vpop.f32.mrb[13].mxu1 }
 0x13b   : > { %v5962_v48 = vadd.f32 %v4326_v0, %v4325_v34  ;;  %v4328_v51 = vpop.f32.mrb[14].mxu1 }
 0x13c   : > { %4708 = vmatmul.mubr.bf16.vlgmr.msra.gmra.mrb[112].mxu0 %v5564_v24  ;;  %v4329_v9 = vpop.f32.mrb[15].mxu1 }
 0x13d   : > { %4711 = vmatprep.mubr.bf16.mxu0 %v5643_v25  ;;  %v5965_v6 = vadd.f32 %v4329_v9, %v4328_v51  ;;  %v1927_v9 = vshll.u32 %v5999_v4, 16 }
 0x13e   : > { %3108 = vmatmul.mubr.bf16.gmra.mrb[120].mxu1 %v5802_v21 }
 0x13f   : > { %3115 = vmatprep.mubr.bf16.mxu1 %v5277_v43 }
 0x141   : > { %v4347_v7 = vpop.f32.mrb[16].mxu1 }
 0x142   : > { %v4253_v23 = vpop.f32.mrb[12].mxu0  ;;  %v4348_v14 = vpop.f32.mrb[17].mxu1 }
 0x143   : > { %v4254_v8 = vpop.f32.mrb[13].mxu0  ;;  %v4349_v15 = vadd.f32 %v4348_v14, %v4347_v7  ;;  %v4350_v24 = vpop.f32.mrb[18].mxu1 }
 0x144   : > { %4712 = vmatmul.mubr.bf16.gmra.mrb[116].mxu0 %v5679_v22  ;;  %v5970_v18 = vadd.f32 %v4254_v8, %v4253_v23  ;;  %v4256_v12 = vpop.f32.mrb[14].mxu0  ;;  %v4351_v25 = vpop.f32.mrb[19].mxu1 }
 0x145   : > { %4715 = vmatprep.mubr.bf16.mxu0 %v5715_v63  ;;  %v4257_v41 = vpop.f32.mrb[15].mxu0  ;;  %v5974_v31 = vadd.f32 %v4349_v15, %v5912_v11  ;;  %v4352_v21 = vadd.f32 %v4351_v25, %v4350_v24  ;;  %v1929_v15 = vrot.slane %v1927_v9, 1 }
 0x146   : > { %v5976_v43 = vadd.f32 %v4257_v41, %v4256_v12  ;;  %3116 = vmatmul.mubr.bf16.gmra.mrb[124].mxu1 %v5822_v59  ;;  %v5987_v59 = vld [vmem:[#allocation2 + $0xcc] sm:$0xff]  }
 0x147   : > { %v5980_v22 = vadd.f32 %v4352_v21, %v5916_v44  ;;  %3123 = vmatprep.mubr.bf16.mxu1 %v5343_v57 }
 0x149   : > { %v4353_v19 = vpop.f32.mrb[20].mxu1 }
 0x14a   : > { %v4259_v37 = vpop.f32.mrb[16].mxu0  ;;  %v4354_v17 = vpop.f32.mrb[21].mxu1 }
 0x14b   : > { %v4260_v63 = vpop.f32.mrb[17].mxu0  ;;  %v4355_v1 = vadd.f32 %v4354_v17, %v4353_v19  ;;  %v4356_v2 = vpop.f32.mrb[22].mxu1 }
 0x14c   : > { %4716 = vmatmul.mubr.bf16.gmra.mrb[120].mxu0 %v5744_v46  ;;  %v5984_v11 = vadd.f32 %v4260_v63, %v4259_v37  ;;  %v4262_v38 = vpop.f32.mrb[18].mxu0  ;;  %v4357_v29 = vpop.f32.mrb[23].mxu1 }
 0x14d   : > { %4719 = vmatprep.mubr.bf16.mxu0 %v5760_v36  ;;  %v4263_v44 = vpop.f32.mrb[19].mxu0  ;;  %v5990_v33 = vadd.f32 %v4355_v1, %v5928_v49  ;;  %v4358_v57 = vadd.f32 %v4357_v29, %v4356_v2  ;;  %v1922_v36 = vshll.u32 %v5987_v59, 16 }
 0x14e   : > { %v5992_v61 = vadd.f32 %v4263_v44, %v4262_v38  ;;  %3124 = vmatmul.mubr.bf16.gmra.mrb[128].mxu1 %v5844_v52 }
 0x14f   : > { %v5996_v46 = vadd.f32 %v4358_v57, %v5930_v60  ;;  %3131 = vmatprep.mubr.bf16.mxu1 %v5425_v47  ;;  %v1920_v47 = vshrl.u32 %v5987_v59, 16  ;;  %v1924_v51 = vrot.slane %v1922_v36, 1 }
 0x151   : > { %v4359_v39 = vpop.f32.mrb[24].mxu1 }
 0x152   : > { %v4265_v35 = vpop.f32.mrb[20].mxu0  ;;  %v4360_v62 = vpop.f32.mrb[25].mxu1 }
 0x153   : > { %v4266_v49 = vpop.f32.mrb[21].mxu0  ;;  %v4361_v27 = vadd.f32 %v4360_v62, %v4359_v39  ;;  %v4362_v34 = vpop.f32.mrb[26].mxu1 }
 0x154   : > { %4720 = vmatmul.mubr.bf16.gmra.mrb[124].mxu0 %v5780_v10  ;;  %v6003_v0 = vadd.f32 %v4266_v49, %v4265_v35  ;;  %v4268_v52 = vpop.f32.mrb[22].mxu0  ;;  %v4363_v60 = vpop.f32.mrb[27].mxu1 }
 0x155   : > { %4723 = vmatprep.mubr.bf16.mxu0 %v5794_v58  ;;  %v4269_v7 = vpop.f32.mrb[23].mxu0  ;;  %v6009_v23 = vadd.f32 %v4361_v27, %v5955_v42  ;;  %v4364_v14 = vadd.f32 %v4363_v60, %v4362_v34  ;;  %v1925_v58 = vor.u32 %v1924_v51, %v1920_v47  ;;  %v1933_v60 = vrot.slane %v5999_v4, 1 }
 0x156   : > { %v4270_v10 = vadd.f32 %v4269_v7, %v4268_v52  ;;  %3132 = vmatmul.mubr.bf16.gmra.mrb[132].mxu1 %v5859_v26 }
 0x157   : > { %v6013_v8 = vadd.f32 %v4364_v14, %v5957_v53  ;;  %3139 = vmatprep.mubr.bf16.mxu1 %v5951_v16  ;;  %v1930_v53 = vsel %vm1610_vm9, %v1925_v58, %v1929_v15 }
 0x159   : > { %v4365_v24 = vpop.f32.mrb[28].mxu1 }
 0x15a   : > { %v4271_v12 = vpop.f32.mrb[24].mxu0  ;;  %v4366_v25 = vpop.f32.mrb[29].mxu1 }
 0x15b   : > { %v4272_v41 = vpop.f32.mrb[25].mxu0  ;;  %v4367_v21 = vadd.f32 %v4366_v25, %v4365_v24  ;;  %v4368_v42 = vpop.f32.mrb[30].mxu1 }
 0x15c   : > { %4724 = vmatmul.mubr.bf16.gmra.mrb[128].mxu0 %v5811_v28  ;;  %v4273_v19 = vadd.f32 %v4272_v41, %v4271_v12  ;;  %v4274_v37 = vpop.f32.mrb[26].mxu0  ;;  %v4369_v26 = vpop.f32.mrb[31].mxu1 }
 0x15d   : > { %4727 = vmatprep.mubr.bf16.mxu0 %v5837_v54  ;;  %v4275_v17 = vpop.f32.mrb[27].mxu0  ;;  %v6020_v16 = vadd.f32 %v4367_v21, %v5970_v18  ;;  %v4370_v63 = vadd.f32 %v4369_v26, %v4368_v42 }
 0x15e   : > { %v4276_v1 = vadd.f32 %v4275_v17, %v4274_v37  ;;  %3140 = vmatmul.mubr.bf16.gmra.mrb[136].mxu1 %v5869_v3 }
 0x15f   : > { %v6024_v28 = vadd.f32 %v4370_v63, %v5976_v43  ;;  %3147 = vmatprep.mubr.bf16.mxu1 %v1930_v53 }
 0x161   : > { %v4371_v2 = vpop.f32.mrb[32].mxu1 }
 0x162   : > { %v4372_v38 = vpop.f32.mrb[33].mxu1 }
 0x163   : > { %v4373_v54 = vadd.f32 %v4372_v38, %v4371_v2  ;;  %v4374_v29 = vpop.f32.mrb[34].mxu1 }
 0x164   : > { %4728 = vmatmul.mubr.bf16.gmra.mrb[132].mxu0 %v5853_v32  ;;  %v4375_v57 = vpop.f32.mrb[35].mxu1 }
 0x165   : > { %4731 = vmatprep.mubr.bf16.mxu0 %v5867_v50  ;;  %v6029_v36 = vadd.f32 %v4373_v54, %v5984_v11  ;;  %v4376_v39 = vadd.f32 %v4375_v57, %v4374_v29  ;;  %v1932_v11 = vrot.slane %v5987_v59, 1 }
 0x166   : > { %v4277_v44 = vpop.f32.mrb[28].mxu0  ;;  %3148 = vmatmul.mubr.bf16.gmra.mrb[140].mxu1 %v5987_v59 }
 0x167   : > { %v4278_v18 = vpop.f32.mrb[29].mxu0  ;;  %v6033_v62 = vadd.f32 %v4376_v39, %v5992_v61  ;;  %v1934_v24 = vsel %vm1819_vm10, %v1932_v11, %v1933_v60 }
 0x168   : > { %v4279_v3 = vadd.f32 %v4278_v18, %v4277_v44  ;;  %v4280_v35 = vpop.f32.mrb[30].mxu0 }
 0x169   : > { %v4281_v43 = vpop.f32.mrb[31].mxu0  ;;  %v4377_v49 = vpop.f32.mrb[36].mxu1 }
 0x16a   : > { %v4282_v32 = vadd.f32 %v4281_v43, %v4280_v35  ;;  %v4378_v27 = vpop.f32.mrb[37].mxu1 }
 0x16b   : > { %v4379_v50 = vadd.f32 %v4378_v27, %v4377_v49  ;;  %v4380_v34 = vpop.f32.mrb[38].mxu1 }
 0x16c   : > { %4732 = vmatmul.mubr.bf16.gmra.mrb[136].mxu0 %v5885_v30  ;;  %v4381_v47 = vpop.f32.mrb[39].mxu1 }
 0x16d   : > { %4735 = vmatprep.mubr.bf16.mxu0 %v5940_v13  ;;  %v6040_v9 = vadd.f32 %v4379_v50, %v6003_v0  ;;  %v4382_v61 = vadd.f32 %v4381_v47, %v4380_v34 }
 0x16e   : > { %v4283_v52 = vpop.f32.mrb[32].mxu0 }
 0x16f   : > { %v4284_v51 = vpop.f32.mrb[33].mxu0  ;;  %v6042_v15 = vadd.f32 %v4382_v61, %v4270_v10 }
 0x170   : > { %v4285_v7 = vadd.f32 %v4284_v51, %v4283_v52  ;;  %v4286_v14 = vpop.f32.mrb[34].mxu0 }
 0x171   : > { %v4287_v58 = vpop.f32.mrb[35].mxu0  ;;  %v4383_v12 = vpop.f32.mrb[40].mxu1 }
 0x172   : > { %v4288_v30 = vadd.f32 %v4287_v58, %v4286_v14  ;;  %v4384_v13 = vpop.f32.mrb[41].mxu1 }
 0x173   : > { %v4385_v59 = vadd.f32 %v4384_v13, %v4383_v12  ;;  %v4386_v25 = vpop.f32.mrb[42].mxu1 }
 0x174   : > { %4736 = vmatmul.mubr.bf16.gmra.mrb[140].mxu0 %v1934_v24  ;;  %v4387_v4 = vpop.f32.mrb[43].mxu1 }
 0x175   : > { %v6045_v21 = vadd.f32 %v4385_v59, %v4273_v19  ;;  %v4388_v0 = vadd.f32 %v4387_v4, %v4386_v25 }
 0x177   : > { %v4289_v41 = vpop.f32.mrb[36].mxu0  ;;  %v6047_v53 = vadd.f32 %v4388_v0, %v4276_v1 }
 0x178   : > { %v4290_v42 = vpop.f32.mrb[37].mxu0 }
 0x179   : > { %v4291_v37 = vadd.f32 %v4290_v42, %v4289_v41  ;;  %v4292_v26 = vpop.f32.mrb[38].mxu0  ;;  %v4389_v63 = vpop.f32.mrb[44].mxu1 }
 0x17a   : > { %v4293_v10 = vpop.f32.mrb[39].mxu0  ;;  %v4390_v2 = vpop.f32.mrb[45].mxu1 }
 0x17b   : > { %v4294_v17 = vadd.f32 %v4293_v10, %v4292_v26  ;;  %v4391_v38 = vadd.f32 %v4390_v2, %v4389_v63  ;;  %v4392_v54 = vpop.f32.mrb[46].mxu1 }
 0x17c   : > { %v4393_v29 = vpop.f32.mrb[47].mxu1 }
 0x17d   : > { %v6049_v57 = vadd.f32 %v4391_v38, %v4279_v3  ;;  %v4394_v18 = vadd.f32 %v4393_v29, %v4392_v54 }
 0x17f   : > { %v4295_v44 = vpop.f32.mrb[40].mxu0  ;;  %v6051_v43 = vadd.f32 %v4394_v18, %v4282_v32 }
 0x180   : > { %v4296_v39 = vpop.f32.mrb[41].mxu0 }
 0x181   : > { %v4297_v19 = vadd.f32 %v4296_v39, %v4295_v44  ;;  %v4298_v35 = vpop.f32.mrb[42].mxu0  ;;  %v4395_v1 = vpop.f32.mrb[48].mxu1 }
 0x182   : > { %v4299_v49 = vpop.f32.mrb[43].mxu0  ;;  %v4396_v50 = vpop.f32.mrb[49].mxu1 }
 0x183   : > { %v4300_v27 = vadd.f32 %v4299_v49, %v4298_v35  ;;  %v4397_v34 = vadd.f32 %v4396_v50, %v4395_v1  ;;  %v4398_v52 = vpop.f32.mrb[50].mxu1 }
 0x184   : > { %v4399_v11 = vpop.f32.mrb[51].mxu1 }
 0x185   : > { %v6053_v60 = vadd.f32 %v4397_v34, %v4285_v7  ;;  %v4400_v47 = vadd.f32 %v4399_v11, %v4398_v52 }
 0x187   : > { %v4301_v51 = vpop.f32.mrb[44].mxu0  ;;  %v6055_v3 = vadd.f32 %v4400_v47, %v4288_v30 }
 0x188   : > { %v4302_v61 = vpop.f32.mrb[45].mxu0 }
 0x189   : > { %v4303_v14 = vadd.f32 %v4302_v61, %v4301_v51  ;;  %v4304_v58 = vpop.f32.mrb[46].mxu0  ;;  %v4401_v12 = vpop.f32.mrb[52].mxu1 }
 0x18a   : > { %v4305_v24 = vpop.f32.mrb[47].mxu0  ;;  %v4402_v13 = vpop.f32.mrb[53].mxu1 }
 0x18b   : > { %v4306_v32 = vadd.f32 %v4305_v24, %v4304_v58  ;;  %v4403_v59 = vadd.f32 %v4402_v13, %v4401_v12  ;;  %v4404_v25 = vpop.f32.mrb[54].mxu1 }
 0x18c   : > { %v4405_v4 = vpop.f32.mrb[55].mxu1 }
 0x18d   : > { %v6057_v41 = vadd.f32 %v4403_v59, %v4291_v37  ;;  %v4406_v0 = vadd.f32 %v4405_v4, %v4404_v25 }
 0x18f   : > { %v4459_v42 = vpop.f32.mrb[48].mxu0  ;;  %v6059_v26 = vadd.f32 %v4406_v0, %v4294_v17 }
 0x190   : > { %v4460_v7 = vpop.f32.mrb[49].mxu0 }
 0x191   : > { %v4461_v10 = vadd.f32 %v4460_v7, %v4459_v42  ;;  %v4462_v63 = vpop.f32.mrb[50].mxu0  ;;  %v4407_v2 = vpop.f32.mrb[56].mxu1 }
 0x192   : > { %v4463_v30 = vpop.f32.mrb[51].mxu0  ;;  %v4408_v29 = vpop.f32.mrb[57].mxu1 }
 0x193   : > { %v6062_v38 = vadd.f32 %v4461_v10, %v5974_v31  ;;  %v4464_v54 = vadd.f32 %v4463_v30, %v4462_v63  ;;  %v4409_v44 = vadd.f32 %v4408_v29, %v4407_v2  ;;  %v4410_v18 = vpop.f32.mrb[58].mxu1 }
 0x194   : > { %v4411_v37 = vpop.f32.mrb[59].mxu1 }
 0x195   : > { %v6065_v39 = vadd.f32 %v4464_v54, %v5980_v22  ;;  %v6067_v35 = vadd.f32 %v4409_v44, %v4297_v19  ;;  %v4412_v49 = vadd.f32 %v4411_v37, %v4410_v18 }
 0x197   : > { %v4465_v17 = vpop.f32.mrb[52].mxu0  ;;  %v6069_v50 = vadd.f32 %v4412_v49, %v4300_v27 }
 0x198   : > { %v4466_v1 = vpop.f32.mrb[53].mxu0 }
 0x199   : > { %v4467_v34 = vadd.f32 %v4466_v1, %v4465_v17  ;;  %v4468_v52 = vpop.f32.mrb[54].mxu0  ;;  %v4413_v31 = vpop.f32.mrb[60].mxu1 }
 0x19a   : > { %v4469_v11 = vpop.f32.mrb[55].mxu0  ;;  %v4414_v61 = vpop.f32.mrb[61].mxu1 }
 0x19b   : > { %v6072_v47 = vadd.f32 %v4467_v34, %v5990_v33  ;;  %v4470_v51 = vadd.f32 %v4469_v11, %v4468_v52  ;;  %v4415_v58 = vadd.f32 %v4414_v61, %v4413_v31  ;;  %v4416_v22 = vpop.f32.mrb[62].mxu1 }
 0x19c   : > { %v4417_v19 = vpop.f32.mrb[63].mxu1 }
 0x19d   : > { %v6075_v24 = vadd.f32 %v4470_v51, %v5996_v46  ;;  %v6077_v12 = vadd.f32 %v4415_v58, %v4303_v14  ;;  %v4418_v13 = vadd.f32 %v4417_v19, %v4416_v22 }
 0x19f   : > { %v4471_v27 = vpop.f32.mrb[56].mxu0  ;;  %v6079_v25 = vadd.f32 %v4418_v13, %v4306_v32 }
 0x1a0   : > { %v4472_v59 = vpop.f32.mrb[57].mxu0 }
 0x1a1   : > { %v4473_v4 = vadd.f32 %v4472_v59, %v4471_v27  ;;  %v4474_v0 = vpop.f32.mrb[58].mxu0  ;;  %v4419_v33 = vpop.f32.mrb[64].mxu1 }
 0x1a2   : > { %v4475_v42 = vpop.f32.mrb[59].mxu0  ;;  %v4420_v63 = vpop.f32.mrb[65].mxu1 }
 0x1a3   : > { %v6082_v7 = vadd.f32 %v4473_v4, %v6009_v23  ;;  %v4476_v10 = vadd.f32 %v4475_v42, %v4474_v0  ;;  %v4421_v30 = vadd.f32 %v4420_v63, %v4419_v33  ;;  %v4422_v46 = vpop.f32.mrb[66].mxu1 }
 0x1a4   : > { %v4423_v14 = vpop.f32.mrb[67].mxu1 }
 0x1a5   : > { %v6085_v2 = vadd.f32 %v4476_v10, %v6013_v8  ;;  %v6088_v54 = vadd.f32 %v4421_v30, %v5907_v45  ;;  %v4424_v32 = vadd.f32 %v4423_v14, %v4422_v46 }
 0x1a7   : > { %v4477_v29 = vpop.f32.mrb[60].mxu0  ;;  %v6091_v18 = vadd.f32 %v4424_v32, %v5910_v20 }
 0x1a8   : > { %v4478_v44 = vpop.f32.mrb[61].mxu0 }
 0x1a9   : > { %v4479_v37 = vadd.f32 %v4478_v44, %v4477_v29  ;;  %v4480_v23 = vpop.f32.mrb[62].mxu0  ;;  %v4425_v17 = vpop.f32.mrb[68].mxu1 }
 0x1aa   : > { %v4481_v49 = vpop.f32.mrb[63].mxu0  ;;  %v4426_v8 = vpop.f32.mrb[69].mxu1 }
 0x1ab   : > { %v6094_v1 = vadd.f32 %v4479_v37, %v6020_v16  ;;  %v4482_v34 = vadd.f32 %v4481_v49, %v4480_v23  ;;  %v4427_v52 = vadd.f32 %v4426_v8, %v4425_v17  ;;  %v4428_v11 = vpop.f32.mrb[70].mxu1 }
 0x1ac   : > { %v4429_v31 = vpop.f32.mrb[71].mxu1 }
 0x1ad   : > { %v6097_v45 = vadd.f32 %v4482_v34, %v6024_v28  ;;  %v6100_v51 = vadd.f32 %v4427_v52, %v5922_v56  ;;  %v4430_v20 = vadd.f32 %v4429_v31, %v4428_v11 }
 0x1af   : > { %v4483_v61 = vpop.f32.mrb[64].mxu0  ;;  %v6103_v22 = vadd.f32 %v4430_v20, %v5926_v40 }
 0x1b0   : > { %v4484_v58 = vpop.f32.mrb[65].mxu0 }
 0x1b1   : > { %v4485_v19 = vadd.f32 %v4484_v58, %v4483_v61  ;;  %v4486_v16 = vpop.f32.mrb[66].mxu0  ;;  %v4431_v27 = vpop.f32.mrb[72].mxu1 }
 0x1b2   : > { %v4487_v13 = vpop.f32.mrb[67].mxu0  ;;  %v4432_v28 = vpop.f32.mrb[73].mxu1 }
 0x1b3   : > { %v6106_v59 = vadd.f32 %v4485_v19, %v6029_v36  ;;  %v4488_v4 = vadd.f32 %v4487_v13, %v4486_v16  ;;  %v4433_v0 = vadd.f32 %v4432_v28, %v4431_v27  ;;  %v4434_v42 = vpop.f32.mrb[74].mxu1 }
 0x1b4   : > { %v4435_v33 = vpop.f32.mrb[75].mxu1 }
 0x1b5   : > { %v6109_v56 = vadd.f32 %v4488_v4, %v6033_v62  ;;  %v6112_v10 = vadd.f32 %v4433_v0, %v5942_v55  ;;  %v4436_v40 = vadd.f32 %v4435_v33, %v4434_v42 }
 0x1b7   : > { %v4489_v63 = vpop.f32.mrb[68].mxu0  ;;  %v6115_v46 = vadd.f32 %v4436_v40, %v5946_v5 }
 0x1b8   : > { %v4490_v30 = vpop.f32.mrb[69].mxu0 }
 0x1b9   : > { %v4491_v14 = vadd.f32 %v4490_v30, %v4489_v63  ;;  %v4492_v36 = vpop.f32.mrb[70].mxu0  ;;  %v4437_v29 = vpop.f32.mrb[76].mxu1 }
 0x1ba   : > { %v4493_v32 = vpop.f32.mrb[71].mxu0  ;;  %v4438_v62 = vpop.f32.mrb[77].mxu1 }
 0x1bb   : > { %v6118_v44 = vadd.f32 %v4491_v14, %v6040_v9  ;;  %v4494_v37 = vadd.f32 %v4493_v32, %v4492_v36  ;;  %v4439_v23 = vadd.f32 %v4438_v62, %v4437_v29  ;;  %v4440_v49 = vpop.f32.mrb[78].mxu1 }
 0x1bc   : > { %v4441_v17 = vpop.f32.mrb[79].mxu1 }
 0x1bd   : > { %v6121_v55 = vadd.f32 %v4494_v37, %v6042_v15  ;;  %v6124_v34 = vadd.f32 %v4439_v23, %v5962_v48  ;;  %v4442_v5 = vadd.f32 %v4441_v17, %v4440_v49 }
 0x1bf   : > { %v4495_v8 = vpop.f32.mrb[72].mxu0  ;;  %v6127_v11 = vadd.f32 %v4442_v5, %v5965_v6 }
 0x1c0   : > { %v4496_v52 = vpop.f32.mrb[73].mxu0 }
 0x1c1   : > { %v4497_v31 = vadd.f32 %v4496_v52, %v4495_v8  ;;  %v4498_v9 = vpop.f32.mrb[74].mxu0  ;;  %v4571_v61 = vpop.f32.mrb[80].mxu1 }
 0x1c2   : > { %v4499_v20 = vpop.f32.mrb[75].mxu0  ;;  %v4572_v15 = vpop.f32.mrb[81].mxu1 }
 0x1c3   : > { %v6130_v58 = vadd.f32 %v4497_v31, %v6045_v21  ;;  %v4500_v19 = vadd.f32 %v4499_v20, %v4498_v9  ;;  %v4573_v16 = vadd.f32 %v4572_v15, %v4571_v61  ;;  %v4574_v13 = vpop.f32.mrb[82].mxu1 }
 0x1c4   : > { %v4575_v27 = vpop.f32.mrb[83].mxu1 }
 0x1c5   : > { %v6133_v48 = vadd.f32 %v4500_v19, %v6047_v53  ;;  %v4576_v4 = vadd.f32 %v4575_v27, %v4574_v13  ;;  %v6136_v28 = vadd.f32 %v4573_v16, %v6062_v38 }
 0x1c7   : > { %v4501_v6 = vpop.f32.mrb[76].mxu0  ;;  %v6139_v42 = vadd.f32 %v4576_v4, %v6065_v39 }
 0x1c8   : > { %v4502_v0 = vpop.f32.mrb[77].mxu0 }
 0x1c9   : > { %v4503_v33 = vadd.f32 %v4502_v0, %v4501_v6  ;;  %v4504_v21 = vpop.f32.mrb[78].mxu0  ;;  %v4577_v63 = vpop.f32.mrb[84].mxu1 }
 0x1ca   : > { %v4505_v40 = vpop.f32.mrb[79].mxu0  ;;  %v4578_v53 = vpop.f32.mrb[85].mxu1 }
 0x1cb   : > { %v6142_v30 = vadd.f32 %v4503_v33, %v6049_v57  ;;  %v4506_v14 = vadd.f32 %v4505_v40, %v4504_v21  ;;  %v4579_v36 = vadd.f32 %v4578_v53, %v4577_v63  ;;  %v4580_v32 = vpop.f32.mrb[86].mxu1 }
 0x1cc   : > { %v4581_v38 = vpop.f32.mrb[87].mxu1 }
 0x1cd   : > { %v6145_v29 = vadd.f32 %v4506_v14, %v6051_v43  ;;  %v4582_v37 = vadd.f32 %v4581_v38, %v4580_v32  ;;  %v6148_v62 = vadd.f32 %v4579_v36, %v6072_v47 }
 0x1cf   : > { %v4507_v39 = vpop.f32.mrb[80].mxu0  ;;  %v6151_v49 = vadd.f32 %v4582_v37, %v6075_v24 }
 0x1d0   : > { %v4508_v23 = vpop.f32.mrb[81].mxu0 }
 0x1d1   : > { %v4509_v17 = vadd.f32 %v4508_v23, %v4507_v39  ;;  %v4510_v57 = vpop.f32.mrb[82].mxu0  ;;  %v4583_v8 = vpop.f32.mrb[88].mxu1 }
 0x1d2   : > { %v4511_v5 = vpop.f32.mrb[83].mxu0  ;;  %v4584_v43 = vpop.f32.mrb[89].mxu1 }
 0x1d3   : > { %v6154_v52 = vadd.f32 %v4509_v17, %v6053_v60  ;;  %v4512_v31 = vadd.f32 %v4511_v5, %v4510_v57  ;;  %v4585_v9 = vadd.f32 %v4584_v43, %v4583_v8  ;;  %v4586_v20 = vpop.f32.mrb[90].mxu1 }
 0x1d4   : > { %v4587_v47 = vpop.f32.mrb[91].mxu1 }
 0x1d5   : > { %v6157_v61 = vadd.f32 %v4512_v31, %v6055_v3  ;;  %v4588_v19 = vadd.f32 %v4587_v47, %v4586_v20  ;;  %v6160_v15 = vadd.f32 %v4585_v9, %v6082_v7 }
 0x1d7   : > { %v4513_v24 = vpop.f32.mrb[84].mxu0  ;;  %v6163_v13 = vadd.f32 %v4588_v19, %v6085_v2 }
 0x1d8   : > { %v4514_v16 = vpop.f32.mrb[85].mxu0 }
 0x1d9   : > { %v4515_v27 = vadd.f32 %v4514_v16, %v4513_v24  ;;  %v4516_v60 = vpop.f32.mrb[86].mxu0  ;;  %v4589_v6 = vpop.f32.mrb[92].mxu1 }
 0x1da   : > { %v4517_v4 = vpop.f32.mrb[87].mxu0  ;;  %v4590_v3 = vpop.f32.mrb[93].mxu1 }
 0x1db   : > { %v6166_v0 = vadd.f32 %v4515_v27, %v6057_v41  ;;  %v4518_v33 = vadd.f32 %v4517_v4, %v4516_v60  ;;  %v4591_v21 = vadd.f32 %v4590_v3, %v4589_v6  ;;  %v4592_v40 = vpop.f32.mrb[94].mxu1 }
 0x1dc   : > { %v4593_v7 = vpop.f32.mrb[95].mxu1 }
 0x1dd   : > { %v6169_v63 = vadd.f32 %v4518_v33, %v6059_v26  ;;  %v4594_v14 = vadd.f32 %v4593_v7, %v4592_v40  ;;  %v6172_v53 = vadd.f32 %v4591_v21, %v6094_v1 }
 0x1df   : > { %v4519_v2 = vpop.f32.mrb[88].mxu0  ;;  %v6175_v32 = vadd.f32 %v4594_v14, %v6097_v45 }
 0x1e0   : > { %v4520_v36 = vpop.f32.mrb[89].mxu0 }
 0x1e1   : > { %v4521_v38 = vadd.f32 %v4520_v36, %v4519_v2  ;;  %v4522_v41 = vpop.f32.mrb[90].mxu0  ;;  %v4595_v39 = vpop.f32.mrb[96].mxu1 }
 0x1e2   : > { %v4523_v37 = vpop.f32.mrb[91].mxu0  ;;  %v4596_v26 = vpop.f32.mrb[97].mxu1 }
 0x1e3   : > { %v6178_v23 = vadd.f32 %v4521_v38, %v6067_v35  ;;  %v4524_v17 = vadd.f32 %v4523_v37, %v4522_v41  ;;  %v4597_v57 = vadd.f32 %v4596_v26, %v4595_v39  ;;  %v4598_v5 = vpop.f32.mrb[98].mxu1 }
 0x1e4   : > { %v4599_v1 = vpop.f32.mrb[99].mxu1 }
 0x1e5   : > { %v6181_v8 = vadd.f32 %v4524_v17, %v6069_v50  ;;  %v4600_v31 = vadd.f32 %v4599_v1, %v4598_v5  ;;  %v6184_v43 = vadd.f32 %v4597_v57, %v6106_v59 }
 0x1e7   : > { %v4525_v45 = vpop.f32.mrb[92].mxu0  ;;  %v6187_v20 = vadd.f32 %v4600_v31, %v6109_v56 }
 0x1e8   : > { %v4526_v9 = vpop.f32.mrb[93].mxu0 }
 0x1e9   : > { %v4527_v47 = vadd.f32 %v4526_v9, %v4525_v45  ;;  %v4528_v35 = vpop.f32.mrb[94].mxu0  ;;  %v4601_v24 = vpop.f32.mrb[100].mxu1 }
 0x1ea   : > { %v4529_v19 = vpop.f32.mrb[95].mxu0  ;;  %v4602_v50 = vpop.f32.mrb[101].mxu1 }
 0x1eb   : > { %v6190_v16 = vadd.f32 %v4527_v47, %v6077_v12  ;;  %v4530_v27 = vadd.f32 %v4529_v19, %v4528_v35  ;;  %v4603_v60 = vadd.f32 %v4602_v50, %v4601_v24  ;;  %v4604_v4 = vpop.f32.mrb[102].mxu1 }
 0x1ec   : > { %v4605_v59 = vpop.f32.mrb[103].mxu1 }
 0x1ed   : > { %v6193_v6 = vadd.f32 %v4530_v27, %v6079_v25  ;;  %v4606_v33 = vadd.f32 %v4605_v59, %v4604_v4  ;;  %v6196_v3 = vadd.f32 %v4603_v60, %v6118_v44 }
 0x1ef   : > { %v4531_v56 = vpop.f32.mrb[96].mxu0  ;;  %v6199_v40 = vadd.f32 %v4606_v33, %v6121_v55 }
 0x1f0   : > { %v4532_v21 = vpop.f32.mrb[97].mxu0 }
 0x1f1   : > { %v4533_v7 = vadd.f32 %v4532_v21, %v4531_v56  ;;  %v4534_v12 = vpop.f32.mrb[98].mxu0  ;;  %v4607_v2 = vpop.f32.mrb[104].mxu1 }
 0x1f2   : > { %v4535_v14 = vpop.f32.mrb[99].mxu0  ;;  %v4608_v25 = vpop.f32.mrb[105].mxu1 }
 0x1f3   : > { %v6202_v36 = vadd.f32 %v4533_v7, %v6088_v54  ;;  %v4536_v38 = vadd.f32 %v4535_v14, %v4534_v12  ;;  %v4609_v41 = vadd.f32 %v4608_v25, %v4607_v2  ;;  %v4610_v37 = vpop.f32.mrb[106].mxu1 }
 0x1f4   : > { %v4611_v44 = vpop.f32.mrb[107].mxu1 }
 0x1f5   : > { %v6205_v39 = vadd.f32 %v4536_v38, %v6091_v18  ;;  %v4612_v17 = vadd.f32 %v4611_v44, %v4610_v37  ;;  %v6208_v26 = vadd.f32 %v4609_v41, %v6130_v58 }
 0x1f7   : > { %v4537_v55 = vpop.f32.mrb[100].mxu0  ;;  %v6211_v5 = vadd.f32 %v4612_v17, %v6133_v48 }
 0x1f8   : > { %v4538_v57 = vpop.f32.mrb[101].mxu0 }
 0x1f9   : > { %v4539_v1 = vadd.f32 %v4538_v57, %v4537_v55  ;;  %v4540_v54 = vpop.f32.mrb[102].mxu0  ;;  %v4613_v45 = vpop.f32.mrb[108].mxu1 }
 0x1fa   : > { %v4541_v31 = vpop.f32.mrb[103].mxu0  ;;  %v4614_v18 = vpop.f32.mrb[109].mxu1 }
 0x1fb   : > { %v6214_v9 = vadd.f32 %v4539_v1, %v6100_v51  ;;  %v4542_v47 = vadd.f32 %v4541_v31, %v4540_v54  ;;  %v4615_v35 = vadd.f32 %v4614_v18, %v4613_v45  ;;  %v4616_v19 = vpop.f32.mrb[110].mxu1 }
 0x1fc   : > { %v4617_v58 = vpop.f32.mrb[111].mxu1 }
 0x1fd   : > { %v6217_v24 = vadd.f32 %v4542_v47, %v6103_v22  ;;  %v4618_v27 = vadd.f32 %v4617_v58, %v4616_v19  ;;  %v6220_v50 = vadd.f32 %v4615_v35, %v6142_v30 }
 0x1ff   : > { %v4543_v48 = vpop.f32.mrb[104].mxu0  ;;  %v6223_v4 = vadd.f32 %v4618_v27, %v6145_v29 }
 0x200   : > { %v4544_v60 = vpop.f32.mrb[105].mxu0 }
 0x201   : > { %v4545_v59 = vadd.f32 %v4544_v60, %v4543_v48  ;;  %v4546_v51 = vpop.f32.mrb[106].mxu0  ;;  %v4619_v56 = vpop.f32.mrb[112].mxu1 }
 0x202   : > { %v4547_v33 = vpop.f32.mrb[107].mxu0  ;;  %v4620_v22 = vpop.f32.mrb[113].mxu1 }
 0x203   : > { %v6226_v21 = vadd.f32 %v4545_v59, %v6112_v10  ;;  %v4548_v7 = vadd.f32 %v4547_v33, %v4546_v51  ;;  %v4621_v12 = vadd.f32 %v4620_v22, %v4619_v56  ;;  %v4622_v14 = vpop.f32.mrb[114].mxu1 }
 0x204   : > { %v4623_v30 = vpop.f32.mrb[115].mxu1 }
 0x205   : > { %v6229_v2 = vadd.f32 %v4548_v7, %v6115_v46  ;;  %v4624_v38 = vadd.f32 %v4623_v30, %v4622_v14  ;;  %v6232_v25 = vadd.f32 %v4621_v12, %v6154_v52 }
 0x207   : > { %v4549_v29 = vpop.f32.mrb[108].mxu0  ;;  %v6235_v37 = vadd.f32 %v4624_v38, %v6157_v61 }
 0x208   : > { %v4550_v41 = vpop.f32.mrb[109].mxu0 }
 0x209   : > { %v4551_v44 = vadd.f32 %v4550_v41, %v4549_v29  ;;  %v4552_v10 = vpop.f32.mrb[110].mxu0  ;;  %v4625_v55 = vpop.f32.mrb[116].mxu1 }
 0x20a   : > { %v4553_v17 = vpop.f32.mrb[111].mxu0  ;;  %v4626_v46 = vpop.f32.mrb[117].mxu1 }
 0x20b   : > { %v6238_v57 = vadd.f32 %v4551_v44, %v6124_v34  ;;  %v4554_v1 = vadd.f32 %v4553_v17, %v4552_v10  ;;  %v4627_v54 = vadd.f32 %v4626_v46, %v4625_v55  ;;  %v4628_v31 = vpop.f32.mrb[118].mxu1 }
 0x20c   : > { %v4629_v45 = vpop.f32.mrb[119].mxu1 }
 0x20d   : > { %v6241_v52 = vadd.f32 %v4554_v1, %v6127_v11  ;;  %v4630_v47 = vadd.f32 %v4629_v45, %v4628_v31  ;;  %v6244_v61 = vadd.f32 %v4627_v54, %v6166_v0 }
 0x20f   : > { %v4709_v18 = vpop.f32.mrb[112].mxu0  ;;  %v6248_v34 = vadd.f32 %v4630_v47, %v6169_v63 }
 0x210   : > { %v3199_v35 = vadd.f32 %v4709_v18, %v6148_v62  ;;  %v3190_v19 = vpop.f32.mrb[113].mxu0 }
 0x211   : > { %v3191_v58 = vadd.f32 %v3190_v19, %v6136_v28  ;;  %v4710_v27 = vpop.f32.mrb[114].mxu0  ;;  %v4631_v11 = vpop.f32.mrb[120].mxu1 }
 0x212   : > { %v3202_v48 = vadd.f32 %v4710_v27, %v6151_v49  ;;  %v3193_v60 = vpop.f32.mrb[115].mxu0  ;;  %v4632_v62 = vpop.f32.mrb[121].mxu1  ;;  %v3356_v14 = vmul.f32 %v3199_v35, %v3199_v35 }
 0x213   : > { %v3194_v0 = vadd.f32 %v3193_v60, %v6139_v42  ;;  %v4633_v63 = vadd.f32 %v4632_v62, %v4631_v11  ;;  %v4634_v51 = vpop.f32.mrb[122].mxu1  ;;  %v3354_v33 = vmul.f32 %v3191_v58, %v3191_v58 }
 0x214   : > { %v4116_v59 = vpack.c.bf16 %v3202_v48, %v3199_v35  ;;  %v4635_v49 = vpop.f32.mrb[123].mxu1  ;;  %v3357_v10 = vmul.f32 %v3202_v48, %v3202_v48 }
 0x215   : > { %v3317_v28 = vadd.f32 %v3194_v0, %v3191_v58  ;;  %v3355_v56 = vmul.f32 %v3194_v0, %v3194_v0  ;;  %v4111_v7 = vpack.c.bf16 %v3194_v0, %v3191_v58  ;;  %v4636_v22 = vadd.f32 %v4635_v49, %v4634_v51 }
 0x216   : > { %4204 = vst [vmem:[%s6256_s20 + $0x8] sm:$0xff] %v4116_v59   ;;  %v6261_v12 = vadd.f32 %v4633_v63, %v6178_v23 }
 0x217   : > { %v3318_v30 = vadd.f32 %v3317_v28, %v3199_v35  ;;  %v3386_v38 = vadd.f32 %v3355_v56, %v3354_v33  ;;  %4112 = vst [vmem:[%s6256_s20] sm:$0xff] %v4111_v7   ;;  %v4713_v42 = vpop.f32.mrb[116].mxu0  ;;  %v6266_v44 = vadd.f32 %v4636_v22, %v6181_v8 }
 0x218   : > { %v3215_v29 = vadd.f32 %v4713_v42, %v6172_v53  ;;  %v3206_v41 = vpop.f32.mrb[117].mxu0 }
 0x219   : > { %v3387_v17 = vadd.f32 %v3386_v38, %v3356_v14  ;;  %v3207_v55 = vadd.f32 %v3206_v41, %v6160_v15  ;;  %v3319_v1 = vadd.f32 %v3318_v30, %v3202_v48  ;;  %v4714_v46 = vpop.f32.mrb[118].mxu0  ;;  %v4637_v31 = vpop.f32.mrb[124].mxu1 }
 0x21a   : > { %v3218_v23 = vadd.f32 %v4714_v46, %v6175_v32  ;;  %v3209_v54 = vpop.f32.mrb[119].mxu0  ;;  %v4638_v35 = vpop.f32.mrb[125].mxu1  ;;  %v3360_v62 = vmul.f32 %v3215_v29, %v3215_v29 }
 0x21b   : > { %v3320_v45 = vadd.f32 %v3319_v1, %v3207_v55  ;;  %v3358_v47 = vmul.f32 %v3207_v55, %v3207_v55  ;;  %v3388_v18 = vadd.f32 %v3387_v17, %v3357_v10  ;;  %v3210_v53 = vadd.f32 %v3209_v54, %v6163_v13  ;;  %v4640_v58 = vpop.f32.mrb[126].mxu1 }
 0x21c   : > { %v4126_v8 = vpack.c.bf16 %v3218_v23, %v3215_v29  ;;  %v4639_v19 = vadd.f32 %v4638_v35, %v4637_v31  ;;  %v4641_v11 = vpop.f32.mrb[127].mxu1  ;;  %v3361_v56 = vmul.f32 %v3218_v23, %v3218_v23 }
 0x21d   : > { %v3389_v27 = vadd.f32 %v3388_v18, %v3358_v47  ;;  %v3321_v60 = vadd.f32 %v3320_v45, %v3210_v53  ;;  %v3359_v15 = vmul.f32 %v3210_v53, %v3210_v53  ;;  %v4121_v48 = vpack.c.bf16 %v3210_v53, %v3207_v55 }
 0x21e   : > { %4206 = vst [vmem:[%s6256_s20 + $0x18] sm:$0xff] %v4126_v8   ;;  %v4642_v32 = vadd.f32 %v4641_v11, %v4640_v58  ;;  %v6273_v0 = vadd.f32 %v4639_v19, %v6190_v16 }
 0x21f   : > { %v3322_v59 = vadd.f32 %v3321_v60, %v3215_v29  ;;  %v3390_v63 = vadd.f32 %v3389_v27, %v3359_v15  ;;  %4205 = vst [vmem:[%s6256_s20 + $0x10] sm:$0xff] %v4121_v48   ;;  %v4717_v13 = vpop.f32.mrb[120].mxu0 }
 0x220   : > { %v3231_v51 = vadd.f32 %v4717_v13, %v6196_v3  ;;  %v3222_v33 = vpop.f32.mrb[121].mxu0  ;;  %v6278_v28 = vadd.f32 %v4642_v32, %v6193_v6 }
 0x221   : > { %v3391_v7 = vadd.f32 %v3390_v63, %v3360_v62  ;;  %v3223_v49 = vadd.f32 %v3222_v33, %v6184_v43  ;;  %v3323_v22 = vadd.f32 %v3322_v59, %v3218_v23  ;;  %v4718_v14 = vpop.f32.mrb[122].mxu0  ;;  %v4643_v38 = vpop.f32.mrb[128].mxu1 }
 0x222   : > { %v3234_v16 = vadd.f32 %v4718_v14, %v6199_v40  ;;  %v3225_v30 = vpop.f32.mrb[123].mxu0  ;;  %v4644_v10 = vpop.f32.mrb[129].mxu1  ;;  %v3364_v45 = vmul.f32 %v3231_v51, %v3231_v51 }
 0x223   : > { %v3324_v42 = vadd.f32 %v3323_v22, %v3223_v49  ;;  %v3362_v29 = vmul.f32 %v3223_v49, %v3223_v49  ;;  %v3392_v41 = vadd.f32 %v3391_v7, %v3361_v56  ;;  %v3226_v3 = vadd.f32 %v3225_v30, %v6187_v20  ;;  %v4646_v55 = vpop.f32.mrb[130].mxu1 }
 0x224   : > { %v4136_v6 = vpack.c.bf16 %v3234_v16, %v3231_v51  ;;  %v4645_v17 = vadd.f32 %v4644_v10, %v4643_v38  ;;  %v4647_v54 = vpop.f32.mrb[131].mxu1  ;;  %v3365_v19 = vmul.f32 %v3234_v16, %v3234_v16 }
 0x225   : > { %v3393_v1 = vadd.f32 %v3392_v41, %v3362_v29  ;;  %v3325_v46 = vadd.f32 %v3324_v42, %v3226_v3  ;;  %v3363_v43 = vmul.f32 %v3226_v3, %v3226_v3  ;;  %v4131_v23 = vpack.c.bf16 %v3226_v3, %v3223_v49 }
 0x226   : > { %4208 = vst [vmem:[%s6256_s20 + $0x28] sm:$0xff] %v4136_v6   ;;  %v4648_v40 = vadd.f32 %v4647_v54, %v4646_v55  ;;  %v6285_v31 = vadd.f32 %v4645_v17, %v6202_v36 }
 0x227   : > { %v3326_v47 = vadd.f32 %v3325_v46, %v3231_v51  ;;  %v3394_v18 = vadd.f32 %v3393_v1, %v3363_v43  ;;  %4207 = vst [vmem:[%s6256_s20 + $0x20] sm:$0xff] %v4131_v23   ;;  %v4721_v20 = vpop.f32.mrb[124].mxu0 }
 0x228   : > { %v3247_v53 = vadd.f32 %v4721_v20, %v6220_v50  ;;  %v3238_v35 = vpop.f32.mrb[125].mxu0  ;;  %v6290_v8 = vadd.f32 %v4648_v40, %v6205_v39 }
 0x229   : > { %v3395_v58 = vadd.f32 %v3394_v18, %v3364_v45  ;;  %v3239_v27 = vadd.f32 %v3238_v35, %v6208_v26  ;;  %v3327_v60 = vadd.f32 %v3326_v47, %v3234_v16  ;;  %v4722_v15 = vpop.f32.mrb[126].mxu0  ;;  %v4649_v11 = vpop.f32.mrb[132].mxu1 }
 0x22a   : > { %v3250_v36 = vadd.f32 %v4722_v15, %v6223_v4  ;;  %v3241_v48 = vpop.f32.mrb[127].mxu0  ;;  %v4650_v63 = vpop.f32.mrb[133].mxu1  ;;  %v3368_v14 = vmul.f32 %v3247_v53, %v3247_v53 }
 0x22b   : > { %v3328_v32 = vadd.f32 %v3327_v60, %v3239_v27  ;;  %v3366_v62 = vmul.f32 %v3239_v27, %v3239_v27  ;;  %v3396_v59 = vadd.f32 %v3395_v58, %v3365_v19  ;;  %v3242_v50 = vadd.f32 %v3241_v48, %v6211_v5  ;;  %v4652_v51 = vpop.f32.mrb[134].mxu1 }
 0x22c   : > { %v4146_v39 = vpack.c.bf16 %v3250_v36, %v3247_v53  ;;  %v4651_v13 = vadd.f32 %v4650_v63, %v4649_v11  ;;  %v4653_v49 = vpop.f32.mrb[135].mxu1  ;;  %v3369_v41 = vmul.f32 %v3250_v36, %v3250_v36 }
 0x22d   : > { %v3397_v33 = vadd.f32 %v3396_v59, %v3366_v62  ;;  %v3329_v56 = vadd.f32 %v3328_v32, %v3242_v50  ;;  %v3367_v26 = vmul.f32 %v3242_v50, %v3242_v50  ;;  %v4141_v7 = vpack.c.bf16 %v3242_v50, %v3239_v27 }
 0x22e   : > { %4210 = vst [vmem:[%s6256_s20 + $0x38] sm:$0xff] %v4146_v39   ;;  %v4654_v4 = vadd.f32 %v4653_v49, %v4652_v51  ;;  %v6297_v22 = vadd.f32 %v4651_v13, %v6214_v9 }
 0x22f   : > { %v3330_v16 = vadd.f32 %v3329_v56, %v3247_v53  ;;  %v3398_v30 = vadd.f32 %v3397_v33, %v3367_v26  ;;  %4209 = vst [vmem:[%s6256_s20 + $0x30] sm:$0xff] %v4141_v7   ;;  %v4725_v5 = vpop.f32.mrb[128].mxu0 }
 0x230   : > { %v3263_v38 = vadd.f32 %v4725_v5, %v6244_v61  ;;  %v3254_v42 = vpop.f32.mrb[129].mxu0  ;;  %v6302_v29 = vadd.f32 %v4654_v4, %v6217_v24 }
 0x231   : > { %v3399_v3 = vadd.f32 %v3398_v30, %v3368_v14  ;;  %v3255_v10 = vadd.f32 %v3254_v42, %v6232_v25  ;;  %v3331_v6 = vadd.f32 %v3330_v16, %v3250_v36  ;;  %v4726_v17 = vpop.f32.mrb[130].mxu0  ;;  %v4655_v1 = vpop.f32.mrb[136].mxu1 }
 0x232   : > { %v3266_v9 = vadd.f32 %v4726_v17, %v6248_v34  ;;  %v3257_v55 = vpop.f32.mrb[131].mxu0  ;;  %v4656_v54 = vpop.f32.mrb[137].mxu1  ;;  %v3372_v19 = vmul.f32 %v3263_v38, %v3263_v38 }
 0x233   : > { %v3332_v46 = vadd.f32 %v3331_v6, %v3255_v10  ;;  %v3370_v43 = vmul.f32 %v3255_v10, %v3255_v10  ;;  %v3400_v23 = vadd.f32 %v3399_v3, %v3369_v41  ;;  %v3258_v61 = vadd.f32 %v3257_v55, %v6235_v37  ;;  %v4658_v45 = vpop.f32.mrb[138].mxu1 }
 0x234   : > { %v4156_v24 = vpack.c.bf16 %v3266_v9, %v3263_v38  ;;  %v4657_v40 = vadd.f32 %v4656_v54, %v4655_v1  ;;  %v4659_v53 = vpop.f32.mrb[139].mxu1  ;;  %v3373_v48 = vmul.f32 %v3266_v9, %v3266_v9 }
 0x235   : > { %v3401_v47 = vadd.f32 %v3400_v23, %v3370_v43  ;;  %v3333_v18 = vadd.f32 %v3332_v46, %v3258_v61  ;;  %v3371_v25 = vmul.f32 %v3258_v61, %v3258_v61  ;;  %v4151_v20 = vpack.c.bf16 %v3258_v61, %v3255_v10 }
 0x236   : > { %4212 = vst [vmem:[%s6256_s20 + $0x48] sm:$0xff] %v4156_v24   ;;  %v4660_v34 = vadd.f32 %v4659_v53, %v4658_v45  ;;  %v6309_v35 = vadd.f32 %v4657_v40, %v6226_v21 }
 0x237   : > { %v3334_v58 = vadd.f32 %v3333_v18, %v3263_v38  ;;  %v3402_v27 = vadd.f32 %v3401_v47, %v3371_v25  ;;  %4211 = vst [vmem:[%s6256_s20 + $0x40] sm:$0xff] %v4151_v20   ;;  %v4729_v37 = vpop.f32.mrb[132].mxu0 }
 0x238   : > { %v3279_v60 = vadd.f32 %v4729_v37, %v6273_v0  ;;  %v3270_v15 = vpop.f32.mrb[133].mxu0  ;;  %v6314_v36 = vadd.f32 %v4660_v34, %v6229_v2 }
 0x239   : > { %v3403_v11 = vadd.f32 %v3402_v27, %v3372_v19  ;;  %v3271_v32 = vadd.f32 %v3270_v15, %v6261_v12  ;;  %v3335_v62 = vadd.f32 %v3334_v58, %v3266_v9  ;;  %v4730_v59 = vpop.f32.mrb[134].mxu0  ;;  %v4661_v63 = vpop.f32.mrb[140].mxu1 }
 0x23a   : > { %v3282_v21 = vadd.f32 %v4730_v59, %v6278_v28  ;;  %v3273_v50 = vpop.f32.mrb[135].mxu0  ;;  %v4662_v33 = vpop.f32.mrb[141].mxu1  ;;  %v3376_v30 = vmul.f32 %v3279_v60, %v3279_v60 }
 0x23b   : > { %v3336_v39 = vadd.f32 %v3335_v62, %v3271_v32  ;;  %v3374_v13 = vmul.f32 %v3271_v32, %v3271_v32  ;;  %v3404_v51 = vadd.f32 %v3403_v11, %v3373_v48  ;;  %v3274_v0 = vadd.f32 %v3273_v50, %v6266_v44  ;;  %v4664_v26 = vpop.f32.mrb[142].mxu1 }
 0x23c   : > { %v4166_v2 = vpack.c.bf16 %v3282_v21, %v3279_v60  ;;  %v4663_v56 = vadd.f32 %v4662_v33, %v4661_v63  ;;  %v4665_v14 = vpop.f32.mrb[143].mxu1  ;;  %v3377_v10 = vmul.f32 %v3282_v21, %v3282_v21 }
 0x23d   : > { %v3405_v7 = vadd.f32 %v3404_v51, %v3374_v13  ;;  %v3337_v49 = vadd.f32 %v3336_v39, %v3274_v0  ;;  %v3375_v12 = vmul.f32 %v3274_v0, %v3274_v0  ;;  %v4161_v4 = vpack.c.bf16 %v3274_v0, %v3271_v32 }
 0x23e   : > { %4214 = vst [vmem:[%s6256_s20 + $0x58] sm:$0xff] %v4166_v2   ;;  %v3150_v28 = vadd.f32 %v4663_v56, %v6238_v57  ;;  %v4666_v16 = vadd.f32 %v4665_v14, %v4664_v26 }
 0x23f   : > { %v3338_v5 = vadd.f32 %v3337_v49, %v3279_v60  ;;  %v3406_v38 = vadd.f32 %v3405_v7, %v3375_v12  ;;  %4213 = vst [vmem:[%s6256_s20 + $0x50] sm:$0xff] %v4161_v4   ;;  %v4733_v42 = vpop.f32.mrb[136].mxu0 }
 0x240   : > { %v3295_v44 = vadd.f32 %v4733_v42, %v6297_v22  ;;  %v3286_v41 = vpop.f32.mrb[137].mxu0  ;;  %v3153_v3 = vadd.f32 %v4666_v16, %v6241_v52 }
 0x241   : > { %v3407_v6 = vadd.f32 %v3406_v38, %v3376_v30  ;;  %v3287_v17 = vadd.f32 %v3286_v41, %v6285_v31  ;;  %v3339_v9 = vadd.f32 %v3338_v5, %v3282_v21  ;;  %v4734_v55 = vpop.f32.mrb[138].mxu0 }
 0x242   : > { %v3298_v57 = vadd.f32 %v4734_v55, %v6302_v29  ;;  %v3289_v1 = vpop.f32.mrb[139].mxu0  ;;  %v3380_v45 = vmul.f32 %v3295_v44, %v3295_v44 }
 0x243   : > { %v3340_v46 = vadd.f32 %v3339_v9, %v3287_v17  ;;  %v3378_v43 = vmul.f32 %v3287_v17, %v3287_v17  ;;  %v3408_v23 = vadd.f32 %v3407_v6, %v3377_v10  ;;  %v3290_v61 = vadd.f32 %v3289_v1, %v6290_v8 }
 0x244   : > { %v4176_v22 = vpack.c.bf16 %v3298_v57, %v3295_v44  ;;  %v3381_v29 = vmul.f32 %v3298_v57, %v3298_v57 }
 0x245   : > { %v3409_v54 = vadd.f32 %v3408_v23, %v3378_v43  ;;  %v3341_v24 = vadd.f32 %v3340_v46, %v3290_v61  ;;  %v3379_v52 = vmul.f32 %v3290_v61, %v3290_v61  ;;  %v4171_v40 = vpack.c.bf16 %v3290_v61, %v3287_v17 }
 0x246   : > { %4216 = vst [vmem:[%s6256_s20 + $0x68] sm:$0xff] %v4176_v22  }
 0x247   : > { %v3342_v47 = vadd.f32 %v3341_v24, %v3295_v44  ;;  %v3410_v31 = vadd.f32 %v3409_v54, %v3379_v52  ;;  %4215 = vst [vmem:[%s6256_s20 + $0x60] sm:$0xff] %v4171_v40   ;;  %v4737_v18 = vpop.f32.mrb[140].mxu0 }
 0x248   : > { %v3311_v25 = vadd.f32 %v4737_v18, %v3150_v28  ;;  %v3302_v20 = vpop.f32.mrb[141].mxu0 }
 0x249   : > { %v3411_v53 = vadd.f32 %v3410_v31, %v3380_v45  ;;  %v3303_v34 = vadd.f32 %v3302_v20, %v6309_v35  ;;  %v3343_v19 = vadd.f32 %v3342_v47, %v3298_v57  ;;  %v4738_v8 = vpop.f32.mrb[142].mxu0 }
 0x24a   : > { %v3314_v58 = vadd.f32 %v4738_v8, %v3153_v3  ;;  %v3305_v27 = vpop.f32.mrb[143].mxu0  ;;  %v3384_v11 = vmul.f32 %v3311_v25, %v3311_v25 }
 0x24b   : > { %v3344_v37 = vadd.f32 %v3343_v19, %v3303_v34  ;;  %v3382_v60 = vmul.f32 %v3303_v34, %v3303_v34  ;;  %v3412_v15 = vadd.f32 %v3411_v53, %v3381_v29  ;;  %v3306_v48 = vadd.f32 %v3305_v27, %v6314_v36 }
 0x24c   : > { %v4186_v32 = vpack.c.bf16 %v3314_v58, %v3311_v25  ;;  %v3385_v63 = vmul.f32 %v3314_v58, %v3314_v58 }
 0x24d   : > { %v3413_v62 = vadd.f32 %v3412_v15, %v3382_v60  ;;  %v3345_v59 = vadd.f32 %v3344_v37, %v3306_v48  ;;  %v3383_v21 = vmul.f32 %v3306_v48, %v3306_v48  ;;  %v4181_v50 = vpack.c.bf16 %v3306_v48, %v3303_v34 }
 0x24e   : > { %4218 = vst [vmem:[%s6256_s20 + $0x78] sm:$0xff] %v4186_v32  }
 0x24f   : > { %v3346_v35 = vadd.f32 %v3345_v59, %v3311_v25  ;;  %v3414_v39 = vadd.f32 %v3413_v62, %v3383_v21  ;;  %4217 = vst [vmem:[%s6256_s20 + $0x70] sm:$0xff] %v4181_v50  }
 0x251   : > { %v3347_v13 = vadd.f32 %v3346_v35, %v3314_v58  ;;  %v3415_v51 = vadd.f32 %v3414_v39, %v3384_v11 }
 0x253   : > { %v3348_v0 = vrot.slane %v3347_v13, 4  ;;  %v3416_v33 = vadd.f32 %v3415_v51, %v3385_v63 }
 0x255   : > { %v3349_v2 = vadd.f32 %v3348_v0, %v3347_v13  ;;  %v3417_v56 = vrot.slane %v3416_v33, 4 }
 0x257   : > { %v3350_v26 = vrot.slane %v3349_v2, 2  ;;  %v3418_v36 = vadd.f32 %v3417_v56, %v3416_v33 }
 0x259   : > { %v3351_v7 = vadd.f32 %v3350_v26, %v3349_v2  ;;  %v3419_v49 = vrot.slane %v3418_v36, 2 }
 0x25b   : > { %v3352_v12 = vrot.slane %v3351_v7, 1  ;;  %v3420_v4 = vadd.f32 %v3419_v49, %v3418_v36 }
 0x25d   : > { %v3421_v14 = vrot.slane %v3420_v4, 1  ;;  %v3353_v28 = vadd.f32 %v3352_v12, %v3351_v7 }
 0x25f   : > { %v3422_v16 = vadd.f32 %v3421_v14, %v3420_v4 }
 0x261   : > { %v3424_v30 = vsel %vm1068_vm1, %v3353_v28, %v3422_v16 }
 0x262   : > { %3425 = vst [vmem:[%s465_s23] sm:$0x3] %v3424_v30 }
 0x263 PF: > { %s18_s26 = sadd.s32 1, %s4924_s26   ;;  %s6363_s24 = smov %s4920_s25 }
 0x264   : > { %p15_p5 = scmp.ge.s32.totalorder %s18_s26, 4   ;;  %s6364_s25 = smov %s6366_s27 }
 0x266   :  { %17 = sbr.rel (!%p15_p5) target bundleno = 2 (0x2), region = 98 }

</bundles_post_ra>
